<compile_context>
chip_gen: v7x
topology: tpu7x:2x2x1
jax: 0.10.0
libtpu: 0.0.40
codegen_flags: <defaults>
</compile_context>

<pallas_src>
import functools

import jax
import jax.numpy as jnp
from jax import lax
from jax.experimental import pallas as pl
from jax.experimental.pallas import tpu as pltpu


def _inverted_residual_kernel(x_ref, w1_ref, b1_ref, wdw_ref, b2_ref,
                              w3_ref, b3_ref, *rest,
                              N, H, W, Chid, stride, use_res):
    if stride == 1:
        out_ref, hp0, hp1, hp2 = rest
        srow_ref = None
    else:
        srow_ref, out_ref, hp0, hp1, hp2 = rest
    WC = W * Chid

    # ---- expand 1x1 conv (BN folded) + ReLU6 ---------------------------
    # One bf16 MXU matmul produces the three dx-shifted copies of the hidden
    # activation (dx = -1, 0, +1) side by side on the lane axis.
    x = x_ref[...]                                            # (N*H, W*Cin) f32
    h1 = jnp.dot(x.astype(jnp.bfloat16), w1_ref[...],
                 preferred_element_type=jnp.float32)          # (N*H, 3*WC)
    h1 = jnp.clip(h1 + b1_ref[...], 0.0, 6.0)

    # Stash each dx copy in a row-padded VMEM scratch; the zero rows at the
    # y borders give the depthwise its vertical zero padding for free.
    zrow = jnp.zeros((N, 1, WC), jnp.float32)
    for j, hp in enumerate((hp0, hp1, hp2)):                  # j - 1 == dx
        hp[:, 0:1, :] = zrow
        hp[:, H + 1:H + 2, :] = zrow
        hp[:, 1:H + 1, :] = h1[:, j * WC:(j + 1) * WC].reshape(N, H, WC)

    # ---- depthwise 3x3 (BN folded) + ReLU6 -----------------------------
    # 9 VPU multiply-accumulates; dy handled by the row window, dx by the
    # pre-shifted copies; invalid border taps are already zeroed in wdw_ref.
    acc = jnp.zeros((N, H, WC), jnp.float32)
    for d in range(3):                                        # d - 1 == dy
        for j, hp in enumerate((hp0, hp1, hp2)):
            k = d * 3 + j
            acc = acc + hp[:, d:d + H, :] * wdw_ref[k:k + 1, :].reshape(1, 1, WC)
    h2 = jnp.clip(acc + b2_ref[...].reshape(1, 1, WC), 0.0, 6.0)
    h2 = h2.reshape(N * H, WC)

    # ---- project 1x1 conv (BN folded, linear) --------------------------
    if stride == 2:
        # Row subsample (y = stride*yo per image) as a tiny 0/1 matmul.
        h2 = jnp.dot(srow_ref[...], h2, preferred_element_type=jnp.float32)
    y = jnp.dot(h2.astype(jnp.bfloat16), w3_ref[...],
                preferred_element_type=jnp.float32)           # (rows, Wo*Cout)
    y = y + b3_ref[...]
    if use_res:                                               # stride==1, Cin==Cout
        y = y + x
    out_ref[...] = y                                          # lane-dense store


def prepare_kernel_params(params, N, H, W, stride):
    """One-time host-side transform of the module parameters into the
    lane-dense, BN-folded, bf16 forms the kernel consumes."""
    f32, bf16 = jnp.float32, jnp.bfloat16
    Cin, Chid = params["w1"].shape
    Cout = params["w3"].shape[1]
    Ho = (H + 2 - 3) // stride + 1
    Wo = (W + 2 - 3) // stride + 1

    # Fold eval-mode BatchNorm scales into the conv weights.
    w1f = params["w1"] * params["s1"]                         # (Cin, Chid)
    wdwf = params["wdw"] * params["s2"].reshape(1, 1, Chid)   # (3, 3, Chid)
    w3f = params["w3"] * params["s3"]                         # (Chid, Cout)

    # Expand conv as a block-banded matrix: output column block xout of band
    # dx applies w1f to input column xout+dx (zero block when out of range).
    xs = jnp.arange(W)
    bands = [jnp.kron((xs[:, None] == xs[None, :] + dx).astype(f32), w1f)
             for dx in (-1, 0, 1)]
    w1cat = jnp.concatenate(bands, axis=1).astype(bf16)       # (W*Cin, 3*W*Chid)
    b1t = jnp.tile(params["b1"], (1, 3 * W))                  # (1, 3*W*Chid)

    # Depthwise weights tiled over W; taps whose dx neighbour is out of range
    # are zeroed (their scratch activations hold ReLU6(b1) garbage).
    wt = jnp.tile(wdwf.reshape(3, 3, 1, Chid), (1, 1, W, 1))  # (3, 3, W, Chid)
    wt = wt.at[:, 0, 0, :].set(0.0)                           # dx=-1 at x=0
    wt = wt.at[:, 2, W - 1, :].set(0.0)                       # dx=+1 at x=W-1
    wdwt = wt.reshape(9, W * Chid)
    b2t = jnp.tile(params["b2"], (1, W))                      # (1, W*Chid)

    # Project conv as a block matrix: output column xo reads input column
    # stride*xo -> also performs the stride-2 column subsampling.
    sel = (xs[:, None] == stride * jnp.arange(Wo)[None, :]).astype(f32)
    w3bd = jnp.kron(sel, w3f).astype(bf16)                    # (W*Chid, Wo*Cout)
    b3t = jnp.tile(params["b3"], (1, Wo))                     # (1, Wo*Cout)

    kp = dict(w1cat=w1cat, b1t=b1t, wdwt=wdwt, b2t=b2t, w3bd=w3bd, b3t=b3t,
              Chid=Chid, Cout=Cout)
    if stride != 1:
        r_out = jnp.arange(N * Ho)
        target = (r_out // Ho) * H + stride * (r_out % Ho)
        kp["srow"] = (jnp.arange(N * H)[None, :] == target[:, None]).astype(f32)
    return kp


def inverted_residual(x_nhwc, kp, *, stride, use_res):
    N, H, W, Cin = x_nhwc.shape
    Chid, Cout = kp["Chid"], kp["Cout"]
    Ho = (H + 2 - 3) // stride + 1
    Wo = (W + 2 - 3) // stride + 1
    assert not use_res or (stride == 1 and Cin == Cout)

    x2d = x_nhwc.reshape(N * H, W * Cin)   # free, contiguous metadata reshape

    kernel = functools.partial(
        _inverted_residual_kernel, N=N, H=H, W=W, Chid=Chid,
        stride=stride, use_res=use_res)

    def full(shape):
        nd = len(shape)
        return pl.BlockSpec(shape, lambda i, _nd=nd: (0,) * _nd)

    inputs = [x2d, kp["w1cat"], kp["b1t"], kp["wdwt"], kp["b2t"],
              kp["w3bd"], kp["b3t"]]
    if stride != 1:
        inputs.append(kp["srow"])

    out2d = pl.pallas_call(
        kernel,
        out_shape=jax.ShapeDtypeStruct((N * Ho, Wo * Cout), jnp.float32),
        grid=(1,),   # whole batch in one step: batch folded into the matmul M
        in_specs=[full(a.shape) for a in inputs],
        out_specs=full((N * Ho, Wo * Cout)),
        scratch_shapes=[pltpu.VMEM((N, H + 2, W * Chid), jnp.float32),
                        pltpu.VMEM((N, H + 2, W * Chid), jnp.float32),
                        pltpu.VMEM((N, H + 2, W * Chid), jnp.float32)],
        compiler_params=pltpu.CompilerParams(
            dimension_semantics=("arbitrary",)),
    )(*inputs)
    return out2d.reshape(N, Ho, Wo, Cout)  # free, contiguous metadata reshape


def make_params(key, inp, oup, expand_ratio):
    assert expand_ratio != 1
    hidden = int(round(inp * expand_ratio))
    ks = jax.random.split(key, 15)

    def bn_fold(kg, kb, km, kv, c):
        gamma = 1.0 + 0.1 * jax.random.normal(kg, (c,), jnp.float32)
        beta = 0.1 * jax.random.normal(kb, (c,), jnp.float32)
        mean = 0.1 * jax.random.normal(km, (c,), jnp.float32)
        var = jnp.abs(jax.random.normal(kv, (c,), jnp.float32)) + 0.5
        scale = gamma / jnp.sqrt(var + 1e-5)
        bias = beta - mean * scale
        return scale.reshape(1, c), bias.reshape(1, c)

    w1 = 0.2 * jax.random.normal(ks[0], (inp, hidden), jnp.float32)
    s1, b1 = bn_fold(ks[1], ks[2], ks[3], ks[4], hidden)
    wdw = 0.2 * jax.random.normal(ks[5], (3, 3, hidden), jnp.float32)
    s2, b2 = bn_fold(ks[6], ks[7], ks[8], ks[9], hidden)
    w3 = 0.2 * jax.random.normal(ks[10], (hidden, oup), jnp.float32)
    s3, b3 = bn_fold(ks[11], ks[12], ks[13], ks[14], oup)
    return dict(w1=w1, s1=s1, b1=b1, wdw=wdw, s2=s2, b2=b2,
                w3=w3, s3=s3, b3=b3)


def ref_forward(x, params, *, stride, use_res):
    """Pure-JAX reference (NHWC, eval-mode BN folded; 1x1-conv operands cast
    to bf16 with f32 accumulation to match the kernel's matmul precision)."""
    bf16, f32 = jnp.bfloat16, jnp.float32
    Chid = params["wdw"].shape[-1]
    w1f = (params["w1"] * params["s1"]).astype(bf16)
    h = jnp.einsum("nhwc,cd->nhwd", x.astype(bf16), w1f,
                   preferred_element_type=f32)
    h = jnp.clip(h + params["b1"], 0.0, 6.0)
    wdwf = params["wdw"] * params["s2"].reshape(1, 1, Chid)
    h = lax.conv_general_dilated(
        h, wdwf.reshape(3, 3, 1, Chid),
        window_strides=(stride, stride), padding=((1, 1), (1, 1)),
        dimension_numbers=("NHWC", "HWIO", "NHWC"),
        feature_group_count=Chid, precision=lax.Precision.HIGHEST)
    h = jnp.clip(h + params["b2"], 0.0, 6.0)
    w3f = (params["w3"] * params["s3"]).astype(bf16)
    y = jnp.einsum("nhwc,cd->nhwd", h.astype(bf16), w3f,
                   preferred_element_type=f32)
    y = y + params["b3"]
    if use_res:
        y = y + x
    return y


if __name__ == "__main__":
    # InvertedResidual(inp=8, oup=8, stride, expand_ratio=6)
    N, H, W = 2, 16, 16
    inp, oup, expand_ratio = 8, 8, 6

    key = jax.random.PRNGKey(0)
    kx, kparam = jax.random.split(key)
    # PyTorch input is NCHW (2, 8, 16, 16); the kernel runs in NHWC.
    x_nchw = jax.random.normal(kx, (N, inp, H, W), jnp.float32)
    x = jnp.transpose(x_nchw, (0, 2, 3, 1))                    # NHWC

    params = make_params(kparam, inp, oup, expand_ratio)

    for stride in (1, 2):
        use_res = (stride == 1) and (inp == oup)
        kp = prepare_kernel_params(params, N, H, W, stride)
        out = inverted_residual(x, kp, stride=stride, use_res=use_res)
        out = jax.block_until_ready(out)
        ref = ref_forward(x, params, stride=stride, use_res=use_res)
        if not jnp.allclose(out, ref, atol=3e-2, rtol=3e-2):
            raise AssertionError(
                f"stride={stride} mismatch: max abs err "
                f"{float(jnp.max(jnp.abs(out - ref)))}")
    print("KERNEL_OK")
</pallas_src>

<mosaic_0001>
module attributes {stable_mosaic.version = 11 : i64} {
  func.func @_inverted_residual_kernel(%arg0: i32, %arg1: memref<32x128xf32, #tpu.memory_space<vmem>>, %arg2: memref<128x2304xbf16, #tpu.memory_space<vmem>>, %arg3: memref<1x2304xf32, #tpu.memory_space<vmem>>, %arg4: memref<9x768xf32, #tpu.memory_space<vmem>>, %arg5: memref<1x768xf32, #tpu.memory_space<vmem>>, %arg6: memref<768x128xbf16, #tpu.memory_space<vmem>>, %arg7: memref<1x128xf32, #tpu.memory_space<vmem>>, %arg8: memref<32x128xf32, #tpu.memory_space<vmem>>, %arg9: memref<2x18x768xf32, #tpu.memory_space<vmem>>, %arg10: memref<2x18x768xf32, #tpu.memory_space<vmem>>, %arg11: memref<2x18x768xf32, #tpu.memory_space<vmem>>) attributes {dimension_semantics = [#tpu.dimension_semantics<arbitrary>], iteration_bounds = array<i64: 1>, scalar_prefetch = 0 : i64, scratch_operands = 3 : i64, tpu.core_type = #tpu.core_type<tc>, window_params = [{pipeline_mode = #tpu.pipeline_mode<synchronous>, transform_indices = @transform_0, window_bounds = array<i64: 32, 128>}, {pipeline_mode = #tpu.pipeline_mode<synchronous>, transform_indices = @transform_1, window_bounds = array<i64: 128, 2304>}, {pipeline_mode = #tpu.pipeline_mode<synchronous>, transform_indices = @transform_2, window_bounds = array<i64: 1, 2304>}, {pipeline_mode = #tpu.pipeline_mode<synchronous>, transform_indices = @transform_3, window_bounds = array<i64: 9, 768>}, {pipeline_mode = #tpu.pipeline_mode<synchronous>, transform_indices = @transform_4, window_bounds = array<i64: 1, 768>}, {pipeline_mode = #tpu.pipeline_mode<synchronous>, transform_indices = @transform_5, window_bounds = array<i64: 768, 128>}, {pipeline_mode = #tpu.pipeline_mode<synchronous>, transform_indices = @transform_6, window_bounds = array<i64: 1, 128>}, {pipeline_mode = #tpu.pipeline_mode<synchronous>, transform_indices = @transform_7, window_bounds = array<i64: 32, 128>}]} {
    %c0 = arith.constant 0 : index
    %c0_0 = arith.constant 0 : index
    %0 = vector.load %arg1[%c0, %c0_0] : memref<32x128xf32, #tpu.memory_space<vmem>>, vector<32x128xf32>
    %1 = arith.truncf %0 : vector<32x128xf32> to vector<32x128xbf16>
    %c0_1 = arith.constant 0 : index
    %c0_2 = arith.constant 0 : index
    %2 = vector.load %arg2[%c0_1, %c0_2] : memref<128x2304xbf16, #tpu.memory_space<vmem>>, vector<128x2304xbf16>
    %cst = arith.constant dense<0.000000e+00> : vector<32x2304xf32>
    %3 = tpu.matmul %1, %2, %cst {dimension_numbers = #tpu.dot_dimension_numbers<[1], [0], [0], [1], [0, 0, 1, 1], [], []>} : vector<32x128xbf16>, vector<128x2304xbf16>, vector<32x2304xf32> -> vector<32x2304xf32>
    %c0_3 = arith.constant 0 : index
    %c0_4 = arith.constant 0 : index
    %4 = vector.load %arg3[%c0_3, %c0_4] : memref<1x2304xf32, #tpu.memory_space<vmem>>, vector<1x2304xf32>
    %5 = vector.broadcast %4 : vector<1x2304xf32> to vector<32x2304xf32>
    %6 = arith.addf %3, %5 : vector<32x2304xf32>
    %cst_5 = arith.constant 0.000000e+00 : f32
    %cst_6 = arith.constant 6.000000e+00 : f32
    %7 = vector.broadcast %cst_5 : f32 to vector<32x2304xf32>
    %8 = arith.maximumf %7, %6 : vector<32x2304xf32>
    %9 = vector.broadcast %cst_6 : f32 to vector<32x2304xf32>
    %10 = arith.minimumf %9, %8 : vector<32x2304xf32>
    %cst_7 = arith.constant 0.000000e+00 : f32
    %11 = vector.broadcast %cst_7 : f32 to vector<2x1x768xf32>
    %c0_8 = arith.constant 0 : index
    %c0_9 = arith.constant 0 : index
    %c0_10 = arith.constant 0 : index
    %12 = vector.load %arg9[%c0_8, %c0_9, %c0_10] : memref<2x18x768xf32, #tpu.memory_space<vmem>>, vector<2x1x768xf32>
    tpu.vector_store %arg9[%c0_8, %c0_9, %c0_10], %11 {strides = array<i32>} : memref<2x18x768xf32, #tpu.memory_space<vmem>>, vector<2x1x768xf32>,
    %c0_11 = arith.constant 0 : index
    %c17 = arith.constant 17 : index
    %c0_12 = arith.constant 0 : index
    %13 = vector.load %arg9[%c0_11, %c17, %c0_12] : memref<2x18x768xf32, #tpu.memory_space<vmem>>, vector<2x1x768xf32>
    tpu.vector_store %arg9[%c0_11, %c17, %c0_12], %11 {strides = array<i32>} : memref<2x18x768xf32, #tpu.memory_space<vmem>>, vector<2x1x768xf32>,
    %14 = vector.extract_strided_slice %10 {offsets = [0, 0], sizes = [32, 768], strides = [1, 1]} : vector<32x2304xf32> to vector<32x768xf32>
    %15 = vector.shape_cast %14 : vector<32x768xf32> to vector<2x16x768xf32>
    %c0_13 = arith.constant 0 : index
    %c1 = arith.constant 1 : index
    %c0_14 = arith.constant 0 : index
    %16 = vector.load %arg9[%c0_13, %c1, %c0_14] : memref<2x18x768xf32, #tpu.memory_space<vmem>>, vector<2x16x768xf32>
    tpu.vector_store %arg9[%c0_13, %c1, %c0_14], %15 {strides = array<i32>} : memref<2x18x768xf32, #tpu.memory_space<vmem>>, vector<2x16x768xf32>,
    %c0_15 = arith.constant 0 : index
    %c0_16 = arith.constant 0 : index
    %c0_17 = arith.constant 0 : index
    %17 = vector.load %arg10[%c0_15, %c0_16, %c0_17] : memref<2x18x768xf32, #tpu.memory_space<vmem>>, vector<2x1x768xf32>
    tpu.vector_store %arg10[%c0_15, %c0_16, %c0_17], %11 {strides = array<i32>} : memref<2x18x768xf32, #tpu.memory_space<vmem>>, vector<2x1x768xf32>,
    %c0_18 = arith.constant 0 : index
    %c17_19 = arith.constant 17 : index
    %c0_20 = arith.constant 0 : index
    %18 = vector.load %arg10[%c0_18, %c17_19, %c0_20] : memref<2x18x768xf32, #tpu.memory_space<vmem>>, vector<2x1x768xf32>
    tpu.vector_store %arg10[%c0_18, %c17_19, %c0_20], %11 {strides = array<i32>} : memref<2x18x768xf32, #tpu.memory_space<vmem>>, vector<2x1x768xf32>,
    %19 = vector.extract_strided_slice %10 {offsets = [0, 768], sizes = [32, 768], strides = [1, 1]} : vector<32x2304xf32> to vector<32x768xf32>
    %20 = vector.shape_cast %19 : vector<32x768xf32> to vector<2x16x768xf32>
    %c0_21 = arith.constant 0 : index
    %c1_22 = arith.constant 1 : index
    %c0_23 = arith.constant 0 : index
    %21 = vector.load %arg10[%c0_21, %c1_22, %c0_23] : memref<2x18x768xf32, #tpu.memory_space<vmem>>, vector<2x16x768xf32>
    tpu.vector_store %arg10[%c0_21, %c1_22, %c0_23], %20 {strides = array<i32>} : memref<2x18x768xf32, #tpu.memory_space<vmem>>, vector<2x16x768xf32>,
    %c0_24 = arith.constant 0 : index
    %c0_25 = arith.constant 0 : index
    %c0_26 = arith.constant 0 : index
    %22 = vector.load %arg11[%c0_24, %c0_25, %c0_26] : memref<2x18x768xf32, #tpu.memory_space<vmem>>, vector<2x1x768xf32>
    tpu.vector_store %arg11[%c0_24, %c0_25, %c0_26], %11 {strides = array<i32>} : memref<2x18x768xf32, #tpu.memory_space<vmem>>, vector<2x1x768xf32>,
    %c0_27 = arith.constant 0 : index
    %c17_28 = arith.constant 17 : index
    %c0_29 = arith.constant 0 : index
    %23 = vector.load %arg11[%c0_27, %c17_28, %c0_29] : memref<2x18x768xf32, #tpu.memory_space<vmem>>, vector<2x1x768xf32>
    tpu.vector_store %arg11[%c0_27, %c17_28, %c0_29], %11 {strides = array<i32>} : memref<2x18x768xf32, #tpu.memory_space<vmem>>, vector<2x1x768xf32>,
    %24 = vector.extract_strided_slice %10 {offsets = [0, 1536], sizes = [32, 768], strides = [1, 1]} : vector<32x2304xf32> to vector<32x768xf32>
    %25 = vector.shape_cast %24 : vector<32x768xf32> to vector<2x16x768xf32>
    %c0_30 = arith.constant 0 : index
    %c1_31 = arith.constant 1 : index
    %c0_32 = arith.constant 0 : index
    %26 = vector.load %arg11[%c0_30, %c1_31, %c0_32] : memref<2x18x768xf32, #tpu.memory_space<vmem>>, vector<2x16x768xf32>
    tpu.vector_store %arg11[%c0_30, %c1_31, %c0_32], %25 {strides = array<i32>} : memref<2x18x768xf32, #tpu.memory_space<vmem>>, vector<2x16x768xf32>,
    %cst_33 = arith.constant 0.000000e+00 : f32
    %27 = vector.broadcast %cst_33 : f32 to vector<2x16x768xf32>
    %c0_34 = arith.constant 0 : index
    %c0_35 = arith.constant 0 : index
    %c0_36 = arith.constant 0 : index
    %28 = vector.load %arg9[%c0_34, %c0_35, %c0_36] : memref<2x18x768xf32, #tpu.memory_space<vmem>>, vector<2x16x768xf32>
    %c0_37 = arith.constant 0 : index
    %c0_38 = arith.constant 0 : index
    %29 = vector.load %arg4[%c0_37, %c0_38] : memref<9x768xf32, #tpu.memory_space<vmem>>, vector<1x768xf32>
    %30 = vector.shape_cast %29 : vector<1x768xf32> to vector<1x1x768xf32>
    %31 = vector.broadcast %30 : vector<1x1x768xf32> to vector<2x16x768xf32>
    %32 = arith.mulf %28, %31 : vector<2x16x768xf32>
    %33 = arith.addf %27, %32 : vector<2x16x768xf32>
    %c0_39 = arith.constant 0 : index
    %c0_40 = arith.constant 0 : index
    %c0_41 = arith.constant 0 : index
    %34 = vector.load %arg10[%c0_39, %c0_40, %c0_41] : memref<2x18x768xf32, #tpu.memory_space<vmem>>, vector<2x16x768xf32>
    %c1_42 = arith.constant 1 : index
    %c0_43 = arith.constant 0 : index
    %35 = vector.load %arg4[%c1_42, %c0_43] : memref<9x768xf32, #tpu.memory_space<vmem>>, vector<1x768xf32>
    %36 = vector.shape_cast %35 : vector<1x768xf32> to vector<1x1x768xf32>
    %37 = vector.broadcast %36 : vector<1x1x768xf32> to vector<2x16x768xf32>
    %38 = arith.mulf %34, %37 : vector<2x16x768xf32>
    %39 = arith.addf %33, %38 : vector<2x16x768xf32>
    %c0_44 = arith.constant 0 : index
    %c0_45 = arith.constant 0 : index
    %c0_46 = arith.constant 0 : index
    %40 = vector.load %arg11[%c0_44, %c0_45, %c0_46] : memref<2x18x768xf32, #tpu.memory_space<vmem>>, vector<2x16x768xf32>
    %c2 = arith.constant 2 : index
    %c0_47 = arith.constant 0 : index
    %41 = vector.load %arg4[%c2, %c0_47] : memref<9x768xf32, #tpu.memory_space<vmem>>, vector<1x768xf32>
    %42 = vector.shape_cast %41 : vector<1x768xf32> to vector<1x1x768xf32>
    %43 = vector.broadcast %42 : vector<1x1x768xf32> to vector<2x16x768xf32>
    %44 = arith.mulf %40, %43 : vector<2x16x768xf32>
    %45 = arith.addf %39, %44 : vector<2x16x768xf32>
    %c0_48 = arith.constant 0 : index
    %c1_49 = arith.constant 1 : index
    %c0_50 = arith.constant 0 : index
    %46 = vector.load %arg9[%c0_48, %c1_49, %c0_50] : memref<2x18x768xf32, #tpu.memory_space<vmem>>, vector<2x16x768xf32>
    %c3 = arith.constant 3 : index
    %c0_51 = arith.constant 0 : index
    %47 = vector.load %arg4[%c3, %c0_51] : memref<9x768xf32, #tpu.memory_space<vmem>>, vector<1x768xf32>
    %48 = vector.shape_cast %47 : vector<1x768xf32> to vector<1x1x768xf32>
    %49 = vector.broadcast %48 : vector<1x1x768xf32> to vector<2x16x768xf32>
    %50 = arith.mulf %46, %49 : vector<2x16x768xf32>
    %51 = arith.addf %45, %50 : vector<2x16x768xf32>
    %c0_52 = arith.constant 0 : index
    %c1_53 = arith.constant 1 : index
    %c0_54 = arith.constant 0 : index
    %52 = vector.load %arg10[%c0_52, %c1_53, %c0_54] : memref<2x18x768xf32, #tpu.memory_space<vmem>>, vector<2x16x768xf32>
    %c4 = arith.constant 4 : index
    %c0_55 = arith.constant 0 : index
    %53 = vector.load %arg4[%c4, %c0_55] : memref<9x768xf32, #tpu.memory_space<vmem>>, vector<1x768xf32>
    %54 = vector.shape_cast %53 : vector<1x768xf32> to vector<1x1x768xf32>
    %55 = vector.broadcast %54 : vector<1x1x768xf32> to vector<2x16x768xf32>
    %56 = arith.mulf %52, %55 : vector<2x16x768xf32>
    %57 = arith.addf %51, %56 : vector<2x16x768xf32>
    %c0_56 = arith.constant 0 : index
    %c1_57 = arith.constant 1 : index
    %c0_58 = arith.constant 0 : index
    %58 = vector.load %arg11[%c0_56, %c1_57, %c0_58] : memref<2x18x768xf32, #tpu.memory_space<vmem>>, vector<2x16x768xf32>
    %c5 = arith.constant 5 : index
    %c0_59 = arith.constant 0 : index
    %59 = vector.load %arg4[%c5, %c0_59] : memref<9x768xf32, #tpu.memory_space<vmem>>, vector<1x768xf32>
    %60 = vector.shape_cast %59 : vector<1x768xf32> to vector<1x1x768xf32>
    %61 = vector.broadcast %60 : vector<1x1x768xf32> to vector<2x16x768xf32>
    %62 = arith.mulf %58, %61 : vector<2x16x768xf32>
    %63 = arith.addf %57, %62 : vector<2x16x768xf32>
    %c0_60 = arith.constant 0 : index
    %c2_61 = arith.constant 2 : index
    %c0_62 = arith.constant 0 : index
    %64 = vector.load %arg9[%c0_60, %c2_61, %c0_62] : memref<2x18x768xf32, #tpu.memory_space<vmem>>, vector<2x16x768xf32>
    %c6 = arith.constant 6 : index
    %c0_63 = arith.constant 0 : index
    %65 = vector.load %arg4[%c6, %c0_63] : memref<9x768xf32, #tpu.memory_space<vmem>>, vector<1x768xf32>
    %66 = vector.shape_cast %65 : vector<1x768xf32> to vector<1x1x768xf32>
    %67 = vector.broadcast %66 : vector<1x1x768xf32> to vector<2x16x768xf32>
    %68 = arith.mulf %64, %67 : vector<2x16x768xf32>
    %69 = arith.addf %63, %68 : vector<2x16x768xf32>
    %c0_64 = arith.constant 0 : index
    %c2_65 = arith.constant 2 : index
    %c0_66 = arith.constant 0 : index
    %70 = vector.load %arg10[%c0_64, %c2_65, %c0_66] : memref<2x18x768xf32, #tpu.memory_space<vmem>>, vector<2x16x768xf32>
    %c7 = arith.constant 7 : index
    %c0_67 = arith.constant 0 : index
    %71 = vector.load %arg4[%c7, %c0_67] : memref<9x768xf32, #tpu.memory_space<vmem>>, vector<1x768xf32>
    %72 = vector.shape_cast %71 : vector<1x768xf32> to vector<1x1x768xf32>
    %73 = vector.broadcast %72 : vector<1x1x768xf32> to vector<2x16x768xf32>
    %74 = arith.mulf %70, %73 : vector<2x16x768xf32>
    %75 = arith.addf %69, %74 : vector<2x16x768xf32>
    %c0_68 = arith.constant 0 : index
    %c2_69 = arith.constant 2 : index
    %c0_70 = arith.constant 0 : index
    %76 = vector.load %arg11[%c0_68, %c2_69, %c0_70] : memref<2x18x768xf32, #tpu.memory_space<vmem>>, vector<2x16x768xf32>
    %c8 = arith.constant 8 : index
    %c0_71 = arith.constant 0 : index
    %77 = vector.load %arg4[%c8, %c0_71] : memref<9x768xf32, #tpu.memory_space<vmem>>, vector<1x768xf32>
    %78 = vector.shape_cast %77 : vector<1x768xf32> to vector<1x1x768xf32>
    %79 = vector.broadcast %78 : vector<1x1x768xf32> to vector<2x16x768xf32>
    %80 = arith.mulf %76, %79 : vector<2x16x768xf32>
    %81 = arith.addf %75, %80 : vector<2x16x768xf32>
    %c0_72 = arith.constant 0 : index
    %c0_73 = arith.constant 0 : index
    %82 = vector.load %arg5[%c0_72, %c0_73] : memref<1x768xf32, #tpu.memory_space<vmem>>, vector<1x768xf32>
    %83 = vector.shape_cast %82 : vector<1x768xf32> to vector<1x1x768xf32>
    %84 = vector.broadcast %83 : vector<1x1x768xf32> to vector<2x16x768xf32>
    %85 = arith.addf %81, %84 : vector<2x16x768xf32>
    %cst_74 = arith.constant 0.000000e+00 : f32
    %cst_75 = arith.constant 6.000000e+00 : f32
    %86 = vector.broadcast %cst_74 : f32 to vector<2x16x768xf32>
    %87 = arith.maximumf %86, %85 : vector<2x16x768xf32>
    %88 = vector.broadcast %cst_75 : f32 to vector<2x16x768xf32>
    %89 = arith.minimumf %88, %87 : vector<2x16x768xf32>
    %90 = vector.shape_cast %89 : vector<2x16x768xf32> to vector<32x768xf32>
    %91 = arith.truncf %90 : vector<32x768xf32> to vector<32x768xbf16>
    %c0_76 = arith.constant 0 : index
    %c0_77 = arith.constant 0 : index
    %92 = vector.load %arg6[%c0_76, %c0_77] : memref<768x128xbf16, #tpu.memory_space<vmem>>, vector<768x128xbf16>
    %cst_78 = arith.constant dense<0.000000e+00> : vector<32x128xf32>
    %93 = tpu.matmul %91, %92, %cst_78 {dimension_numbers = #tpu.dot_dimension_numbers<[1], [0], [0], [1], [0, 0, 1, 1], [], []>} : vector<32x768xbf16>, vector<768x128xbf16>, vector<32x128xf32> -> vector<32x128xf32>
    %c0_79 = arith.constant 0 : index
    %c0_80 = arith.constant 0 : index
    %94 = vector.load %arg7[%c0_79, %c0_80] : memref<1x128xf32, #tpu.memory_space<vmem>>, vector<1x128xf32>
    %95 = vector.broadcast %94 : vector<1x128xf32> to vector<32x128xf32>
    %96 = arith.addf %93, %95 : vector<32x128xf32>
    %97 = arith.addf %96, %0 : vector<32x128xf32>
    %c0_81 = arith.constant 0 : index
    %c0_82 = arith.constant 0 : index
    %98 = vector.load %arg8[%c0_81, %c0_82] : memref<32x128xf32, #tpu.memory_space<vmem>>, vector<32x128xf32>
    tpu.vector_store %arg8[%c0_81, %c0_82], %97 {strides = array<i32>} : memref<32x128xf32, #tpu.memory_space<vmem>>, vector<32x128xf32>,
    return
  }
  func.func @transform_0(%arg0: i32) -> (i32, i32) {
    %c0_i32 = arith.constant 0 : i32
    %c0_i32_0 = arith.constant 0 : i32
    %c0_i32_1 = arith.constant 0 : i32
    return %c0_i32, %c0_i32_0 : i32, i32
  }
  func.func @transform_1(%arg0: i32) -> (i32, i32) {
    %c0_i32 = arith.constant 0 : i32
    %c0_i32_0 = arith.constant 0 : i32
    %c0_i32_1 = arith.constant 0 : i32
    return %c0_i32, %c0_i32_0 : i32, i32
  }
  func.func @transform_2(%arg0: i32) -> (i32, i32) {
    %c0_i32 = arith.constant 0 : i32
    %c0_i32_0 = arith.constant 0 : i32
    %c0_i32_1 = arith.constant 0 : i32
    return %c0_i32, %c0_i32_0 : i32, i32
  }
  func.func @transform_3(%arg0: i32) -> (i32, i32) {
    %c0_i32 = arith.constant 0 : i32
    %c0_i32_0 = arith.constant 0 : i32
    %c0_i32_1 = arith.constant 0 : i32
    return %c0_i32, %c0_i32_0 : i32, i32
  }
  func.func @transform_4(%arg0: i32) -> (i32, i32) {
    %c0_i32 = arith.constant 0 : i32
    %c0_i32_0 = arith.constant 0 : i32
    %c0_i32_1 = arith.constant 0 : i32
    return %c0_i32, %c0_i32_0 : i32, i32
  }
  func.func @transform_5(%arg0: i32) -> (i32, i32) {
    %c0_i32 = arith.constant 0 : i32
    %c0_i32_0 = arith.constant 0 : i32
    %c0_i32_1 = arith.constant 0 : i32
    return %c0_i32, %c0_i32_0 : i32, i32
  }
  func.func @transform_6(%arg0: i32) -> (i32, i32) {
    %c0_i32 = arith.constant 0 : i32
    %c0_i32_0 = arith.constant 0 : i32
    %c0_i32_1 = arith.constant 0 : i32
    return %c0_i32, %c0_i32_0 : i32, i32
  }
  func.func @transform_7(%arg0: i32) -> (i32, i32) {
    %c0_i32 = arith.constant 0 : i32
    %c0_i32_0 = arith.constant 0 : i32
    %c0_i32_1 = arith.constant 0 : i32
    return %c0_i32, %c0_i32_0 : i32, i32
  }
}

</mosaic_0001>

<bundles_post_ra>
// kernel: tpu_custom_call.1
= control target key start
LH: loop header
LB: loop body
LE: loop exit
PB: predicated region body
PF: predicated region fallthrough
CT: control target
= control target key end

     0   :  { %12 = vsyncpa [#allocation6], 0  ;;  %s6725_s0 = inlined_call_operand.hbm [shape: f32[32,128], index: 0, kind: input, shape index: {}]   ;;  %s6726_s1 = inlined_call_operand.hbm [shape: bf16[128,2304], index: 1, kind: input, shape index: {}]   ;;  %s6727_s2 = inlined_call_operand.hbm [shape: f32[1,2304], index: 2, kind: input, shape index: {}]   ;;  %s6728_s3 = inlined_call_operand.hbm [shape: f32[9,768], index: 3, kind: input, shape index: {}]   ;;  %s6729_s4 = inlined_call_operand.vmem [shape: f32[1,768], index: 4, kind: input, shape index: {}]   ;;  %s6730_s5 = inlined_call_operand.hbm [shape: bf16[768,128], index: 5, kind: input, shape index: {}]   ;;  %s6731_s6 = inlined_call_operand.vmem [shape: f32[1,128], index: 6, kind: input, shape index: {}]   ;;  %s6732_s7 = inlined_call_operand.hbm [shape: f32[32,128], index: 7, kind: output, shape index: {}]  }
   0x1   :  { %13 = vsyncpa [#allocation9], 0 }
   0x2   :  { %14 = vsyncpa [#allocation12], 0 }
   0x3   :  { %15 = vsyncpa [#allocation7], 0  ;;  %s5254_s24 = smov [#allocation8]   ;;  %s5114_s28 = scalar_lea.hbm %s6726_s1, 18432 }
   0x4   :  { %s33_s25 = sshll.u32 %s5254_s24, 4  ;;  %p5115_p0 = scmp.ne.s32.totalorder %s6726_s1, %s5114_s28  ;;  %s34_s25 = int_to_ptr.vmem [resolvable:$true] %s33_s25 }
   0x5   :  { %p5118_p1 = scmp.lt.u32.totalorder %s5114_s28, %s6726_s1 }
   0x7   :  { %p5120_p2 = pnand %p5118_p1, %p5115_p0 }
   0x9   :  { %5123 = shalt.err (!%p5120_p2)
}
   0xa   :  { %s5124_s10 = scalar_lea.vmem %s34_s25, 18432  ;;  %p5129_p4 = scmp.lt.s32.totalorder %s34_s25, %s34_s25 }
   0xb   :  { %p5125_p3 = scmp.ne.s32.totalorder %s34_s25, %s5124_s10  ;;  %p5130_p5 = scmp.lt.s32.totalorder %s5124_s10, %s5124_s10 }
   0xd   :  { %p5131_p6 = por %p5130_p5, %p5129_p4 }
   0xf   :  { %p5132_p7 = pnand %p5131_p6, %p5125_p3 }
  0x11   :  { %5135 = shalt.err (!%p5132_p7)
}
  0x12   :  { %s5255_s11 = smov 1152   ;;  %s5256_s12 = smov 72  }
  0x13   :  { %39 = dma.hbm_to_vmem [thread:$0]  %s6726_s1, 18432, %s34_s25, [#allocation9], %s5255_s11, %s5255_s11, %s5256_s12  }
  0x14   :  { %s5257_s15 = smov [#allocation11]   ;;  %s5136_s19 = scalar_lea.hbm %s6728_s3, 1536 }
  0x15   :  { %s55_s16 = sshll.u32 %s5257_s15, 4  ;;  %p5137_p8 = scmp.ne.s32.totalorder %s6728_s3, %s5136_s19  ;;  %s56_s16 = int_to_ptr.vmem [resolvable:$true] %s55_s16 }
  0x16   :  { %p5140_p9 = scmp.lt.u32.totalorder %s5136_s19, %s6728_s3 }
  0x18   :  { %p5142_p10 = pnand %p5140_p9, %p5137_p8 }
  0x1a   :  { %5145 = shalt.err (!%p5142_p10)
}
  0x1b   :  { %s5146_s24 = scalar_lea.vmem %s56_s16, 1536  ;;  %p5151_p12 = scmp.lt.s32.totalorder %s56_s16, %s56_s16 }
  0x1c   :  { %p5147_p11 = scmp.ne.s32.totalorder %s56_s16, %s5146_s24  ;;  %p5152_p13 = scmp.lt.s32.totalorder %s5146_s24, %s5146_s24 }
  0x1e   :  { %p5153_p0 = por %p5152_p13, %p5151_p12 }
  0x20   :  { %p5154_p1 = pnand %p5153_p0, %p5147_p11 }
  0x22   :  { %5157 = shalt.err (!%p5154_p1)
}
  0x23   :  { %s5258_s1 = smov 768   ;;  %s5259_s25 = smov 48  }
  0x24   :  { %61 = dma.hbm_to_vmem [thread:$0]  %s6728_s3, 1536, %s56_s16, [#allocation12], %s5258_s1, %s5258_s1, %s5259_s25  }
  0x25   :  { %s5260_s28 = smov [#allocation5]   ;;  %s5158_s9 = scalar_lea.hbm %s6725_s0, 512 }
  0x26   :  { %s21_s29 = sshll.u32 %s5260_s28, 4  ;;  %p5159_p2 = scmp.ne.s32.totalorder %s6725_s0, %s5158_s9  ;;  %s22_s29 = int_to_ptr.vmem [resolvable:$true] %s21_s29 }
  0x27   :  { %p5162_p3 = scmp.lt.u32.totalorder %s5158_s9, %s6725_s0 }
  0x29   :  { %p5164_p4 = pnand %p5162_p3, %p5159_p2 }
  0x2b   :  { %5167 = shalt.err (!%p5164_p4)
}
  0x2c   :  { %s5168_s14 = scalar_lea.vmem %s22_s29, 512  ;;  %p5173_p6 = scmp.lt.s32.totalorder %s22_s29, %s22_s29 }
  0x2d   :  { %p5169_p5 = scmp.ne.s32.totalorder %s22_s29, %s5168_s14  ;;  %p5174_p7 = scmp.lt.s32.totalorder %s5168_s14, %s5168_s14 }
  0x2f   :  { %p5175_p8 = por %p5174_p7, %p5173_p6 }
  0x31   :  { %p5176_p9 = pnand %p5175_p8, %p5169_p5 }
  0x33   :  { %5179 = shalt.err (!%p5176_p9)
}
  0x34   :  { %s5261_s3 = smov 128   ;;  %s5262_s15 = smov 8  }
  0x35   :  { %27 = dma.hbm_to_vmem [thread:$0]  %s6725_s0, 512, %s22_s29, [#allocation6], %s5261_s3, %s5261_s3, %s5262_s15  }
  0x36   :  { %s5263_s18 = smov [#allocation10]   ;;  %s5264_s20 = smov [#allocation13]  }
  0x37   :  { %s46_s19 = sshll.u32 %s5263_s18, 4  ;;  %s69_s21 = sshll.u32 %s5264_s20, 4  ;;  %s47_s19 = int_to_ptr.vmem [resolvable:$true] %s46_s19  ;;  %s70_s21 = int_to_ptr.vmem [resolvable:$true] %s69_s21 }
  0x38   :  { %s5180_s24 = scalar_lea.hbm %s6727_s2, 288 }
  0x39   :  { %p5181_p10 = scmp.ne.s32.totalorder %s6727_s2, %s5180_s24  ;;  %p5184_p11 = scmp.lt.u32.totalorder %s5180_s24, %s6727_s2 }
  0x3b   :  { %p5186_p12 = pnand %p5184_p11, %p5181_p10 }
  0x3d   :  { %5189 = shalt.err (!%p5186_p12)
}
  0x3e   :  { %s5190_s0 = scalar_lea.vmem %s47_s19, 288  ;;  %p5195_p0 = scmp.lt.s32.totalorder %s47_s19, %s47_s19 }
  0x3f   :  { %p5191_p13 = scmp.ne.s32.totalorder %s47_s19, %s5190_s0  ;;  %p5196_p1 = scmp.lt.s32.totalorder %s5190_s0, %s5190_s0 }
  0x41   :  { %p5197_p2 = por %p5196_p1, %p5195_p0 }
  0x43   :  { %p5198_p3 = pnand %p5197_p2, %p5191_p13 }
  0x45   :  { %5201 = shalt.err (!%p5198_p3)
}
  0x46   :  { %49 = dma.hbm_to_vmem [thread:$0]  %s6727_s2, 288, %s47_s19, [#allocation9]  }
  0x47   :  { %s5202_s9 = scalar_lea.hbm %s6730_s5, 6144 }
  0x48   :  { %p5203_p4 = scmp.ne.s32.totalorder %s6730_s5, %s5202_s9  ;;  %p5206_p5 = scmp.lt.u32.totalorder %s5202_s9, %s6730_s5 }
  0x4a   :  { %p5208_p6 = pnand %p5206_p5, %p5203_p4 }
  0x4c   :  { %5211 = shalt.err (!%p5208_p6)
}
  0x4d   :  { %s5212_s14 = scalar_lea.vmem %s70_s21, 6144  ;;  %p5217_p8 = scmp.lt.s32.totalorder %s70_s21, %s70_s21 }
  0x4e   :  { %p5213_p7 = scmp.ne.s32.totalorder %s70_s21, %s5212_s14  ;;  %p5218_p9 = scmp.lt.s32.totalorder %s5212_s14, %s5212_s14 }
  0x50   :  { %p5219_p10 = por %p5218_p9, %p5217_p8 }
  0x52   :  { %p5220_p11 = pnand %p5219_p10, %p5213_p7 }
  0x54   :  { %5223 = shalt.err (!%p5220_p11)
}
  0x55   :  { %s5265_s2 = smov 64   ;;  %s5266_s16 = smov 4  }
  0x56   :  { %75 = dma.hbm_to_vmem [thread:$0]  %s6730_s5, 6144, %s70_s21, [#allocation12], %s5265_s2, %s5265_s2, %s5266_s16  }
  0x57   :  { %5246 = dma.done.wait [#allocation6], 512  }
  0x58   :  { %5247 = vsyncadd [#allocation6], 4294966784 }
  0x59   :  { %5248 = dma.done.wait [#allocation9], 18720  }
  0x5a   :  { %5249 = vsyncadd [#allocation9], 4294948576 }
  0x5b   :  { %5250 = dma.done.wait [#allocation12], 7680  }
  0x5c   :  { %5251 = vsyncadd [#allocation12], 4294959616  ;;  %v5267_v0 = vmov 0   ;;  %v4845_v1 = vld [vmem:[#allocation8 + $0x4] ss:$72 sps:$4 sm:$0xff]   ;;  %v96_v46 = vld [vmem:[#allocation5 + $0x10] sm:$0xff] }
  0x5d   :  { %1092 = vmatprep.mubr.bf16.mxu0 %v5267_v0  ;;  %1145 = vmatprep.mubr.bf16.mxu1 %v5267_v0  ;;  %v4847_v2 = vld [vmem:[#allocation8 + $0xc] ss:$72 sps:$4 sm:$0xff]   ;;  %v4849_v3 = vld [vmem:[#allocation8] ss:$72 sps:$4 sm:$0xff]   ;;  %v4853_v6 = vld [vmem:[#allocation8 + $0x9c] ss:$72 sps:$4 sm:$0xff]  }
  0x5e   :  { %1060 = vmatprep.subr.bf16.mxu0 %v4845_v1  ;;  %v4850_v4 = vld [vmem:[#allocation8 + $0x8] ss:$72 sps:$4 sm:$0xff]   ;;  %1113 = vmatprep.subr.bf16.mxu1 %v4847_v2  ;;  %v4851_v5 = vld [vmem:[#allocation8 + $0x94] ss:$72 sps:$4 sm:$0xff]   ;;  %v4856_v8 = vld [vmem:[#allocation8 + $0x98] ss:$72 sps:$4 sm:$0xff]  }
  0x5f   :  { %1061 = vmatpush1.bf16.msra.mxu0 %v4849_v3  ;;  %1114 = vmatpush1.bf16.msra.mxu1 %v4850_v4  ;;  %v4855_v7 = vld [vmem:[#allocation8 + $0x90] ss:$72 sps:$4 sm:$0xff]   ;;  %v4857_v9 = vld [vmem:[#allocation8 + $0x124] ss:$72 sps:$4 sm:$0xff]   ;;  %v4861_v11 = vld [vmem:[#allocation8 + $0x120] ss:$72 sps:$4 sm:$0xff]  }
  0x60   :  { %1062 = vmatprep.subr.bf16.mxu0 %v4851_v5  ;;  %1115 = vmatprep.subr.bf16.mxu1 %v4853_v6  ;;  %v4859_v10 = vld [vmem:[#allocation8 + $0x12c] ss:$72 sps:$4 sm:$0xff]   ;;  %v4862_v12 = vld [vmem:[#allocation8 + $0x128] ss:$72 sps:$4 sm:$0xff]   ;;  %v4865_v14 = vld [vmem:[#allocation8 + $0x1bc] ss:$72 sps:$4 sm:$0xff]  }
  0x61   :  { %v4863_v13 = vld [vmem:[#allocation8 + $0x1b4] ss:$72 sps:$4 sm:$0xff]   ;;  %v4867_v15 = vld [vmem:[#allocation8 + $0x1b0] ss:$72 sps:$4 sm:$0xff]   ;;  %v4869_v17 = vld [vmem:[#allocation8 + $0x244] ss:$72 sps:$4 sm:$0xff]  }
  0x62   :  { %v4868_v16 = vld [vmem:[#allocation8 + $0x1b8] ss:$72 sps:$4 sm:$0xff]   ;;  %v4871_v18 = vld [vmem:[#allocation8 + $0x24c] ss:$72 sps:$4 sm:$0xff]   ;;  %v4874_v20 = vld [vmem:[#allocation8 + $0x248] ss:$72 sps:$4 sm:$0xff]  }
  0x63   :  { %1063 = vmatpush1.bf16.msra.mxu0 %v4855_v7  ;;  %1116 = vmatpush1.bf16.msra.mxu1 %v4856_v8  ;;  %v4873_v19 = vld [vmem:[#allocation8 + $0x240] ss:$72 sps:$4 sm:$0xff]   ;;  %v4875_v21 = vld [vmem:[#allocation8 + $0x2d4] ss:$72 sps:$4 sm:$0xff]   ;;  %v4879_v23 = vld [vmem:[#allocation8 + $0x2d0] ss:$72 sps:$4 sm:$0xff]  }
  0x64   :  { %1064 = vmatprep.subr.bf16.mxu0 %v4857_v9  ;;  %1117 = vmatprep.subr.bf16.mxu1 %v4859_v10  ;;  %v4877_v22 = vld [vmem:[#allocation8 + $0x2dc] ss:$72 sps:$4 sm:$0xff]   ;;  %v4880_v24 = vld [vmem:[#allocation8 + $0x2d8] ss:$72 sps:$4 sm:$0xff]   ;;  %v4883_v26 = vld [vmem:[#allocation8 + $0x36c] ss:$72 sps:$4 sm:$0xff]  }
  0x65   :  { %v4881_v25 = vld [vmem:[#allocation8 + $0x364] ss:$72 sps:$4 sm:$0xff]   ;;  %v4885_v27 = vld [vmem:[#allocation8 + $0x360] ss:$72 sps:$4 sm:$0xff]   ;;  %v4887_v29 = vld [vmem:[#allocation8 + $0x3f4] ss:$72 sps:$4 sm:$0xff]  }
  0x66   :  { %v4886_v28 = vld [vmem:[#allocation8 + $0x368] ss:$72 sps:$4 sm:$0xff]   ;;  %v4889_v30 = vld [vmem:[#allocation8 + $0x3fc] ss:$72 sps:$4 sm:$0xff]   ;;  %v4892_v32 = vld [vmem:[#allocation8 + $0x3f8] ss:$72 sps:$4 sm:$0xff]  }
  0x67   :  { %1065 = vmatpush1.bf16.msra.mxu0 %v4861_v11  ;;  %1118 = vmatpush1.bf16.msra.mxu1 %v4862_v12  ;;  %v4891_v31 = vld [vmem:[#allocation8 + $0x3f0] ss:$72 sps:$4 sm:$0xff]   ;;  %v94_v33 = vld [vmem:[#allocation5] sm:$0xff]  ;;  %v95_v34 = vld [vmem:[#allocation5 + $0x8] sm:$0xff]  ;;  %vm1720_vm1 = vcmask 1040384   ;;  %vm2566_vm2 = vcmask 1046528  }
  0x68   :  { %1066 = vmatprep.subr.bf16.mxu0 %v4863_v13  ;;  %1119 = vmatprep.subr.bf16.mxu1 %v4865_v14  ;;  %v4895_v35 = vld [vmem:[#allocation8 + $0x14] ss:$72 sps:$4 sm:$0xff]   ;;  %v5375_v37 = vpack.c.bf16 %v95_v34, %v94_v33  ;;  %v4893_v38 = vld [vmem:[#allocation8 + $0x10] ss:$72 sps:$4 sm:$0xff]   ;;  %v4901_v40 = vld [vmem:[#allocation8 + $0xa4] ss:$72 sps:$4 sm:$0xff]  }
  0x69   :  { %v4898_v36 = vld [vmem:[#allocation8 + $0x1c] ss:$72 sps:$4 sm:$0xff]   ;;  %v4896_v39 = vld [vmem:[#allocation8 + $0x18] ss:$72 sps:$4 sm:$0xff]   ;;  %v4904_v41 = vld [vmem:[#allocation8 + $0xac] ss:$72 sps:$4 sm:$0xff]  }
  0x6a   :  { %v4899_v42 = vld [vmem:[#allocation8 + $0xa0] ss:$72 sps:$4 sm:$0xff]   ;;  %v4907_v44 = vld [vmem:[#allocation8 + $0x134] ss:$72 sps:$4 sm:$0xff]   ;;  %v4905_v48 = vld [vmem:[#allocation8 + $0x130] ss:$72 sps:$4 sm:$0xff]  }
  0x6b   :  { %1067 = vmatpush1.bf16.msra.mxu0 %v4867_v15  ;;  %1120 = vmatpush1.bf16.msra.mxu1 %v4868_v16  ;;  %v4902_v43 = vld [vmem:[#allocation8 + $0xa8] ss:$72 sps:$4 sm:$0xff]   ;;  %v4910_v45 = vld [vmem:[#allocation8 + $0x13c] ss:$72 sps:$4 sm:$0xff]   ;;  %v4908_v49 = vld [vmem:[#allocation8 + $0x138] ss:$72 sps:$4 sm:$0xff]  }
  0x6c   :  { %1068 = vmatprep.subr.bf16.mxu0 %v4869_v17  ;;  %1121 = vmatprep.subr.bf16.mxu1 %v4871_v18  ;;  %v97_v47 = vld [vmem:[#allocation5 + $0x18] sm:$0xff]  ;;  %v4913_v51 = vld [vmem:[#allocation8 + $0x1c4] ss:$72 sps:$4 sm:$0xff]   ;;  %v4911_v53 = vld [vmem:[#allocation8 + $0x1c0] ss:$72 sps:$4 sm:$0xff]   ;;  %vm3284_vm3 = vcmask 1045504  }
  0x6d   :  { %v5381_v50 = vpack.c.bf16 %v97_v47, %v96_v46  ;;  %v4916_v52 = vld [vmem:[#allocation8 + $0x1cc] ss:$72 sps:$4 sm:$0xff]   ;;  %v4914_v54 = vld [vmem:[#allocation8 + $0x1c8] ss:$72 sps:$4 sm:$0xff]   ;;  %v4922_v56 = vld [vmem:[#allocation8 + $0x25c] ss:$72 sps:$4 sm:$0xff]  }
  0x6e   :  { %v4919_v55 = vld [vmem:[#allocation8 + $0x254] ss:$72 sps:$4 sm:$0xff]   ;;  %v4917_v57 = vld [vmem:[#allocation8 + $0x250] ss:$72 sps:$4 sm:$0xff]   ;;  %v4925_v59 = vld [vmem:[#allocation8 + $0x2e4] ss:$72 sps:$4 sm:$0xff]  }
  0x6f   :  { %1069 = vmatpush1.bf16.msra.mxu0 %v4873_v19  ;;  %1122 = vmatpush1.bf16.msra.mxu1 %v4874_v20  ;;  %v4920_v58 = vld [vmem:[#allocation8 + $0x258] ss:$72 sps:$4 sm:$0xff]   ;;  %v4928_v60 = vld [vmem:[#allocation8 + $0x2ec] ss:$72 sps:$4 sm:$0xff]   ;;  %v4926_v62 = vld [vmem:[#allocation8 + $0x2e8] ss:$72 sps:$4 sm:$0xff]  }
  0x70   :  { %1070 = vmatprep.subr.bf16.mxu0 %v4875_v21  ;;  %1123 = vmatprep.subr.bf16.mxu1 %v4877_v22  ;;  %v4923_v61 = vld [vmem:[#allocation8 + $0x2e0] ss:$72 sps:$4 sm:$0xff]   ;;  %v4931_v63 = vld [vmem:[#allocation8 + $0x374] ss:$72 sps:$4 sm:$0xff]   ;;  %v4929_v2 = vld [vmem:[#allocation8 + $0x370] ss:$72 sps:$4 sm:$0xff]  }
  0x71   :  { %v4934_v1 = vld [vmem:[#allocation8 + $0x37c] ss:$72 sps:$4 sm:$0xff]   ;;  %v4932_v3 = vld [vmem:[#allocation8 + $0x378] ss:$72 sps:$4 sm:$0xff]   ;;  %v4940_v5 = vld [vmem:[#allocation8 + $0x40c] ss:$72 sps:$4 sm:$0xff]  }
  0x72   :  { %v4937_v4 = vld [vmem:[#allocation8 + $0x404] ss:$72 sps:$4 sm:$0xff]   ;;  %v4935_v6 = vld [vmem:[#allocation8 + $0x400] ss:$72 sps:$4 sm:$0xff]   ;;  %v4949_v12 = vld [vmem:[#allocation8 + $0xb4] ss:$72 sps:$4 sm:$0xff]  }
  0x73   :  { %1071 = vmatpush1.bf16.msra.mxu0 %v4879_v23  ;;  %1124 = vmatpush1.bf16.msra.mxu1 %v4880_v24  ;;  %v4938_v7 = vld [vmem:[#allocation8 + $0x408] ss:$72 sps:$4 sm:$0xff]   ;;  %v4943_v8 = vld [vmem:[#allocation8 + $0x24] ss:$72 sps:$4 sm:$0xff]   ;;  %v4950_v15 = vld [vmem:[#allocation8 + $0xb8] ss:$72 sps:$4 sm:$0xff]  }
  0x74   :  { %1072 = vmatprep.subr.bf16.mxu0 %v4881_v25  ;;  %1125 = vmatprep.subr.bf16.mxu1 %v4883_v26  ;;  %v4946_v9 = vld [vmem:[#allocation8 + $0x2c] ss:$72 sps:$4 sm:$0xff]   ;;  %v4941_v10 = vld [vmem:[#allocation8 + $0x20] ss:$72 sps:$4 sm:$0xff]   ;;  %v4952_v13 = vld [vmem:[#allocation8 + $0xbc] ss:$72 sps:$4 sm:$0xff]  }
  0x75   :  { %v4944_v11 = vld [vmem:[#allocation8 + $0x28] ss:$72 sps:$4 sm:$0xff]   ;;  %v4955_v16 = vld [vmem:[#allocation8 + $0x144] ss:$72 sps:$4 sm:$0xff]   ;;  %v4961_v20 = vld [vmem:[#allocation8 + $0x1d4] ss:$72 sps:$4 sm:$0xff]  }
  0x76   :  { %v4947_v14 = vld [vmem:[#allocation8 + $0xb0] ss:$72 sps:$4 sm:$0xff]   ;;  %v4958_v17 = vld [vmem:[#allocation8 + $0x14c] ss:$72 sps:$4 sm:$0xff]   ;;  %v4953_v18 = vld [vmem:[#allocation8 + $0x140] ss:$72 sps:$4 sm:$0xff]  }
  0x77   :  { %1073 = vmatpush1.bf16.msra.mxu0 %v4885_v27  ;;  %1126 = vmatpush1.bf16.msra.mxu1 %v4886_v28  ;;  %v4956_v19 = vld [vmem:[#allocation8 + $0x148] ss:$72 sps:$4 sm:$0xff]   ;;  %v4964_v21 = vld [vmem:[#allocation8 + $0x1dc] ss:$72 sps:$4 sm:$0xff]   ;;  %v4962_v23 = vld [vmem:[#allocation8 + $0x1d8] ss:$72 sps:$4 sm:$0xff]  }
  0x78   :  { %1074 = vmatprep.subr.bf16.mxu0 %v4887_v29  ;;  %1127 = vmatprep.subr.bf16.mxu1 %v4889_v30  ;;  %v4959_v22 = vld [vmem:[#allocation8 + $0x1d0] ss:$72 sps:$4 sm:$0xff]   ;;  %v4967_v24 = vld [vmem:[#allocation8 + $0x264] ss:$72 sps:$4 sm:$0xff]   ;;  %v4965_v26 = vld [vmem:[#allocation8 + $0x260] ss:$72 sps:$4 sm:$0xff]  }
  0x79   :  { %v4970_v25 = vld [vmem:[#allocation8 + $0x26c] ss:$72 sps:$4 sm:$0xff]   ;;  %v4968_v27 = vld [vmem:[#allocation8 + $0x268] ss:$72 sps:$4 sm:$0xff]   ;;  %v4976_v29 = vld [vmem:[#allocation8 + $0x2fc] ss:$72 sps:$4 sm:$0xff]  }
  0x7a   :  { %v4973_v28 = vld [vmem:[#allocation8 + $0x2f4] ss:$72 sps:$4 sm:$0xff]   ;;  %v4971_v30 = vld [vmem:[#allocation8 + $0x2f0] ss:$72 sps:$4 sm:$0xff]   ;;  %v4977_v34 = vld [vmem:[#allocation8 + $0x380] ss:$72 sps:$4 sm:$0xff]  }
  0x7b   :  { %1075 = vmatpush1.bf16.msra.mxu0 %v4891_v31  ;;  %1128 = vmatpush1.bf16.msra.mxu1 %v4892_v32  ;;  %v4974_v31 = vld [vmem:[#allocation8 + $0x2f8] ss:$72 sps:$4 sm:$0xff]   ;;  %v4979_v32 = vld [vmem:[#allocation8 + $0x384] ss:$72 sps:$4 sm:$0xff]  }
  0x7c   :  { %1166 = vmatprep.subr.bf16.mxu0 %v4895_v35  ;;  %1219 = vmatprep.subr.bf16.mxu1 %v4898_v36  ;;  %v4982_v33 = vld [vmem:[#allocation8 + $0x38c] ss:$72 sps:$4 sm:$0xff]   ;;  %v4980_v35 = vld [vmem:[#allocation8 + $0x388] ss:$72 sps:$4 sm:$0xff]  }
  0x7d   :  { %v4985_v36 = vld [vmem:[#allocation8 + $0x414] ss:$72 sps:$4 sm:$0xff]   ;;  %v4995_v47 = vld [vmem:[#allocation8 + $0xc0] ss:$72 sps:$4 sm:$0xff]  }
  0x7e   :  { %1093 = vmatmul.mubr.bf16.vlgmr.msra.gmra.mrb[0].mxu0 %v5375_v37  ;;  %1146 = vmatmul.mubr.bf16.vlgmr.msra.gmra.mrb[0].mxu1 %v5375_v37  ;;  %v5000_v46 = vld [vmem:[#allocation8 + $0xcc] ss:$72 sps:$4 sm:$0xff]  }
  0x7f   :  { %1167 = vmatpush1.bf16.msra.mxu0 %v4893_v38  ;;  %1220 = vmatpush1.bf16.msra.mxu1 %v4896_v39  ;;  %v4988_v38 = vld [vmem:[#allocation8 + $0x41c] ss:$72 sps:$4 sm:$0xff]   ;;  %v4983_v39 = vld [vmem:[#allocation8 + $0x410] ss:$72 sps:$4 sm:$0xff]  }
  0x80   :  { %1168 = vmatprep.subr.bf16.mxu0 %v4901_v40  ;;  %1221 = vmatprep.subr.bf16.mxu1 %v4904_v41  ;;  %v4986_v40 = vld [vmem:[#allocation8 + $0x418] ss:$72 sps:$4 sm:$0xff]   ;;  %v4991_v41 = vld [vmem:[#allocation8 + $0x34] ss:$72 sps:$4 sm:$0xff]  }
  0x81   :  { %1102 = vmatprep.mubr.bf16.mxu0 %v5267_v0  ;;  %1155 = vmatprep.mubr.bf16.mxu1 %v5267_v0 }
  0x83   :  { %1169 = vmatpush1.bf16.msra.mxu0 %v4899_v42  ;;  %1222 = vmatpush1.bf16.msra.mxu1 %v4902_v43  ;;  %v4994_v42 = vld [vmem:[#allocation8 + $0x3c] ss:$72 sps:$4 sm:$0xff]   ;;  %v4989_v43 = vld [vmem:[#allocation8 + $0x30] ss:$72 sps:$4 sm:$0xff]  }
  0x84   :  { %1170 = vmatprep.subr.bf16.mxu0 %v4907_v44  ;;  %1223 = vmatprep.subr.bf16.mxu1 %v4910_v45  ;;  %v4992_v44 = vld [vmem:[#allocation8 + $0x38] ss:$72 sps:$4 sm:$0xff]   ;;  %v4997_v45 = vld [vmem:[#allocation8 + $0xc4] ss:$72 sps:$4 sm:$0xff]  }
  0x86   :  { %1103 = vmatmul.mubr.bf16.gmra.mrb[4].mxu0 %v5381_v50  ;;  %1156 = vmatmul.mubr.bf16.gmra.mrb[4].mxu1 %v5381_v50 }
  0x87   :  { %1171 = vmatpush1.bf16.msra.mxu0 %v4905_v48  ;;  %1224 = vmatpush1.bf16.msra.mxu1 %v4908_v49  ;;  %v4998_v48 = vld [vmem:[#allocation8 + $0xc8] ss:$72 sps:$4 sm:$0xff]   ;;  %v5003_v49 = vld [vmem:[#allocation8 + $0x154] ss:$72 sps:$4 sm:$0xff]  }
  0x88   :  { %1172 = vmatprep.subr.bf16.mxu0 %v4913_v51  ;;  %1225 = vmatprep.subr.bf16.mxu1 %v4916_v52  ;;  %v5006_v51 = vld [vmem:[#allocation8 + $0x15c] ss:$72 sps:$4 sm:$0xff]   ;;  %v5001_v52 = vld [vmem:[#allocation8 + $0x150] ss:$72 sps:$4 sm:$0xff]  }
  0x89   :  { %1198 = vmatprep.mubr.bf16.mxu0 %v5267_v0  ;;  %1251 = vmatprep.mubr.bf16.mxu1 %v5267_v0 }
  0x8b   :  { %1173 = vmatpush1.bf16.msra.mxu0 %v4911_v53  ;;  %1226 = vmatpush1.bf16.msra.mxu1 %v4914_v54  ;;  %v5004_v53 = vld [vmem:[#allocation8 + $0x158] ss:$72 sps:$4 sm:$0xff]   ;;  %v5009_v54 = vld [vmem:[#allocation8 + $0x1e4] ss:$72 sps:$4 sm:$0xff]  }
  0x8c   :  { %1174 = vmatprep.subr.bf16.mxu0 %v4919_v55  ;;  %1227 = vmatprep.subr.bf16.mxu1 %v4922_v56  ;;  %v5012_v55 = vld [vmem:[#allocation8 + $0x1ec] ss:$72 sps:$4 sm:$0xff]   ;;  %v5007_v56 = vld [vmem:[#allocation8 + $0x1e0] ss:$72 sps:$4 sm:$0xff]  }
  0x8f   :  { %1175 = vmatpush1.bf16.msra.mxu0 %v4917_v57  ;;  %1228 = vmatpush1.bf16.msra.mxu1 %v4920_v58  ;;  %v5010_v57 = vld [vmem:[#allocation8 + $0x1e8] ss:$72 sps:$4 sm:$0xff]   ;;  %v5015_v58 = vld [vmem:[#allocation8 + $0x274] ss:$72 sps:$4 sm:$0xff]  }
  0x90   :  { %1176 = vmatprep.subr.bf16.mxu0 %v4925_v59  ;;  %1229 = vmatprep.subr.bf16.mxu1 %v4928_v60  ;;  %v5018_v59 = vld [vmem:[#allocation8 + $0x27c] ss:$72 sps:$4 sm:$0xff]   ;;  %v5013_v60 = vld [vmem:[#allocation8 + $0x270] ss:$72 sps:$4 sm:$0xff]  }
  0x93   :  { %1177 = vmatpush1.bf16.msra.mxu0 %v4923_v61  ;;  %1230 = vmatpush1.bf16.msra.mxu1 %v4926_v62  ;;  %v5016_v61 = vld [vmem:[#allocation8 + $0x278] ss:$72 sps:$4 sm:$0xff]   ;;  %v5021_v62 = vld [vmem:[#allocation8 + $0x304] ss:$72 sps:$4 sm:$0xff]  }
  0x94   :  { %1178 = vmatprep.subr.bf16.mxu0 %v4931_v63  ;;  %1231 = vmatprep.subr.bf16.mxu1 %v4934_v1  ;;  %v5024_v63 = vld [vmem:[#allocation8 + $0x30c] ss:$72 sps:$4 sm:$0xff]   ;;  %v5019_v1 = vld [vmem:[#allocation8 + $0x300] ss:$72 sps:$4 sm:$0xff]  }
  0x97   :  { %1179 = vmatpush1.bf16.msra.mxu0 %v4929_v2  ;;  %1232 = vmatpush1.bf16.msra.mxu1 %v4932_v3  ;;  %v5022_v2 = vld [vmem:[#allocation8 + $0x308] ss:$72 sps:$4 sm:$0xff]   ;;  %v5027_v3 = vld [vmem:[#allocation8 + $0x394] ss:$72 sps:$4 sm:$0xff]  }
  0x98   :  { %1180 = vmatprep.subr.bf16.mxu0 %v4937_v4  ;;  %1233 = vmatprep.subr.bf16.mxu1 %v4940_v5  ;;  %v5030_v4 = vld [vmem:[#allocation8 + $0x39c] ss:$72 sps:$4 sm:$0xff]   ;;  %v5025_v5 = vld [vmem:[#allocation8 + $0x390] ss:$72 sps:$4 sm:$0xff]  }
  0x9b   :  { %1181 = vmatpush1.bf16.msra.mxu0 %v4935_v6  ;;  %1234 = vmatpush1.bf16.msra.mxu1 %v4938_v7  ;;  %v5028_v6 = vld [vmem:[#allocation8 + $0x398] ss:$72 sps:$4 sm:$0xff]   ;;  %v5033_v7 = vld [vmem:[#allocation8 + $0x424] ss:$72 sps:$4 sm:$0xff]  }
  0x9c   :  { %1272 = vmatprep.subr.bf16.mxu0 %v4943_v8  ;;  %1325 = vmatprep.subr.bf16.mxu1 %v4946_v9  ;;  %v5036_v8 = vld [vmem:[#allocation8 + $0x42c] ss:$72 sps:$4 sm:$0xff]   ;;  %v5031_v9 = vld [vmem:[#allocation8 + $0x420] ss:$72 sps:$4 sm:$0xff]  }
  0x9e   :  { %1199 = vmatmul.mubr.bf16.vlgmr.msra.gmra.mrb[8].mxu0 %v5375_v37  ;;  %1252 = vmatmul.mubr.bf16.vlgmr.msra.gmra.mrb[8].mxu1 %v5375_v37 }
  0x9f   :  { %1273 = vmatpush1.bf16.msra.mxu0 %v4941_v10  ;;  %1326 = vmatpush1.bf16.msra.mxu1 %v4944_v11  ;;  %v5034_v10 = vld [vmem:[#allocation8 + $0x428] ss:$72 sps:$4 sm:$0xff]   ;;  %v5039_v11 = vld [vmem:[#allocation8 + $0x44] ss:$72 sps:$4 sm:$0xff]  }
  0xa0   :  { %1274 = vmatprep.subr.bf16.mxu0 %v4949_v12  ;;  %1327 = vmatprep.subr.bf16.mxu1 %v4952_v13  ;;  %v5037_v12 = vld [vmem:[#allocation8 + $0x40] ss:$72 sps:$4 sm:$0xff]   ;;  %v250_v13 = vlaneseq }
  0xa1   :  { %1261 = vmatprep.mubr.bf16.mxu1 %v5267_v0  ;;  %1208 = vmatprep.mubr.bf16.mxu0 %v5267_v0 }
  0xa2   :  { %vm5404_vm0 = vcmp.lt.s32.totalorder %v250_v13, 768 }
  0xa3   :  { %1275 = vmatpush1.bf16.msra.mxu0 %v4947_v14  ;;  %1328 = vmatpush1.bf16.msra.mxu1 %v4950_v15  ;;  %v5042_v14 = vld [vmem:[#allocation8 + $0xd4] ss:$72 sps:$4 sm:$0xff]   ;;  %v5072_v15 = vld [vmem:[#allocation13 + $0x90] sm:$0xff]  }
  0xa4   :  { %1276 = vmatprep.subr.bf16.mxu0 %v4955_v16  ;;  %1329 = vmatprep.subr.bf16.mxu1 %v4958_v17  ;;  %v5268_v16 = vmov 0.0   ;;  %v5040_v17 = vld [vmem:[#allocation8 + $0xd0] ss:$72 sps:$4 sm:$0xff]  }
  0xa5   :  { %1685 = vst.msk [vmem:[#allocation2] ss:$8 sm:$0xf] %vm5404_vm0, %v5268_v16  ;;  %1691 = vst.msk [vmem:[#allocation2 + $0x61] ss:$8 sm:$0xf] %vm5404_vm0, %v5268_v16 }
  0xa6   :  { %1262 = vmatmul.mubr.bf16.gmra.mrb[12].mxu1 %v5381_v50  ;;  %1209 = vmatmul.mubr.bf16.gmra.mrb[12].mxu0 %v5381_v50  ;;  %1829 = vst.msk [vmem:[#allocation3] ss:$8 sm:$0xf] %vm5404_vm0, %v5268_v16  ;;  %1835 = vst.msk [vmem:[#allocation3 + $0x61] ss:$8 sm:$0xf] %vm5404_vm0, %v5268_v16 }
  0xa7   :  { %1277 = vmatpush1.bf16.msra.mxu0 %v4953_v18  ;;  %1330 = vmatpush1.bf16.msra.mxu1 %v4956_v19  ;;  %1972 = vst.msk [vmem:[#allocation4] ss:$8 sm:$0xf] %vm5404_vm0, %v5268_v16  ;;  %1978 = vst.msk [vmem:[#allocation4 + $0x61] ss:$8 sm:$0xf] %vm5404_vm0, %v5268_v16 }
  0xa8   :  { %1278 = vmatprep.subr.bf16.mxu0 %v4961_v20  ;;  %1331 = vmatprep.subr.bf16.mxu1 %v4964_v21  ;;  %1686 = vst.msk [vmem:[#allocation2] ss:$8 sm:$0x30] %vm5404_vm0, %v5268_v16  ;;  %1688 = vst.msk [vmem:[#allocation2 + $0x90] ss:$8 sm:$0xf] %vm5404_vm0, %v5268_v16 }
  0xa9   :  { %1304 = vmatprep.mubr.bf16.mxu0 %v5267_v0  ;;  %1357 = vmatprep.mubr.bf16.mxu1 %v5267_v0  ;;  %1689 = vst.msk [vmem:[#allocation2 + $0x90] ss:$8 sm:$0x30] %vm5404_vm0, %v5268_v16  ;;  %1692 = vst.msk [vmem:[#allocation2 + $0x61] ss:$8 sm:$0x30] %vm5404_vm0, %v5268_v16 }
  0xaa   :  { %1694 = vst.msk [vmem:[#allocation2 + $0xf1] ss:$8 sm:$0xf] %vm5404_vm0, %v5268_v16  ;;  %1695 = vst.msk [vmem:[#allocation2 + $0xf1] ss:$8 sm:$0x30] %vm5404_vm0, %v5268_v16 }
  0xab   :  { %1279 = vmatpush1.bf16.msra.mxu0 %v4959_v22  ;;  %1332 = vmatpush1.bf16.msra.mxu1 %v4962_v23  ;;  %1830 = vst.msk [vmem:[#allocation3] ss:$8 sm:$0x30] %vm5404_vm0, %v5268_v16  ;;  %1832 = vst.msk [vmem:[#allocation3 + $0x90] ss:$8 sm:$0xf] %vm5404_vm0, %v5268_v16 }
  0xac   :  { %1280 = vmatprep.subr.bf16.mxu0 %v4967_v24  ;;  %1333 = vmatprep.subr.bf16.mxu1 %v4970_v25  ;;  %1833 = vst.msk [vmem:[#allocation3 + $0x90] ss:$8 sm:$0x30] %vm5404_vm0, %v5268_v16  ;;  %1836 = vst.msk [vmem:[#allocation3 + $0x61] ss:$8 sm:$0x30] %vm5404_vm0, %v5268_v16 }
  0xad   :  { %1838 = vst.msk [vmem:[#allocation3 + $0xf1] ss:$8 sm:$0xf] %vm5404_vm0, %v5268_v16  ;;  %1839 = vst.msk [vmem:[#allocation3 + $0xf1] ss:$8 sm:$0x30] %vm5404_vm0, %v5268_v16 }
  0xae   :  { %1973 = vst.msk [vmem:[#allocation4] ss:$8 sm:$0x30] %vm5404_vm0, %v5268_v16  ;;  %1975 = vst.msk [vmem:[#allocation4 + $0x90] ss:$8 sm:$0xf] %vm5404_vm0, %v5268_v16 }
  0xaf   :  { %1281 = vmatpush1.bf16.msra.mxu0 %v4965_v26  ;;  %1334 = vmatpush1.bf16.msra.mxu1 %v4968_v27  ;;  %1976 = vst.msk [vmem:[#allocation4 + $0x90] ss:$8 sm:$0x30] %vm5404_vm0, %v5268_v16  ;;  %1979 = vst.msk [vmem:[#allocation4 + $0x61] ss:$8 sm:$0x30] %vm5404_vm0, %v5268_v16 }
  0xb0   :  { %1282 = vmatprep.subr.bf16.mxu0 %v4973_v28  ;;  %1335 = vmatprep.subr.bf16.mxu1 %v4976_v29  ;;  %1981 = vst.msk [vmem:[#allocation4 + $0xf1] ss:$8 sm:$0xf] %vm5404_vm0, %v5268_v16  ;;  %1982 = vst.msk [vmem:[#allocation4 + $0xf1] ss:$8 sm:$0x30] %vm5404_vm0, %v5268_v16 }
  0xb1   :  { %v5045_v18 = vld [vmem:[#allocation8 + $0x164] ss:$72 sps:$4 sm:$0xff]   ;;  %v5043_v19 = vld [vmem:[#allocation8 + $0x160] ss:$72 sps:$4 sm:$0xff]   ;;  %v5048_v20 = vld [vmem:[#allocation8 + $0x1f4] ss:$72 sps:$4 sm:$0xff]  }
  0xb2   :  { %v5046_v21 = vld [vmem:[#allocation8 + $0x1f0] ss:$72 sps:$4 sm:$0xff]   ;;  %v5051_v22 = vld [vmem:[#allocation8 + $0x284] ss:$72 sps:$4 sm:$0xff]   ;;  %v5049_v23 = vld [vmem:[#allocation8 + $0x280] ss:$72 sps:$4 sm:$0xff]  }
  0xb3   :  { %1283 = vmatpush1.bf16.msra.mxu0 %v4971_v30  ;;  %1336 = vmatpush1.bf16.msra.mxu1 %v4974_v31  ;;  %v5054_v24 = vld [vmem:[#allocation8 + $0x314] ss:$72 sps:$4 sm:$0xff]   ;;  %v5052_v25 = vld [vmem:[#allocation8 + $0x310] ss:$72 sps:$4 sm:$0xff]   ;;  %v5057_v26 = vld [vmem:[#allocation8 + $0x3a4] ss:$72 sps:$4 sm:$0xff]  }
  0xb4   :  { %1284 = vmatprep.subr.bf16.mxu0 %v4979_v32  ;;  %1337 = vmatprep.subr.bf16.mxu1 %v4982_v33  ;;  %v5055_v27 = vld [vmem:[#allocation8 + $0x3a0] ss:$72 sps:$4 sm:$0xff]   ;;  %v5060_v28 = vld [vmem:[#allocation8 + $0x434] ss:$72 sps:$4 sm:$0xff]   ;;  %v5058_v29 = vld [vmem:[#allocation8 + $0x430] ss:$72 sps:$4 sm:$0xff]  }
  0xb5   :  { %v5467_v30 = vshrl.u32 %v250_v13, 7  ;;  %v2139_v31 = vld [vmem:[#allocation11] ss:$8 sm:$0xf] }
  0xb6   :  { %v2140_v32 = vld [vmem:[#allocation11] ss:$8 sm:$0x30]  ;;  %v2460_v33 = vld [vmem:[#allocation11 + $0x3] ss:$8 sm:$0xf] }
  0xb7   :  { %1285 = vmatpush1.bf16.msra.mxu0 %v4977_v34  ;;  %1338 = vmatpush1.bf16.msra.mxu1 %v4980_v35  ;;  %v2461_v34 = vld [vmem:[#allocation11 + $0x3] ss:$8 sm:$0x30]  ;;  %v2353_v16 = vld [vmem:[#allocation11 + $0x2] ss:$8 sm:$0xf] }
  0xb8   :  { %1286 = vmatprep.subr.bf16.mxu0 %v4985_v36  ;;  %1339 = vmatprep.subr.bf16.mxu1 %v4988_v38  ;;  %v5061_v35 = vld [vmem:[#allocation13 + $0x40] sm:$0xff]  }
  0xb9   :  { %v5062_v36 = vld [vmem:[#allocation13 + $0xc0] sm:$0xff]  }
  0xba   :  { %v3178_v38 = vld [vmem:[#allocation11 + $0x6] ss:$8 sm:$0xf] }
  0xbb   :  { %1287 = vmatpush1.bf16.msra.mxu0 %v4983_v39  ;;  %1340 = vmatpush1.bf16.msra.mxu1 %v4986_v40  ;;  %v5063_v39 = vld [vmem:[#allocation13] sm:$0xff]  }
  0xbc   :  { %1378 = vmatprep.subr.bf16.mxu0 %v4991_v41  ;;  %1431 = vmatprep.subr.bf16.mxu1 %v4994_v42  ;;  %v5064_v40 = vld [vmem:[#allocation13 + $0x80] sm:$0xff]   ;;  %v5470_v42 = vsub.s32 0, %v5467_v30 }
  0xbd   :  { %v3179_v41 = vld [vmem:[#allocation11 + $0x6] ss:$8 sm:$0x30] }
  0xbe   :  { %1305 = vmatmul.mubr.bf16.vlgmr.msra.gmra.mrb[16].mxu0 %v5375_v37  ;;  %1358 = vmatmul.mubr.bf16.vlgmr.msra.gmra.mrb[16].mxu1 %v5375_v37 }
  0xbf   :  { %1379 = vmatpush1.bf16.msra.mxu0 %v4989_v43  ;;  %1432 = vmatpush1.bf16.msra.mxu1 %v4992_v44  ;;  %v5479_v43 = vsub.s32 3, %v5467_v30  ;;  %v5481_v44 = vor.u32 %v2140_v32, %v2139_v31 }
  0xc0   :  { %1380 = vmatprep.subr.bf16.mxu0 %v4997_v45  ;;  %1433 = vmatprep.subr.bf16.mxu1 %v5000_v46  ;;  %v2246_v45 = vld [vmem:[#allocation11 + $0x1] ss:$8 sm:$0xf]  ;;  %v5483_v46 = vor.u32 %v2461_v34, %v2460_v33 }
  0xc1   :  { %1314 = vmatprep.mubr.bf16.mxu0 %v5267_v0  ;;  %1367 = vmatprep.mubr.bf16.mxu1 %v5267_v0  ;;  %6824 = vst [vmem:[#allocation19_spill] sm:$0xff] %v5481_v44  ;;  %v5076_v33 = vld [vmem:[#allocation13 + $0x98] sm:$0xff]   ;;  %v5077_v34 = vld [vmem:[#allocation13 + $0x60] sm:$0xff]  }
  0xc2   :  { %6825 = vst [vmem:[#allocation20_spill] sm:$0xff] %v5483_v46 }
  0xc3   :  { %1381 = vmatpush1.bf16.msra.mxu0 %v4995_v47  ;;  %1434 = vmatpush1.bf16.msra.mxu1 %v4998_v48  ;;  %v5486_v47 = vsub.s32 4, %v5467_v30  ;;  %v5065_v48 = vld [vmem:[#allocation13 + $0x48] sm:$0xff]  }
  0xc4   :  { %1382 = vmatprep.subr.bf16.mxu0 %v5003_v49  ;;  %1435 = vmatprep.subr.bf16.mxu1 %v5006_v51  ;;  %v5066_v49 = vld [vmem:[#allocation13 + $0xc8] sm:$0xff]  }
  0xc5   :  { %6826 = vst [vmem:[#allocation21_spill] sm:$0xff] %v5486_v47  ;;  %v2247_v51 = vld [vmem:[#allocation11 + $0x1] ss:$8 sm:$0x30] }
  0xc6   :  { %1315 = vmatmul.mubr.bf16.gmra.mrb[20].mxu0 %v5381_v50  ;;  %1368 = vmatmul.mubr.bf16.gmra.mrb[20].mxu1 %v5381_v50 }
  0xc7   :  { %1383 = vmatpush1.bf16.msra.mxu0 %v5001_v52  ;;  %1436 = vmatpush1.bf16.msra.mxu1 %v5004_v53  ;;  %v5488_v52 = vor.u32 %v3179_v41, %v3178_v38  ;;  %v276_v53 = vsub.s32 6, %v5467_v30  ;;  %v5564_v38 = vrot.slane %v5483_v46, %v5479_v43 }
  0xc8   :  { %1384 = vmatprep.subr.bf16.mxu0 %v5009_v54  ;;  %1437 = vmatprep.subr.bf16.mxu1 %v5012_v55  ;;  %v5492_v54 = vsub.s32 5, %v5467_v30  ;;  %v280_v55 = vsub.s32 7, %v5467_v30 }
  0xc9   :  { %1410 = vmatprep.mubr.bf16.mxu0 %v5267_v0  ;;  %1463 = vmatprep.mubr.bf16.mxu1 %v5267_v0  ;;  %6827 = vst [vmem:[#allocation22_spill] sm:$0xff] %v5488_v52  ;;  %v5556_v32 = vrot.slane %v5488_v52, %v5470_v42  ;;  %6838 = vst [vmem:[#allocation33_spill] sm:$0xff] %v5564_v38 }
  0xca   :  { %6828 = vst [vmem:[#allocation23_spill] sm:$0xff] %v5492_v54 }
  0xcb   :  { %1385 = vmatpush1.bf16.msra.mxu0 %v5007_v56  ;;  %1438 = vmatpush1.bf16.msra.mxu1 %v5010_v57  ;;  %v5067_v56 = vld [vmem:[#allocation13 + $0x8] sm:$0xff]   ;;  %6836 = vst [vmem:[#allocation31_spill] sm:$0xff] %v5556_v32 }
  0xcc   :  { %1386 = vmatprep.subr.bf16.mxu0 %v5015_v58  ;;  %1439 = vmatprep.subr.bf16.mxu1 %v5018_v59  ;;  %v5068_v57 = vld [vmem:[#allocation13 + $0x88] sm:$0xff]  }
  0xcf   :  { %1387 = vmatpush1.bf16.msra.mxu0 %v5013_v60  ;;  %1440 = vmatpush1.bf16.msra.mxu1 %v5016_v61  ;;  %v2700_v60 = vld [vmem:[#allocation11 + $0x4] ss:$8 sm:$0xf] }
  0xd0   :  { %1388 = vmatprep.subr.bf16.mxu0 %v5021_v62  ;;  %1441 = vmatprep.subr.bf16.mxu1 %v5024_v63  ;;  %v2701_v61 = vld [vmem:[#allocation11 + $0x4] ss:$8 sm:$0x30]  ;;  %v5505_v63 = vor.u32 %v2247_v51, %v2246_v45 }
  0xd2   :  { %6829 = vst [vmem:[#allocation24_spill] sm:$0xff] %v5505_v63 }
  0xd3   :  { %1389 = vmatpush1.bf16.msra.mxu0 %v5019_v1  ;;  %1442 = vmatpush1.bf16.msra.mxu1 %v5022_v2  ;;  %v3418_v2 = vld [vmem:[#allocation11 + $0x7] ss:$8 sm:$0xf] }
  0xd4   :  { %1390 = vmatprep.subr.bf16.mxu0 %v5027_v3  ;;  %1443 = vmatprep.subr.bf16.mxu1 %v5030_v4  ;;  %v3419_v3 = vld [vmem:[#allocation11 + $0x7] ss:$8 sm:$0x30] }
  0xd7   :  { %1391 = vmatpush1.bf16.msra.mxu0 %v5025_v5  ;;  %1444 = vmatpush1.bf16.msra.mxu1 %v5028_v6 }
  0xd8   :  { %1392 = vmatprep.subr.bf16.mxu0 %v5033_v7  ;;  %1445 = vmatprep.subr.bf16.mxu1 %v5036_v8  ;;  %v245_v7 = vld [vmem:[#allocation10 + $0x8] sm:$0xff] }
  0xd9   :  { %v5069_v8 = vld [vmem:[#allocation13 + $0x50] sm:$0xff]   ;;  %v5581_v45 = vrot.slane %v245_v7, %v5479_v43 }
  0xdb   :  { %1393 = vmatpush1.bf16.msra.mxu0 %v5031_v9  ;;  %1446 = vmatpush1.bf16.msra.mxu1 %v5034_v10  ;;  %v5070_v9 = vld [vmem:[#allocation13 + $0xd0] sm:$0xff]  }
  0xdc   :  { %1484 = vmatprep.subr.bf16.mxu0 %v5039_v11  ;;  %4745 = vmatprep.subr.bf16.mxu1 %v5061_v35  ;;  %v5078_v35 = vld [vmem:[#allocation13 + $0xe0] sm:$0xff]  }
  0xde   :  { %1411 = vmatmul.mubr.bf16.vlgmr.msra.gmra.mrb[24].mxu0 %v5375_v37  ;;  %1464 = vmatmul.mubr.bf16.vlgmr.msra.gmra.mrb[24].mxu1 %v5375_v37 }
  0xdf   :  { %1485 = vmatpush1.bf16.msra.mxu0 %v5037_v12  ;;  %1420 = vmatprep.mubr.bf16.mxu0 %v5267_v0 }
  0xe0   :  { %1486 = vmatprep.subr.bf16.mxu0 %v5042_v14  ;;  %1473 = vmatprep.mubr.bf16.mxu1 %v5267_v0  ;;  %v5071_v14 = vld [vmem:[#allocation13 + $0x10] sm:$0xff]  }
  0xe1   :  { %4746 = vmatpush3.bf16.msra.mxu1 %v5063_v39  ;;  %v5568_v39 = vrot.slane %v5488_v52, %v5479_v43 }
  0xe2   :  { %4747 = vmatprep.subr.bf16.mxu1 %v5065_v48 }
  0xe3   :  { %1487 = vmatpush1.bf16.msra.mxu0 %v5040_v17  ;;  %v2354_v17 = vld [vmem:[#allocation11 + $0x2] ss:$8 sm:$0x30]  ;;  %6839 = vst [vmem:[#allocation34_spill] sm:$0xff] %v5568_v39 }
  0xe4   :  { %1488 = vmatprep.subr.bf16.mxu0 %v5045_v18  ;;  %v2939_v18 = vld [vmem:[#allocation11 + $0x5] ss:$8 sm:$0xf]  ;;  %v5583_v48 = vor.u32 %v2354_v17, %v2353_v16  ;;  %v5621_v16 = vrot.slane %v245_v7, %v5492_v54  ;;  %v246_v17 = vld [vmem:[#allocation10 + $0x10] sm:$0x3] }
  0xe5   :  { %4748 = vmatpush3.bf16.msra.mxu1 %v5067_v56 }
  0xe6   :  { %1421 = vmatmul.mubr.bf16.gmra.mrb[28].mxu0 %v5381_v50  ;;  %1474 = vmatmul.mubr.bf16.gmra.mrb[28].mxu1 %v5381_v50  ;;  %6841 = vst [vmem:[#allocation36_spill] sm:$0xff] %v5583_v48  ;;  %6852 = vst [vmem:[#allocation47_spill] sm:$0xff] %v5621_v16 }
  0xe7   :  { %1489 = vmatpush1.bf16.msra.mxu0 %v5043_v19  ;;  %1516 = vmatprep.mubr.bf16.mxu0 %v5267_v0  ;;  %v2940_v19 = vld [vmem:[#allocation11 + $0x5] ss:$8 sm:$0x30] }
  0xe8   :  { %1490 = vmatprep.subr.bf16.mxu0 %v5048_v20  ;;  %v5537_v20 = vrot.slane %v5481_v44, %v5470_v42  ;;  %4749 = vmatprep.subr.bf16.mxu1 %v5069_v8  ;;  %v5589_v51 = vor.u32 %v2940_v19, %v2939_v18  ;;  %v5606_v8 = vrot.slane %v245_v7, %v5486_v47 }
  0xe9   :  { %4750 = vmatpush3.bf16.msra.mxu1 %v5071_v14 }
  0xea   :  { %6832 = vst [vmem:[#allocation27_spill] sm:$0xff] %v5537_v20  ;;  %6843 = vst [vmem:[#allocation38_spill] sm:$0xff] %v5589_v51 }
  0xeb   :  { %1491 = vmatpush1.bf16.msra.mxu0 %v5046_v21  ;;  %v5539_v21 = vor.u32 %v2701_v61, %v2700_v60  ;;  %v5080_v60 = vld [vmem:[#allocation13 + $0xa0] sm:$0xff]   ;;  %6848 = vst [vmem:[#allocation43_spill] sm:$0xff] %v5606_v8 }
  0xec   :  { %1492 = vmatprep.subr.bf16.mxu0 %v5051_v22  ;;  %v5541_v22 = vor.u32 %v3419_v3, %v3418_v2 }
  0xed   :  { %6833 = vst [vmem:[#allocation28_spill] sm:$0xff] %v5539_v21  ;;  %v5625_v18 = vrot.slane %v5539_v21, %v5479_v43 }
  0xee   :  { %6834 = vst [vmem:[#allocation29_spill] sm:$0xff] %v5541_v22  ;;  %v5629_v19 = vrot.slane %v5541_v22, %v5479_v43 }
  0xef   :  { %1493 = vmatpush1.bf16.msra.mxu0 %v5049_v23  ;;  %v3657_v23 = vld [vmem:[#allocation11 + $0x30] ss:$8 sm:$0xf]  ;;  %6853 = vst [vmem:[#allocation48_spill] sm:$0xff] %v5625_v18 }
  0xf0   :  { %1494 = vmatprep.subr.bf16.mxu0 %v5054_v24  ;;  %v3658_v24 = vld [vmem:[#allocation11 + $0x30] ss:$8 sm:$0x30]  ;;  %6854 = vst [vmem:[#allocation49_spill] sm:$0xff] %v5629_v19 }
  0xf1   :  { %v5595_v61 = vor.u32 %v3658_v24, %v3657_v23  ;;  %v5633_v23 = vrot.slane %v245_v7, %v280_v55  ;;  %v5088_v19 = vld [vmem:[#allocation13 + $0xb0] sm:$0xff]  }
  0xf3   :  { %1495 = vmatpush1.bf16.msra.mxu0 %v5052_v25  ;;  %v5545_v25 = vrot.slane %v5483_v46, %v5470_v42  ;;  %6845 = vst [vmem:[#allocation40_spill] sm:$0xff] %v5595_v61  ;;  %6855 = vst [vmem:[#allocation50_spill] sm:$0xff] %v5633_v23 }
  0xf4   :  { %1496 = vmatprep.subr.bf16.mxu0 %v5057_v26  ;;  %v5548_v26 = vrot.slane %v245_v7, %v5470_v42 }
  0xf5   :  { %6835 = vst [vmem:[#allocation30_spill] sm:$0xff] %v5545_v25 }
  0xf7   :  { %1497 = vmatpush1.bf16.msra.mxu0 %v5055_v27  ;;  %v5073_v27 = vld [vmem:[#allocation13 + $0x58] sm:$0xff]  }
  0xf8   :  { %1498 = vmatprep.subr.bf16.mxu0 %v5060_v28  ;;  %v5074_v28 = vld [vmem:[#allocation13 + $0xd8] sm:$0xff]   ;;  %4751 = vmatprep.subr.bf16.mxu1 %v5073_v27  ;;  %v5645_v27 = vrot.slane %v5539_v21, %v5470_v42 }
  0xfa   :  { %6858 = vst [vmem:[#allocation53_spill] sm:$0xff] %v5645_v27 }
  0xfb   :  { %1499 = vmatpush1.bf16.msra.mxu0 %v5058_v29  ;;  %v5075_v29 = vld [vmem:[#allocation13 + $0x18] sm:$0xff]  }
  0xfc   :  { %4773 = vmatprep.subr.bf16.mxu0 %v5062_v36  ;;  %v5560_v36 = vrot.slane %v5481_v44, %v5479_v43  ;;  %4752 = vmatpush3.bf16.msra.mxu1 %v5075_v29 }
  0xfd   :  { %4753 = vmatprep.subr.bf16.mxu1 %v5077_v34  ;;  %v5081_v34 = vld [vmem:[#allocation13 + $0x68] sm:$0xff]  }
  0xfe   :  { %1517 = vmatmul.mubr.bf16.vlgmr.msra.gmra.mrb[32].mxu0 %v5375_v37  ;;  %v244_v37 = vld [vmem:[#allocation10] sm:$0xff]  ;;  %6837 = vst [vmem:[#allocation32_spill] sm:$0xff] %v5560_v36 }
  0xff   :  { %1526 = vmatprep.mubr.bf16.mxu0 %v5267_v0  ;;  %v5473_v0 = vsub.s32 1, %v5467_v30  ;;  %4774 = vmatpush3.bf16.msra.mxu0 %v5064_v40  ;;  %v5496_v58 = vrot.slane %v244_v37, %v5470_v42  ;;  %v5515_v5 = vrot.slane %v244_v37, %v5479_v43  ;;  %v5518_v6 = vrot.slane %v244_v37, %v5486_v47 }
 0x100   :  { %4775 = vmatprep.subr.bf16.mxu0 %v5066_v49  ;;  %v5526_v11 = vrot.slane %v244_v37, %v276_v53  ;;  %v5529_v12 = vrot.slane %v244_v37, %v5492_v54  ;;  %v5533_v13 = vrot.slane %v244_v37, %v280_v55  ;;  %v5572_v40 = vrot.slane %v5505_v63, %v5470_v42 }
 0x101   :  { %v5499_v59 = vrot.slane %v244_v37, %v5473_v0  ;;  %v5503_v62 = vrot.slane %v5481_v44, %v5473_v0  ;;  %v5509_v1 = vrot.slane %v5483_v46, %v5473_v0  ;;  %v5522_v10 = vrot.slane %v5488_v52, %v5473_v0 }
 0x102   :  { %v5552_v31 = vrot.slane %v5505_v63, %v5473_v0  ;;  %6840 = vst [vmem:[#allocation35_spill] sm:$0xff] %v5572_v40  ;;  %v5587_v49 = vrot.slane %v5539_v21, %v5473_v0  ;;  %v5593_v56 = vrot.slane %v5541_v22, %v5473_v0  ;;  %v5641_v24 = vrot.slane %v5589_v51, %v5473_v0 }
 0x103   :  { %4776 = vmatpush3.bf16.msra.mxu0 %v5068_v57  ;;  %6830 = vst [vmem:[#allocation25_spill] sm:$0xff] %v5509_v1  ;;  %6831 = vst [vmem:[#allocation26_spill] sm:$0xff] %v5522_v10  ;;  %v5079_v57 = vld [vmem:[#allocation13 + $0x20] sm:$0xff]   ;;  %v5657_v55 = vrot.slane %v5541_v22, %v5470_v42 }
 0x104   :  { %4777 = vmatprep.subr.bf16.mxu0 %v5070_v9  ;;  %6842 = vst [vmem:[#allocation37_spill] sm:$0xff] %v5587_v49  ;;  %6844 = vst [vmem:[#allocation39_spill] sm:$0xff] %v5593_v56  ;;  %v5610_v9 = vrot.slane %v5505_v63, %v5479_v43  ;;  %4754 = vmatpush3.bf16.msra.mxu1 %v5079_v57  ;;  %v5664_v57 = vrot.slane %v5583_v48, %v5470_v42 }
 0x105   :  { %6857 = vst [vmem:[#allocation52_spill] sm:$0xff] %v5641_v24  ;;  %6861 = vst [vmem:[#allocation56_spill] sm:$0xff] %v5657_v55  ;;  %4755 = vmatprep.subr.bf16.mxu1 %v5081_v34 }
 0x106   :  { %1527 = vmatmul.mubr.bf16.gmra.mrb[36].mxu0 %v5381_v50  ;;  %v5476_v50 = vsub.s32 2, %v5467_v30  ;;  %6849 = vst [vmem:[#allocation44_spill] sm:$0xff] %v5610_v9  ;;  %v5653_v30 = vrot.slane %v5583_v48, %v5479_v43  ;;  %6863 = vst [vmem:[#allocation58_spill] sm:$0xff] %v5664_v57 }
 0x107   :  { %4778 = vmatpush3.bf16.msra.mxu0 %v5072_v15  ;;  %v5618_v15 = vrot.slane %v245_v7, %v276_v53  ;;  %v5637_v53 = vrot.slane %v5583_v48, %v5473_v0 }
 0x108   :  { %v5512_v4 = vrot.slane %v244_v37, %v5476_v50  ;;  %v5575_v41 = vrot.slane %v245_v7, %v5476_v50  ;;  %v5578_v37 = vrot.slane %v245_v7, %v5473_v0  ;;  %4779 = vmatprep.subr.bf16.mxu0 %v5074_v28  ;;  %v5599_v2 = vrot.slane %v5481_v44, %v5476_v50 }
 0x109   :  { %v5603_v3 = vrot.slane %v5483_v46, %v5476_v50  ;;  %v5614_v14 = vrot.slane %v5488_v52, %v5476_v50  ;;  %6851 = vst [vmem:[#allocation46_spill] sm:$0xff] %v5618_v15  ;;  %6856 = vst [vmem:[#allocation51_spill] sm:$0xff] %v5637_v53  ;;  %v5649_v28 = vrot.slane %v5595_v61, %v5473_v0 }
 0x10a   :  { %6846 = vst [vmem:[#allocation41_spill] sm:$0xff] %v5599_v2  ;;  %6860 = vst [vmem:[#allocation55_spill] sm:$0xff] %v5653_v30  ;;  %v5672_v47 = vrot.slane %v5539_v21, %v5476_v50  ;;  %v5084_v30 = vld [vmem:[#allocation13 + $0xa8] sm:$0xff]  }
 0x10b   :  { %4780 = vmatpush3.bf16.msra.mxu0 %v5076_v33  ;;  %6847 = vst [vmem:[#allocation42_spill] sm:$0xff] %v5603_v3  ;;  %6850 = vst [vmem:[#allocation45_spill] sm:$0xff] %v5614_v14  ;;  %v5660_v33 = vrot.slane %v246_v17, %v5470_v42 }
 0x10c   :  { %4781 = vmatprep.subr.bf16.mxu0 %v5078_v35  ;;  %6859 = vst [vmem:[#allocation54_spill] sm:$0xff] %v5649_v28  ;;  %v5082_v35 = vld [vmem:[#allocation13 + $0xe8] sm:$0xff]   ;;  %6865 = vst [vmem:[#allocation60_spill] sm:$0xff] %v5672_v47  ;;  %v5678_v28 = vrot.slane %v5589_v51, %v5479_v43 }
 0x10d   :  { %6862 = vst [vmem:[#allocation57_spill] sm:$0xff] %v5660_v33  ;;  %v5083_v33 = vld [vmem:[#allocation13 + $0x28] sm:$0xff]  }
 0x10e   :  { %6866 = vst [vmem:[#allocation61_spill] sm:$0xff] %v5678_v28  ;;  %4756 = vmatpush3.bf16.msra.mxu1 %v5083_v33 }
 0x10f   :  { %4782 = vmatpush3.bf16.msra.mxu0 %v5080_v60  ;;  %v5668_v60 = vrot.slane %v5505_v63, %v5476_v50  ;;  %v5682_v63 = vrot.slane %v5541_v22, %v5476_v50 }
 0x110   :  { %4783 = vmatprep.subr.bf16.mxu0 %v5082_v35 }
 0x111   :  { %6864 = vst [vmem:[#allocation59_spill] sm:$0xff] %v5668_v60  ;;  %6867 = vst [vmem:[#allocation62_spill] sm:$0xff] %v5682_v63 }
 0x113   :  { %4784 = vmatpush3.bf16.msra.mxu0 %v5084_v30 }
 0x151   :  { %v1094_v7 = vpop.f32.mrb[0].mxu0  ;;  %v1147_v29 = vpop.f32.mrb[0].mxu1 }
 0x152   :  { %v1095_v52 = vadd.f32 %v1094_v7, %v5496_v58  ;;  %v1096_v46 = vpop.f32.mrb[1].mxu0  ;;  %v1148_v44 = vadd.f32 %v1147_v29, %v5512_v4  ;;  %v1149_v54 = vpop.f32.mrb[1].mxu1  ;;  %v5687_v29 = vrot.slane %v246_v17, %v5473_v0  ;;  %v5085_v17 = vld [vmem:[#allocation13 + $0x70] sm:$0xff]  }
 0x153   :  { %v1097_v57 = vadd.f32 %v1096_v46, %v5499_v59  ;;  %v1098_v21 = vpop.f32.mrb[2].mxu0  ;;  %v1150_v7 = vadd.f32 %v1149_v54, %v5515_v5  ;;  %v1151_v24 = vpop.f32.mrb[2].mxu1  ;;  %4757 = vmatprep.subr.bf16.mxu1 %v5085_v17  ;;  %v5089_v17 = vld [vmem:[#allocation13 + $0x78] sm:$0xff]  }
 0x154   :  { %6868 = vst [vmem:[#allocation63_spill] sm:$0xff] %v5687_v29  ;;  %v1537_v53 = vmax.f32 %v1095_v52, 0.0  ;;  %v1099_v23 = vadd.f32 %v1098_v21, %v5496_v58  ;;  %v1100_v28 = vpop.f32.mrb[3].mxu0  ;;  %v1539_v16 = vmax.f32 %v1148_v44, 0.0  ;;  %v1152_v22 = vadd.f32 %v1151_v24, %v5512_v4  ;;  %v1153_v15 = vpop.f32.mrb[3].mxu1  ;;  %v5086_v29 = vld [vmem:[#allocation13 + $0xf0] sm:$0xff]  }
 0x155   :  { %v1538_v46 = vmax.f32 %v1097_v57, 0.0  ;;  %v1101_v8 = vadd.f32 %v1100_v28, %v5499_v59  ;;  %v1540_v54 = vmax.f32 %v1150_v7, 0.0  ;;  %v1154_v63 = vadd.f32 %v1153_v15, %v5515_v5  ;;  %v5087_v21 = vld [vmem:[#allocation13 + $0x30] sm:$0xff]   ;;  %4785 = vmatprep.subr.bf16.mxu0 %v5086_v29 }
 0x156   :  { %v1609_v34 = vmin.f32 %v1537_v53, 6.0  ;;  %v1555_v35 = vmax.f32 %v1099_v23, 0.0  ;;  %v1611_v52 = vmin.f32 %v1539_v16, 6.0  ;;  %v1557_v47 = vmax.f32 %v1152_v22, 0.0  ;;  %4758 = vmatpush3.bf16.msra.mxu1 %v5087_v21  ;;  %4786 = vmatpush3.bf16.msra.mxu0 %v5088_v19  ;;  %v5091_v21 = vld [vmem:[#allocation13 + $0x38] sm:$0xff]  }
 0x157   :  { %v1610_v44 = vmin.f32 %v1538_v46, 6.0  ;;  %v1556_v18 = vmax.f32 %v1101_v8, 0.0  ;;  %v1612_v24 = vmin.f32 %v1540_v54, 6.0  ;;  %v1558_v9 = vmax.f32 %v1154_v63, 0.0  ;;  %4759 = vmatprep.subr.bf16.mxu1 %v5089_v17 }
 0x158   :  { %v1721_v30 = vrot.slane %v1609_v34, 7  ;;  %v1627_v33 = vmin.f32 %v1555_v35, 6.0  ;;  %v1723_v28 = vrot.slane %v1611_v52, 7  ;;  %v1629_v57 = vmin.f32 %v1557_v47, 6.0  ;;  %v5090_v47 = vld [vmem:[#allocation13 + $0xf8] sm:$0xff]  }
 0x159   :  { %v1722_v15 = vrot.slane %v1610_v44, 7  ;;  %v1628_v7 = vmin.f32 %v1556_v18, 6.0  ;;  %v1104_v53 = vpop.f32.mrb[4].mxu0  ;;  %v1724_v23 = vrot.slane %v1612_v24, 7  ;;  %v1630_v16 = vmin.f32 %v1558_v9, 6.0  ;;  %v1157_v22 = vpop.f32.mrb[4].mxu1  ;;  %4787 = vmatprep.subr.bf16.mxu0 %v5090_v47 }
 0x15a   :  { %1793 = vst [vmem:[#allocation2] sm:$0xfe] %v1721_v30  ;;  %v1727_v60 = vrot.slane %v1627_v33, 7  ;;  %v1105_v8 = vadd.f32 %v1104_v53, %v5496_v58  ;;  %v1106_v46 = vpop.f32.mrb[5].mxu0  ;;  %1795 = vst [vmem:[#allocation2 + $0x10] sm:$0xfe] %v1723_v28  ;;  %v1158_v29 = vadd.f32 %v1157_v22, %v5512_v4  ;;  %4760 = vmatpush3.bf16.msra.mxu1 %v5091_v21 }
 0x15b   :  { %v1731_v63 = vrot.slane %v1629_v57, 7  ;;  %v1159_v54 = vpop.f32.mrb[5].mxu1  ;;  %1794 = vst [vmem:[#allocation2 + $0x8] sm:$0xfe] %v1722_v15  ;;  %v1729_v19 = vrot.slane %v1628_v7, 7  ;;  %v1107_v18 = vadd.f32 %v1106_v46, %v5499_v59  ;;  %v1108_v34 = vpop.f32.mrb[6].mxu0 }
 0x15c   :  { %1796 = vst [vmem:[#allocation2 + $0x18] sm:$0xfe] %v1724_v23  ;;  %v1733_v9 = vrot.slane %v1630_v16, 7  ;;  %v1160_v35 = vadd.f32 %v1159_v54, %v5515_v5  ;;  %v1161_v52 = vpop.f32.mrb[6].mxu1  ;;  %v5092_v44 = vld [vmem:[#allocation13 + $0xb8] sm:$0xff]   ;;  %v1728_v24 = vsel %vm1720_vm1, %v1721_v30, %v1727_v60  ;;  %v1573_v33 = vmax.f32 %v1105_v8, 0.0 }
 0x15d   :  { %1805 = vst [vmem:[#allocation2 + $0x60] sm:$0x1] %v1727_v60  ;;  %v1109_v57 = vadd.f32 %v1108_v34, %v5496_v58  ;;  %v1110_v53 = vpop.f32.mrb[7].mxu0  ;;  %v1732_v22 = vsel %vm1720_vm1, %v1723_v28, %v1731_v63  ;;  %1807 = vst [vmem:[#allocation2 + $0x70] sm:$0x1] %v1731_v63  ;;  %v1163_v7 = vpop.f32.mrb[7].mxu1  ;;  %v1730_v16 = vsel %vm1720_vm1, %v1722_v15, %v1729_v19  ;;  %4788 = vmatpush3.bf16.msra.mxu0 %v5092_v44 }
 0x15e   :  { %1799 = vst [vmem:[#allocation2 + $0x30] sm:$0xff] %v1728_v24  ;;  %1806 = vst [vmem:[#allocation2 + $0x68] sm:$0x1] %v1729_v19  ;;  %v1574_v46 = vmax.f32 %v1107_v18, 0.0  ;;  %v1111_v54 = vadd.f32 %v1110_v53, %v5499_v59  ;;  %v1734_v60 = vsel %vm1720_vm1, %v1724_v23, %v1733_v9  ;;  %v1645_v58 = vmin.f32 %v1573_v33, 6.0 }
 0x15f   :  { %1801 = vst [vmem:[#allocation2 + $0x40] sm:$0xff] %v1732_v22  ;;  %1808 = vst [vmem:[#allocation2 + $0x78] sm:$0x1] %v1733_v9  ;;  %v1591_v30 = vmax.f32 %v1109_v57, 0.0  ;;  %v1575_v28 = vmax.f32 %v1158_v29, 0.0  ;;  %v1576_v8 = vmax.f32 %v1160_v35, 0.0  ;;  %v1162_v15 = vadd.f32 %v1161_v52, %v5512_v4 }
 0x160   :  { %1800 = vst [vmem:[#allocation2 + $0x38] sm:$0xff] %v1730_v16  ;;  %1802 = vst [vmem:[#allocation2 + $0x48] sm:$0xff] %v1734_v60  ;;  %v1646_v63 = vmin.f32 %v1574_v46, 6.0  ;;  %v1592_v17 = vmax.f32 %v1111_v54, 0.0  ;;  %v1164_v47 = vadd.f32 %v1163_v7, %v5515_v5  ;;  %v5708_v59 = vld [vmem:[%s6729_s4] sm:$0x3f] }
 0x161   :  { %v1739_v23 = vrot.slane %v1645_v58, 7  ;;  %v1663_v19 = vmin.f32 %v1591_v30, 6.0  ;;  %v1647_v18 = vmin.f32 %v1575_v28, 6.0  ;;  %v1648_v34 = vmin.f32 %v1576_v8, 6.0 }
 0x162   :  { %v1740_v9 = vrot.slane %v1646_v63, 7  ;;  %v1664_v29 = vmin.f32 %v1592_v17, 6.0  ;;  %v1593_v35 = vmax.f32 %v1162_v15, 0.0  ;;  %v1594_v21 = vmax.f32 %v1164_v47, 0.0  ;;  %v2116_v5 = vld [vmem:[#allocation2 + $0x8] sm:$0xff] }
 0x163   :  { %1811 = vst [vmem:[#allocation2 + $0x90] sm:$0xfe] %v1739_v23  ;;  %v1745_v44 = vrot.slane %v1663_v19, 7  ;;  %v1741_v4 = vrot.slane %v1647_v18, 7  ;;  %v1742_v52 = vrot.slane %v1648_v34, 7  ;;  %v5712_v33 = vrot.slane %v5708_v59, %v5473_v0  ;;  %v2118_v46 = vld [vmem:[#allocation2 + $0x18] sm:$0xff] }
 0x164   :  { %v2436_v24 = vld [vmem:[#allocation2 + $0x8] sm:$0xfe]  ;;  %1812 = vst [vmem:[#allocation2 + $0x98] sm:$0xfe] %v1740_v9  ;;  %v1747_v57 = vrot.slane %v1664_v29, 7  ;;  %v1665_v53 = vmin.f32 %v1593_v35, 6.0  ;;  %v5715_v7 = vmul.f32 %v5503_v62, %v2116_v5  ;;  %v5721_v28 = vmul.f32 %v5560_v36, %v2118_v46 }
 0x165   :  { %6869 = vst [vmem:[#allocation64_spill] sm:$0xff] %v5712_v33  ;;  %v1666_v22 = vmin.f32 %v1594_v21, 6.0  ;;  %v3154_v16 = vld [vmem:[#allocation2 + $0x8] sm:$0xfc]  ;;  %v1746_v54 = vsel %vm1720_vm1, %v1739_v23, %v1745_v44  ;;  %1823 = vst [vmem:[#allocation2 + $0xf0] sm:$0x1] %v1745_v44  ;;  %v2495_v58 = vmul.f32 %v5509_v1, %v2436_v24 }
 0x166   :  { %1813 = vst [vmem:[#allocation2 + $0xa0] sm:$0xfe] %v1741_v4  ;;  %1814 = vst [vmem:[#allocation2 + $0xa8] sm:$0xfe] %v1742_v52  ;;  %v2442_v60 = vld [vmem:[#allocation2 + $0x68] sm:$0x1]  ;;  %v3213_v0 = vmul.f32 %v5522_v10, %v3154_v16  ;;  %v1748_v8 = vsel %vm1720_vm1, %v1740_v9, %v1747_v57 }
 0x167   :  { %v3160_v30 = vld [vmem:[#allocation2 + $0x68] sm:$0x3]  ;;  %1817 = vst [vmem:[#allocation2 + $0xc0] sm:$0xff] %v1746_v54  ;;  %1824 = vst [vmem:[#allocation2 + $0xf8] sm:$0x1] %v1747_v57  ;;  %v1749_v63 = vrot.slane %v1665_v53, 7  ;;  %v2507_v47 = vmul.f32 %v5509_v1, %v2442_v60 }
 0x168   :  { %v1751_v17 = vrot.slane %v1666_v22, 7  ;;  %v2122_v15 = vld [vmem:[#allocation2 + $0x38] sm:$0xff]  ;;  %v2124_v23 = vld [vmem:[#allocation2 + $0x48] sm:$0xff]  ;;  %1818 = vst [vmem:[#allocation2 + $0xc8] sm:$0xff] %v1748_v8  ;;  %v2570_v34 = vrot.slane %v2495_v58, 1  ;;  %v3225_v24 = vmul.f32 %v5522_v10, %v3160_v30  ;;  %v3288_v22 = vrot.slane %v3213_v0, 2 }
 0x169   :  { %v5726_v19 = vmul.f32 %v5503_v62, %v2122_v15  ;;  %v2501_v18 = vmul.f32 %v5509_v1, %v2122_v15  ;;  %v3219_v29 = vmul.f32 %v5522_v10, %v2122_v15  ;;  %v2438_v35 = vld [vmem:[#allocation2 + $0x18] sm:$0xfe]  ;;  %v2444_v21 = vld [vmem:[#allocation2 + $0x78] sm:$0x1]  ;;  %v1750_v9 = vsel %vm1720_vm1, %v1741_v4, %v1749_v63  ;;  %1825 = vst [vmem:[#allocation2 + $0x100] sm:$0x1] %v1749_v63 }
 0x16a   :  { %v1752_v44 = vsel %vm1720_vm1, %v1742_v52, %v1751_v17  ;;  %1826 = vst [vmem:[#allocation2 + $0x108] sm:$0x1] %v1751_v17  ;;  %v2587_v5 = vrot.slane %v2507_v47, 1  ;;  %v3156_v57 = vld [vmem:[#allocation2 + $0x18] sm:$0xfc]  ;;  %1819 = vst [vmem:[#allocation2 + $0xd0] sm:$0xff] %v1750_v9  ;;  %v5734_v46 = vmul.f32 %v5560_v36, %v2124_v23  ;;  %v2497_v60 = vmul.f32 %v5564_v38, %v2438_v35 }
 0x16b   :  { %1820 = vst [vmem:[#allocation2 + $0xd8] sm:$0xff] %v1752_v44  ;;  %v2571_v53 = vrot.slane %v2501_v18, 1  ;;  %v3289_v16 = vrot.slane %v3219_v29, 2  ;;  %v3305_v54 = vrot.slane %v3225_v24, 2  ;;  %v2503_v4 = vmul.f32 %v5564_v38, %v2124_v23  ;;  %v3162_v58 = vld [vmem:[#allocation2 + $0x78] sm:$0x3] }
 0x16c   :  { %v2509_v52 = vmul.f32 %v5564_v38, %v2444_v21  ;;  %v3215_v63 = vmul.f32 %v5568_v39, %v3156_v57  ;;  %v2115_v17 = vld [vmem:[#allocation2] sm:$0xff]  ;;  %v2576_v47 = vrot.slane %v2497_v60, 1  ;;  %v2121_v35 = vld [vmem:[#allocation2 + $0x30] sm:$0xff]  ;;  %v3227_v9 = vmul.f32 %v5568_v39, %v3162_v58 }
 0x16d   :  { %v5740_v8 = vsel %vm2566_vm2, %v2570_v34, %v2571_v53  ;;  %v5743_v30 = vsel %vm2566_vm2, %v2571_v53, %v2587_v5  ;;  %v5746_v0 = vsel %vm3284_vm3, %v3288_v22, %v3289_v16  ;;  %v5750_v15 = vsel %vm3284_vm3, %v3289_v16, %v3305_v54  ;;  %v2435_v21 = vld [vmem:[#allocation2] sm:$0xfe]  ;;  %v2441_v24 = vld [vmem:[#allocation2 + $0x60] sm:$0x1] }
 0x16e   :  { %v2577_v18 = vrot.slane %v2503_v4, 1  ;;  %v2591_v29 = vrot.slane %v2509_v52, 1  ;;  %v3221_v34 = vmul.f32 %v5568_v39, %v2124_v23  ;;  %v3294_v44 = vrot.slane %v3215_v63, 2  ;;  %v3153_v57 = vld [vmem:[#allocation2] sm:$0xfc] }
 0x16f   :  { %v5756_v5 = vrot.slane %v5595_v61, %v5479_v43  ;;  %v5766_v16 = vrot.slane %v5708_v59, %v5479_v43  ;;  %v5769_v23 = vmul.f32 %v5537_v20, %v2115_v17  ;;  %v3309_v60 = vrot.slane %v3227_v9, 2  ;;  %v3159_v58 = vld [vmem:[#allocation2 + $0x60] sm:$0x3] }
 0x170   :  { %v5759_v53 = vsel %vm2566_vm2, %v2576_v47, %v2577_v18  ;;  %v5762_v22 = vsel %vm2566_vm2, %v2577_v18, %v2591_v29  ;;  %v3295_v54 = vrot.slane %v3221_v34, 2  ;;  %v5772_v4 = vmul.f32 %v5537_v20, %v2121_v35 }
 0x171   :  { %6870 = vst [vmem:[#allocation65_spill] sm:$0xff] %v5756_v5  ;;  %6871 = vst [vmem:[#allocation66_spill] sm:$0xff] %v5759_v53  ;;  %v2494_v52 = vmul.f32 %v5545_v25, %v2435_v21  ;;  %v2500_v63 = vmul.f32 %v5545_v25, %v2121_v35  ;;  %v2506_v47 = vmul.f32 %v5545_v25, %v2441_v24  ;;  %v1200_v9 = vpop.f32.mrb[8].mxu0  ;;  %v1253_v20 = vpop.f32.mrb[8].mxu1 }
 0x172   :  { %6872 = vst [vmem:[#allocation67_spill] sm:$0xff] %v5762_v22  ;;  %6873 = vst [vmem:[#allocation68_spill] sm:$0xff] %v5766_v16  ;;  %v5779_v18 = vrot.slane %v5589_v51, %v5470_v42  ;;  %v5782_v43 = vmul.f32 %v5556_v32, %v3153_v57  ;;  %v5785_v17 = vsel %vm3284_vm3, %v3294_v44, %v3295_v54  ;;  %v1202_v36 = vpop.f32.mrb[9].mxu0 }
 0x173   :  { %6875 = vst [vmem:[#allocation70_spill] sm:$0xff] %v5785_v17  ;;  %v5788_v29 = vsel %vm3284_vm3, %v3295_v54, %v3309_v60  ;;  %v2567_v34 = vrot.slane %v2494_v52, 1  ;;  %v5791_v21 = vmul.f32 %v5556_v32, %v2121_v35  ;;  %v2568_v24 = vrot.slane %v2500_v63, 1  ;;  %v1255_v54 = vpop.f32.mrb[9].mxu1 }
 0x174   :  { %6874 = vst [vmem:[#allocation69_spill] sm:$0xff] %v5779_v18  ;;  %6876 = vst [vmem:[#allocation71_spill] sm:$0xff] %v5788_v29  ;;  %v2585_v25 = vrot.slane %v2506_v47, 1  ;;  %v5794_v39 = vmul.f32 %v5556_v32, %v3159_v58  ;;  %v1201_v38 = vadd.f32 %v1200_v9, %v5518_v6  ;;  %v1254_v44 = vadd.f32 %v1253_v20, %v5526_v11  ;;  %v1204_v58 = vpop.f32.mrb[10].mxu0  ;;  %v1257_v47 = vpop.f32.mrb[10].mxu1 }
 0x175   :  { %v5802_v35 = vrot.slane %v5595_v61, %v5470_v42  ;;  %v1203_v52 = vadd.f32 %v1202_v36, %v5529_v12  ;;  %v1256_v63 = vadd.f32 %v1255_v54, %v5533_v13  ;;  %v5807_v57 = vsel %vm2566_vm2, %v2567_v34, %v2568_v24  ;;  %v1206_v1 = vpop.f32.mrb[11].mxu0 }
 0x176   :  { %6878 = vst [vmem:[#allocation73_spill] sm:$0xff] %v5807_v57  ;;  %v5810_v9 = vsel %vm2566_vm2, %v2568_v24, %v2585_v25  ;;  %v1541_v20 = vmax.f32 %v1201_v38, 0.0  ;;  %v1543_v32 = vmax.f32 %v1254_v44, 0.0  ;;  %v1205_v60 = vadd.f32 %v1204_v58, %v5518_v6 }
 0x177   :  { %6877 = vst [vmem:[#allocation72_spill] sm:$0xff] %v5802_v35  ;;  %6879 = vst [vmem:[#allocation74_spill] sm:$0xff] %v5810_v9  ;;  %v1258_v10 = vadd.f32 %v1257_v47, %v5526_v11  ;;  %v1259_v35 = vpop.f32.mrb[11].mxu1  ;;  %v1542_v18 = vmax.f32 %v1203_v52, 0.0  ;;  %v1544_v36 = vmax.f32 %v1256_v63, 0.0  ;;  %v1207_v54 = vadd.f32 %v1206_v1, %v5529_v12 }
 0x178   :  { %v1260_v16 = vadd.f32 %v1259_v35, %v5533_v13  ;;  %v1613_v29 = vmin.f32 %v1541_v20, 6.0  ;;  %v1615_v34 = vmin.f32 %v1543_v32, 6.0  ;;  %v1559_v57 = vmax.f32 %v1205_v60, 0.0 }
 0x179   :  { %v1561_v17 = vmax.f32 %v1258_v10, 0.0  ;;  %v1614_v25 = vmin.f32 %v1542_v18, 6.0  ;;  %v1616_v24 = vmin.f32 %v1544_v36, 6.0  ;;  %v1560_v38 = vmax.f32 %v1207_v54, 0.0  ;;  %v1263_v53 = vpop.f32.mrb[12].mxu1  ;;  %v1210_v1 = vpop.f32.mrb[12].mxu0 }
 0x17a   :  { %v1562_v44 = vmax.f32 %v1260_v16, 0.0  ;;  %v1725_v9 = vrot.slane %v1613_v29, 7  ;;  %v1864_v58 = vrot.slane %v1615_v34, 7  ;;  %v1631_v33 = vmin.f32 %v1559_v57, 6.0  ;;  %v1265_v18 = vpop.f32.mrb[13].mxu1  ;;  %v1212_v16 = vpop.f32.mrb[13].mxu0 }
 0x17b   :  { %v1633_v47 = vmin.f32 %v1561_v17, 6.0  ;;  %v1726_v5 = vrot.slane %v1614_v25, 7  ;;  %v1865_v22 = vrot.slane %v1616_v24, 7  ;;  %v1632_v52 = vmin.f32 %v1560_v38, 6.0  ;;  %v1267_v20 = vpop.f32.mrb[14].mxu1  ;;  %v1214_v54 = vpop.f32.mrb[14].mxu0 }
 0x17c   :  { %v1634_v63 = vmin.f32 %v1562_v44, 6.0  ;;  %1797 = vst [vmem:[#allocation2 + $0x20] sm:$0xfe] %v1725_v9  ;;  %1936 = vst [vmem:[#allocation3] sm:$0xfe] %v1864_v58  ;;  %v1735_v35 = vrot.slane %v1631_v33, 7  ;;  %v1264_v10 = vadd.f32 %v1263_v53, %v5526_v11  ;;  %v1211_v60 = vadd.f32 %v1210_v1, %v5518_v6 }
 0x17d   :  { %v1870_v32 = vrot.slane %v1633_v47, 7  ;;  %1798 = vst [vmem:[#allocation2 + $0x28] sm:$0xfe] %v1726_v5  ;;  %1937 = vst [vmem:[#allocation3 + $0x8] sm:$0xfe] %v1865_v22  ;;  %v1737_v29 = vrot.slane %v1632_v52, 7  ;;  %v1266_v57 = vadd.f32 %v1265_v18, %v5533_v13  ;;  %v1213_v36 = vadd.f32 %v1212_v16, %v5529_v12 }
 0x17e   :  { %v1872_v17 = vrot.slane %v1634_v63, 7  ;;  %v1736_v34 = vsel %vm1720_vm1, %v1725_v9, %v1735_v35  ;;  %1809 = vst [vmem:[#allocation2 + $0x80] sm:$0x1] %v1735_v35  ;;  %v1579_v53 = vmax.f32 %v1264_v10, 0.0  ;;  %v1268_v25 = vadd.f32 %v1267_v20, %v5526_v11  ;;  %v1269_v24 = vpop.f32.mrb[15].mxu1  ;;  %v1216_v38 = vpop.f32.mrb[15].mxu0 }
 0x17f   :  { %v1871_v33 = vsel %vm1720_vm1, %v1864_v58, %v1870_v32  ;;  %1948 = vst [vmem:[#allocation3 + $0x60] sm:$0x1] %v1870_v32  ;;  %1803 = vst [vmem:[#allocation2 + $0x50] sm:$0xff] %v1736_v34  ;;  %v1738_v44 = vsel %vm1720_vm1, %v1726_v5, %v1737_v29  ;;  %v1580_v52 = vmax.f32 %v1266_v57, 0.0  ;;  %v1270_v9 = vadd.f32 %v1269_v24, %v5533_v13  ;;  %v5093_v5 = vld [vmem:[#allocation13 + $0x140] sm:$0xff]  }
 0x180   :  { %1942 = vst [vmem:[#allocation3 + $0x30] sm:$0xff] %v1871_v33  ;;  %1810 = vst [vmem:[#allocation2 + $0x88] sm:$0x1] %v1737_v29  ;;  %v5825_v47 = vsel %vm1720_vm1, %v1865_v22, %v1872_v17  ;;  %v1651_v58 = vmin.f32 %v1579_v53, 6.0  ;;  %v1597_v63 = vmax.f32 %v1268_v25, 0.0  ;;  %v1577_v1 = vmax.f32 %v1211_v60, 0.0  ;;  %4801 = vmatprep.subr.bf16.mxu1 %v5093_v5 }
 0x181   :  { %1949 = vst [vmem:[#allocation3 + $0x68] sm:$0x1] %v1872_v17  ;;  %1804 = vst [vmem:[#allocation2 + $0x58] sm:$0xff] %v1738_v44  ;;  %v1578_v35 = vmax.f32 %v1213_v36, 0.0  ;;  %v1652_v11 = vmin.f32 %v1580_v52, 6.0  ;;  %v1598_v32 = vmax.f32 %v1270_v9, 0.0  ;;  %v1215_v10 = vadd.f32 %v1214_v54, %v5518_v6 }
 0x182   :  { %v1217_v18 = vadd.f32 %v1216_v38, %v5529_v12  ;;  %v1882_v16 = vrot.slane %v1651_v58, 7  ;;  %v1669_v29 = vmin.f32 %v1597_v63, 6.0  ;;  %v1649_v22 = vmin.f32 %v1577_v1, 6.0 }
 0x183   :  { %v1650_v20 = vmin.f32 %v1578_v35, 6.0  ;;  %v1883_v17 = vrot.slane %v1652_v11, 7  ;;  %v1670_v57 = vmin.f32 %v1598_v32, 6.0  ;;  %v1595_v34 = vmax.f32 %v1215_v10, 0.0  ;;  %v2221_v5 = vld [vmem:[#allocation3] sm:$0xff] }
 0x184   :  { %v1596_v13 = vmax.f32 %v1217_v18, 0.0  ;;  %1954 = vst [vmem:[#allocation3 + $0x90] sm:$0xfe] %v1882_v16  ;;  %v1888_v33 = vrot.slane %v1669_v29, 7  ;;  %v1743_v60 = vrot.slane %v1649_v22, 7  ;;  %v2222_v53 = vld [vmem:[#allocation3 + $0x8] sm:$0xff]  ;;  %v2287_v6 = vmul.f32 %v5552_v31, %v5825_v47 }
 0x185   :  { %v1744_v36 = vrot.slane %v1650_v20, 7  ;;  %v2676_v54 = vld [vmem:[#allocation3 + $0x8] sm:$0xfe]  ;;  %1955 = vst [vmem:[#allocation3 + $0x98] sm:$0xfe] %v1883_v17  ;;  %v1890_v12 = vrot.slane %v1670_v57, 7  ;;  %v2281_v38 = vmul.f32 %v5552_v31, %v2222_v53  ;;  %v2741_v1 = vmul.f32 %v5587_v49, %v5825_v47 }
 0x186   :  { %v1667_v25 = vmin.f32 %v1595_v34, 6.0  ;;  %v1668_v24 = vmin.f32 %v1596_v13, 6.0  ;;  %v3394_v44 = vld [vmem:[#allocation3 + $0x8] sm:$0xfc]  ;;  %v1889_v52 = vsel %vm1720_vm1, %v1882_v16, %v1888_v33  ;;  %1966 = vst [vmem:[#allocation3 + $0xf0] sm:$0x1] %v1888_v33  ;;  %v5835_v9 = vadd.f32 %v2287_v6, %v5726_v19 }
 0x187   :  { %1815 = vst [vmem:[#allocation2 + $0xb0] sm:$0xfe] %v1743_v60  ;;  %1816 = vst [vmem:[#allocation2 + $0xb8] sm:$0xfe] %v1744_v36  ;;  %v2735_v63 = vmul.f32 %v5587_v49, %v2676_v54  ;;  %v1891_v11 = vsel %vm1720_vm1, %v1883_v17, %v1890_v12  ;;  %v5842_v18 = vadd.f32 %v2281_v38, %v5715_v7  ;;  %v2810_v29 = vrot.slane %v2741_v1, 1  ;;  %v2227_v20 = vld [vmem:[#allocation3 + $0x30] sm:$0xff] }
 0x188   :  { %v2682_v58 = vld [vmem:[#allocation3 + $0x68] sm:$0x1]  ;;  %1960 = vst [vmem:[#allocation3 + $0xc0] sm:$0xff] %v1889_v52  ;;  %1967 = vst [vmem:[#allocation3 + $0xf8] sm:$0x1] %v1890_v12  ;;  %v1753_v32 = vrot.slane %v1667_v25, 7  ;;  %v3453_v22 = vmul.f32 %v5593_v56, %v3394_v44  ;;  %v3459_v7 = vmul.f32 %v5593_v56, %v5825_v47  ;;  %v2280_v12 = vmul.f32 %v5572_v40, %v2221_v5 }
 0x189   :  { %v3400_v35 = vld [vmem:[#allocation3 + $0x68] sm:$0x3]  ;;  %v1755_v10 = vrot.slane %v1668_v24, 7  ;;  %1961 = vst [vmem:[#allocation3 + $0xc8] sm:$0xff] %v1891_v11  ;;  %v2747_v19 = vmul.f32 %v5587_v49, %v2682_v58  ;;  %v2809_v16 = vrot.slane %v2735_v63, 1  ;;  %v2740_v44 = vmul.f32 %v5645_v27, %v2227_v20 }
 0x18a   :  { %v2675_v57 = vld [vmem:[#allocation3] sm:$0xfe]  ;;  %v1754_v34 = vsel %vm1720_vm1, %v1743_v60, %v1753_v32  ;;  %1827 = vst [vmem:[#allocation2 + $0x110] sm:$0x1] %v1753_v32  ;;  %v3465_v13 = vmul.f32 %v5593_v56, %v3400_v35  ;;  %v2681_v33 = vld [vmem:[#allocation3 + $0x60] sm:$0x1]  ;;  %v5861_v38 = vadd.f32 %v2280_v12, %v5769_v23 }
 0x18b   :  { %v1756_v17 = vsel %vm1720_vm1, %v1744_v36, %v1755_v10  ;;  %1828 = vst [vmem:[#allocation2 + $0x118] sm:$0x1] %v1755_v10  ;;  %1821 = vst [vmem:[#allocation2 + $0xe0] sm:$0xff] %v1754_v34  ;;  %v5852_v53 = vsel %vm2566_vm2, %v2809_v16, %v2810_v29  ;;  %v2826_v6 = vrot.slane %v2747_v19, 1  ;;  %v3527_v54 = vrot.slane %v3453_v22, 2  ;;  %v2117_v10 = vld [vmem:[#allocation2 + $0x10] sm:$0xff] }
 0x18c   :  { %1822 = vst [vmem:[#allocation2 + $0xe8] sm:$0xff] %v1756_v17  ;;  %v3528_v60 = vrot.slane %v3459_v7, 2  ;;  %v3544_v25 = vrot.slane %v3465_v13, 2  ;;  %v2286_v36 = vmul.f32 %v5572_v40, %v2227_v20  ;;  %v2734_v24 = vmul.f32 %v5645_v27, %v2675_v57  ;;  %v3393_v58 = vld [vmem:[#allocation3] sm:$0xfc] }
 0x18d   :  { %v5858_v47 = vsel %vm2566_vm2, %v2810_v29, %v2826_v6  ;;  %v2746_v52 = vmul.f32 %v5645_v27, %v2681_v33  ;;  %v3399_v63 = vld [vmem:[#allocation3 + $0x60] sm:$0x3]  ;;  %v2807_v5 = vrot.slane %v2740_v44, 1  ;;  %v6880_v19 = vrot.slane %v5791_v21, 2  ;;  %v2437_v13 = vld [vmem:[#allocation2 + $0x10] sm:$0xfe] }
 0x18e   :  { %v5866_v1 = vsel %vm3284_vm3, %v3527_v54, %v3528_v60  ;;  %v5869_v35 = vsel %vm3284_vm3, %v3528_v60, %v3544_v25  ;;  %v5872_v11 = vadd.f32 %v2286_v36, %v5772_v4  ;;  %v2806_v32 = vrot.slane %v2734_v24, 1  ;;  %v2123_v57 = vld [vmem:[#allocation2 + $0x40] sm:$0xff]  ;;  %v2443_v33 = vld [vmem:[#allocation2 + $0x70] sm:$0x1]  ;;  %v3155_v12 = vld [vmem:[#allocation2 + $0x10] sm:$0xfc] }
 0x18f   :  { %v2824_v23 = vrot.slane %v2746_v52, 1  ;;  %v6881_v16 = vrot.slane %v5782_v43, 2  ;;  %v3303_v22 = vrot.slane %v5794_v39, 2  ;;  %v3452_v34 = vmul.f32 %v5657_v55, %v3393_v58 }
 0x190   :  { %v3458_v17 = vmul.f32 %v5657_v55, %v2227_v20  ;;  %v3464_v4 = vmul.f32 %v5657_v55, %v3399_v63  ;;  %v5887_v7 = vrot.slane %v5708_v59, %v5470_v42  ;;  %v5890_v43 = vsel %vm2566_vm2, %v2806_v32, %v2807_v5 }
 0x191   :  { %v5879_v29 = vsel %vm3284_vm3, %v6881_v16, %v6880_v19  ;;  %v5893_v6 = vsel %vm2566_vm2, %v2807_v5, %v2824_v23  ;;  %v6883_v39 = vmov %v6880_v19  ;;  %v5901_v20 = vmul.f32 %v5599_v2, %v2117_v10  ;;  %v1306_v58 = vpop.f32.mrb[16].mxu0  ;;  %v1359_v63 = vpop.f32.mrb[16].mxu1 }
 0x192   :  { %6882 = vst [vmem:[#allocation75_spill] sm:$0xff] %v5887_v7  ;;  %v5898_v54 = vsel %vm3284_vm3, %v6883_v39, %v3303_v22  ;;  %v3524_v60 = vrot.slane %v3452_v34, 2  ;;  %v3525_v42 = vrot.slane %v3458_v17, 2  ;;  %v3542_v25 = vrot.slane %v3464_v4, 2  ;;  %v1308_v22 = vpop.f32.mrb[17].mxu0  ;;  %v1361_v34 = vpop.f32.mrb[17].mxu1 }
 0x193   :  { %v5904_v36 = vmul.f32 %v5599_v2, %v2123_v57  ;;  %v5908_v24 = vrot.slane %v5583_v48, %v5476_v50  ;;  %v5911_v44 = vmul.f32 %v5603_v3, %v2437_v13  ;;  %v5914_v21 = vmul.f32 %v5603_v3, %v2123_v57  ;;  %v1310_v39 = vpop.f32.mrb[18].mxu0 }
 0x194   :  { %v5917_v52 = vmul.f32 %v5603_v3, %v2443_v33  ;;  %v5920_v32 = vsel %vm3284_vm3, %v3524_v60, %v3525_v42  ;;  %v5923_v10 = vsel %vm3284_vm3, %v3525_v42, %v3542_v25  ;;  %v5927_v5 = vrot.slane %v5589_v51, %v5476_v50  ;;  %v1363_v60 = vpop.f32.mrb[18].mxu1  ;;  %v1312_v17 = vpop.f32.mrb[19].mxu0 }
 0x195   :  { %6884 = vst [vmem:[#allocation76_spill] sm:$0xff] %v5920_v32  ;;  %6885 = vst [vmem:[#allocation77_spill] sm:$0xff] %v5923_v10  ;;  %v5930_v23 = vmul.f32 %v5614_v14, %v3155_v12  ;;  %v1307_v19 = vadd.f32 %v1306_v58, %v5548_v26  ;;  %v1360_v16 = vadd.f32 %v1359_v63, %v5575_v41  ;;  %v1365_v48 = vpop.f32.mrb[19].mxu1 }
 0x196   :  { %v1309_v13 = vadd.f32 %v1308_v22, %v5578_v37  ;;  %v1362_v33 = vadd.f32 %v1361_v34, %v5581_v45  ;;  %v5940_v12 = vmul.f32 %v5614_v14, %v2123_v57  ;;  %v1311_v63 = vadd.f32 %v1310_v39, %v5548_v26 }
 0x197   :  { %v1545_v25 = vmax.f32 %v1307_v19, 0.0  ;;  %v1547_v58 = vmax.f32 %v1360_v16, 0.0  ;;  %v1364_v51 = vadd.f32 %v1363_v60, %v5575_v41  ;;  %v1313_v22 = vadd.f32 %v1312_v17, %v5578_v37 }
 0x198   :  { %v1546_v4 = vmax.f32 %v1309_v13, 0.0  ;;  %v1548_v3 = vmax.f32 %v1362_v33, 0.0  ;;  %v1366_v34 = vadd.f32 %v1365_v48, %v5581_v45  ;;  %v1563_v42 = vmax.f32 %v1311_v63, 0.0 }
 0x199   :  { %v1617_v2 = vmin.f32 %v1545_v25, 6.0  ;;  %v1619_v55 = vmin.f32 %v1547_v58, 6.0  ;;  %v1565_v27 = vmax.f32 %v1364_v51, 0.0  ;;  %v1564_v19 = vmax.f32 %v1313_v22, 0.0  ;;  %v1316_v32 = vpop.f32.mrb[20].mxu0  ;;  %v1369_v17 = vpop.f32.mrb[20].mxu1 }
 0x19a   :  { %v1618_v57 = vmin.f32 %v1546_v4, 6.0  ;;  %v1620_v40 = vmin.f32 %v1548_v3, 6.0  ;;  %v1566_v16 = vmax.f32 %v1366_v34, 0.0  ;;  %v1635_v49 = vmin.f32 %v1563_v42, 6.0  ;;  %v1318_v4 = vpop.f32.mrb[21].mxu0  ;;  %v1371_v58 = vpop.f32.mrb[21].mxu1 }
 0x19b   :  { %v1866_v56 = vrot.slane %v1617_v2, 7  ;;  %v1868_v39 = vrot.slane %v1619_v55, 7  ;;  %v1637_v60 = vmin.f32 %v1565_v27, 6.0  ;;  %v1636_v13 = vmin.f32 %v1564_v19, 6.0  ;;  %v1320_v42 = vpop.f32.mrb[22].mxu0  ;;  %v1373_v63 = vpop.f32.mrb[22].mxu1 }
 0x19c   :  { %v1867_v7 = vrot.slane %v1618_v57, 7  ;;  %v1869_v10 = vrot.slane %v1620_v40, 7  ;;  %v1638_v33 = vmin.f32 %v1566_v16, 6.0  ;;  %v1874_v48 = vrot.slane %v1635_v49, 7  ;;  %v1322_v57 = vpop.f32.mrb[23].mxu0  ;;  %v1375_v19 = vpop.f32.mrb[23].mxu1 }
 0x19d   :  { %1938 = vst [vmem:[#allocation3 + $0x10] sm:$0xfe] %v1866_v56  ;;  %1940 = vst [vmem:[#allocation3 + $0x20] sm:$0xfe] %v1868_v39  ;;  %v1878_v25 = vrot.slane %v1637_v60, 7  ;;  %v1317_v51 = vadd.f32 %v1316_v32, %v5548_v26  ;;  %v1370_v3 = vadd.f32 %v1369_v17, %v5575_v41  ;;  %v1876_v2 = vrot.slane %v1636_v13, 7 }
 0x19e   :  { %1939 = vst [vmem:[#allocation3 + $0x18] sm:$0xfe] %v1867_v7  ;;  %1941 = vst [vmem:[#allocation3 + $0x28] sm:$0xfe] %v1869_v10  ;;  %v1880_v27 = vrot.slane %v1638_v33, 7  ;;  %v1319_v40 = vadd.f32 %v1318_v4, %v5578_v37  ;;  %v1372_v55 = vadd.f32 %v1371_v58, %v5581_v45  ;;  %v1875_v22 = vsel %vm1720_vm1, %v1866_v56, %v1874_v48 }
 0x19f   :  { %1950 = vst [vmem:[#allocation3 + $0x70] sm:$0x1] %v1874_v48  ;;  %v1879_v49 = vsel %vm1720_vm1, %v1868_v39, %v1878_v25  ;;  %1952 = vst [vmem:[#allocation3 + $0x80] sm:$0x1] %v1878_v25  ;;  %v1581_v32 = vmax.f32 %v1317_v51, 0.0  ;;  %v1583_v34 = vmax.f32 %v1370_v3, 0.0  ;;  %v1877_v16 = vsel %vm1720_vm1, %v1867_v7, %v1876_v2 }
 0x1a0   :  { %1944 = vst [vmem:[#allocation3 + $0x40] sm:$0xff] %v1875_v22  ;;  %1946 = vst [vmem:[#allocation3 + $0x50] sm:$0xff] %v1879_v49  ;;  %v1881_v60 = vsel %vm1720_vm1, %v1869_v10, %v1880_v27  ;;  %v1582_v13 = vmax.f32 %v1319_v40, 0.0  ;;  %v1584_v33 = vmax.f32 %v1372_v55, 0.0  ;;  %v1321_v39 = vadd.f32 %v1320_v42, %v5548_v26 }
 0x1a1   :  { %1951 = vst [vmem:[#allocation3 + $0x78] sm:$0x1] %v1876_v2  ;;  %1953 = vst [vmem:[#allocation3 + $0x88] sm:$0x1] %v1880_v27  ;;  %v1653_v56 = vmin.f32 %v1581_v32, 6.0  ;;  %v1655_v17 = vmin.f32 %v1583_v34, 6.0  ;;  %v1374_v48 = vadd.f32 %v1373_v63, %v5575_v41  ;;  %v1323_v3 = vadd.f32 %v1322_v57, %v5578_v37 }
 0x1a2   :  { %1945 = vst [vmem:[#allocation3 + $0x48] sm:$0xff] %v1877_v16  ;;  %1947 = vst [vmem:[#allocation3 + $0x58] sm:$0xff] %v1881_v60  ;;  %v1654_v25 = vmin.f32 %v1582_v13, 6.0  ;;  %v1656_v51 = vmin.f32 %v1584_v33, 6.0  ;;  %v1376_v7 = vadd.f32 %v1375_v19, %v5581_v45  ;;  %v1599_v10 = vmax.f32 %v1321_v39, 0.0  ;;  %v6886_v32 = vld [vmem:[#allocation59_spill] sm:$0xff] }
 0x1a3   :  { %v1884_v4 = vrot.slane %v1653_v56, 7  ;;  %v1886_v58 = vrot.slane %v1655_v17, 7  ;;  %v1601_v2 = vmax.f32 %v1374_v48, 0.0  ;;  %v1600_v55 = vmax.f32 %v1323_v3, 0.0  ;;  %v6889_v60 = vld [vmem:[#allocation44_spill] sm:$0xff] }
 0x1a4   :  { %v1885_v27 = vrot.slane %v1654_v25, 7  ;;  %v1887_v40 = vrot.slane %v1656_v51, 7  ;;  %v1602_v22 = vmax.f32 %v1376_v7, 0.0  ;;  %v2223_v49 = vld [vmem:[#allocation3 + $0x10] sm:$0xff]  ;;  %v1671_v26 = vmin.f32 %v1599_v10, 6.0  ;;  %v6890_v33 = vld [vmem:[#allocation48_spill] sm:$0xff] }
 0x1a5   :  { %1956 = vst [vmem:[#allocation3 + $0xa0] sm:$0xfe] %v1884_v4  ;;  %1958 = vst [vmem:[#allocation3 + $0xb0] sm:$0xfe] %v1886_v58  ;;  %v1673_v42 = vmin.f32 %v1601_v2, 6.0  ;;  %v2224_v41 = vld [vmem:[#allocation3 + $0x18] sm:$0xff]  ;;  %v2282_v34 = vmul.f32 %v6886_v32, %v2223_v49 }
 0x1a6   :  { %v2678_v63 = vld [vmem:[#allocation3 + $0x18] sm:$0xfe]  ;;  %v6887_v37 = vrot.slane %v5914_v21, 1  ;;  %v6888_v45 = vrot.slane %v5911_v44, 1  ;;  %1957 = vst [vmem:[#allocation3 + $0xa8] sm:$0xfe] %v1885_v27  ;;  %v2283_v13 = vmul.f32 %v6889_v60, %v2224_v41 }
 0x1a7   :  { %1959 = vst [vmem:[#allocation3 + $0xb8] sm:$0xfe] %v1887_v40  ;;  %v1672_v19 = vmin.f32 %v1600_v55, 6.0  ;;  %v1674_v16 = vmin.f32 %v1602_v22, 6.0  ;;  %v2737_v56 = vmul.f32 %v6890_v33, %v2678_v63  ;;  %v3396_v17 = vld [vmem:[#allocation3 + $0x18] sm:$0xfc]  ;;  %v5970_v7 = vadd.f32 %v2282_v34, %v5901_v20 }
 0x1a8   :  { %v5964_v57 = vsel %vm2566_vm2, %v6888_v45, %v6887_v37  ;;  %v1892_v39 = vrot.slane %v1671_v26, 7  ;;  %v1896_v48 = vrot.slane %v1673_v42, 7  ;;  %v2684_v25 = vld [vmem:[#allocation3 + $0x78] sm:$0x1]  ;;  %v6891_v51 = vld [vmem:[#allocation49_spill] sm:$0xff]  ;;  %v5973_v49 = vadd.f32 %v2283_v13, %v5721_v28 }
 0x1a9   :  { %v3455_v3 = vmul.f32 %v6891_v51, %v3396_v17  ;;  %v1894_v44 = vrot.slane %v1672_v19, 7  ;;  %v1898_v10 = vrot.slane %v1674_v16, 7  ;;  %v2230_v2 = vld [vmem:[#allocation3 + $0x48] sm:$0xff]  ;;  %v2749_v55 = vmul.f32 %v6890_v33, %v2684_v25  ;;  %v3402_v22 = vld [vmem:[#allocation3 + $0x78] sm:$0x3]  ;;  %v2229_v63 = vld [vmem:[#allocation3 + $0x40] sm:$0xff] }
 0x1aa   :  { %v1893_v41 = vsel %vm1720_vm1, %v1884_v4, %v1892_v39  ;;  %1968 = vst [vmem:[#allocation3 + $0x100] sm:$0x1] %v1892_v39  ;;  %v1897_v26 = vsel %vm1720_vm1, %v1886_v58, %v1896_v48  ;;  %1970 = vst [vmem:[#allocation3 + $0x110] sm:$0x1] %v1896_v48  ;;  %v2289_v42 = vmul.f32 %v6889_v60, %v2230_v2  ;;  %v2677_v34 = vld [vmem:[#allocation3 + $0x10] sm:$0xfe] }
 0x1ab   :  { %v2743_v20 = vmul.f32 %v6890_v33, %v2230_v2  ;;  %1962 = vst [vmem:[#allocation3 + $0xd0] sm:$0xff] %v1893_v41  ;;  %1964 = vst [vmem:[#allocation3 + $0xe0] sm:$0xff] %v1897_v26  ;;  %v1895_v28 = vsel %vm1720_vm1, %v1885_v27, %v1894_v44  ;;  %v1899_v37 = vsel %vm1720_vm1, %v1887_v40, %v1898_v10  ;;  %v2815_v45 = vrot.slane %v2737_v56, 1  ;;  %v2683_v17 = vld [vmem:[#allocation3 + $0x70] sm:$0x1]  ;;  %v6894_v25 = vld [vmem:[#allocation60_spill] sm:$0xff] }
 0x1ac   :  { %1969 = vst [vmem:[#allocation3 + $0x108] sm:$0x1] %v1894_v44  ;;  %1971 = vst [vmem:[#allocation3 + $0x118] sm:$0x1] %v1898_v10  ;;  %v2830_v4 = vrot.slane %v2749_v55, 1  ;;  %v5983_v58 = vadd.f32 %v2289_v42, %v5734_v46  ;;  %v3461_v16 = vmul.f32 %v6891_v51, %v2230_v2  ;;  %v3467_v13 = vmul.f32 %v6891_v51, %v3402_v22 }
 0x1ad   :  { %1963 = vst [vmem:[#allocation3 + $0xd8] sm:$0xff] %v1895_v28  ;;  %1965 = vst [vmem:[#allocation3 + $0xe8] sm:$0xff] %v1899_v37  ;;  %v2816_v19 = vrot.slane %v2743_v20, 1  ;;  %v3533_v39 = vrot.slane %v3455_v3, 2  ;;  %v2288_v27 = vmul.f32 %v6886_v32, %v2229_v63  ;;  %v6892_v48 = vrot.slane %v5917_v52, 1 }
 0x1ae   :  { %v6893_v40 = vrot.slane %v5914_v21, 1  ;;  %v2736_v44 = vmul.f32 %v6894_v25, %v2677_v34  ;;  %v3161_v46 = vld [vmem:[#allocation2 + $0x70] sm:$0x3]  ;;  %v3534_v55 = vrot.slane %v3461_v16, 2  ;;  %v3548_v3 = vrot.slane %v3467_v13, 2  ;;  %v2128_v13 = vld [vmem:[#allocation2 + $0x98] sm:$0xff] }
 0x1af   :  { %v5997_v10 = vsel %vm2566_vm2, %v2815_v45, %v2816_v19  ;;  %v6000_v2 = vsel %vm2566_vm2, %v2816_v19, %v2830_v4  ;;  %v3395_v22 = vld [vmem:[#allocation3 + $0x10] sm:$0xfc]  ;;  %v6003_v41 = vadd.f32 %v2288_v27, %v5904_v36  ;;  %v2742_v21 = vmul.f32 %v6894_v25, %v2229_v63  ;;  %v3401_v42 = vld [vmem:[#allocation3 + $0x70] sm:$0x3] }
 0x1b0   :  { %v5993_v56 = vsel %vm2566_vm2, %v6893_v40, %v6892_v48  ;;  %v2748_v52 = vmul.f32 %v6894_v25, %v2683_v17  ;;  %v2812_v26 = vrot.slane %v2736_v44, 1  ;;  %v6008_v20 = vsel %vm3284_vm3, %v3533_v39, %v3534_v55  ;;  %v6895_v19 = vld [vmem:[#allocation62_spill] sm:$0xff]  ;;  %v2234_v44 = vld [vmem:[#allocation3 + $0x98] sm:$0xff] }
 0x1b1   :  { %v6011_v34 = vsel %vm3284_vm3, %v3534_v55, %v3548_v3  ;;  %v3226_v28 = vmul.f32 %v5614_v14, %v3161_v46  ;;  %v3291_v37 = vrot.slane %v5930_v23, 2  ;;  %v2813_v45 = vrot.slane %v2742_v21, 1  ;;  %v6023_v40 = vld [vmem:[#allocation2 + $0xc8] sm:$0xff] }
 0x1b2   :  { %v2828_v4 = vrot.slane %v2748_v52, 1  ;;  %v3292_v36 = vrot.slane %v5940_v12, 2  ;;  %v3454_v16 = vmul.f32 %v6895_v19, %v3395_v22  ;;  %v3460_v27 = vmul.f32 %v6895_v19, %v2229_v63  ;;  %6896 = vst [vmem:[#allocation78_spill] sm:$0xff] %v6023_v40  ;;  %v6025_v23 = vld [vmem:[#allocation3 + $0xc8] sm:$0xff] }
 0x1b3   :  { %v3307_v17 = vrot.slane %v3226_v28, 2  ;;  %v3466_v39 = vmul.f32 %v6895_v19, %v3401_v42  ;;  %v6021_v48 = vrot.slane %v5595_v61, %v5476_v50  ;;  %6897 = vst [vmem:[#allocation79_spill] sm:$0xff] %v6025_v23  ;;  %v6028_v46 = vsel %vm2566_vm2, %v2812_v26, %v2813_v45  ;;  %v1412_v42 = vpop.f32.mrb[24].mxu0  ;;  %v1465_v28 = vpop.f32.mrb[24].mxu1 }
 0x1b4   :  { %v6031_v12 = vsel %vm2566_vm2, %v2813_v45, %v2828_v4  ;;  %v6034_v55 = vsel %vm3284_vm3, %v3291_v37, %v3292_v36  ;;  %v3530_v63 = vrot.slane %v3454_v16, 2  ;;  %v3531_v22 = vrot.slane %v3460_v27, 2  ;;  %v1467_v61 = vpop.f32.mrb[25].mxu1 }
 0x1b5   :  { %v6037_v3 = vsel %vm3284_vm3, %v3292_v36, %v3307_v17  ;;  %v3546_v21 = vrot.slane %v3466_v39, 2  ;;  %v6041_v52 = vrot.slane %v5708_v59, %v5476_v50  ;;  %v2186_v26 = vmul.f32 %v5503_v62, %v2128_v13  ;;  %v6899_v36 = vld [vmem:[#allocation43_spill] sm:$0xff]  ;;  %v6900_v17 = vld [vmem:[#allocation46_spill] sm:$0xff]  ;;  %v1414_v39 = vpop.f32.mrb[25].mxu0  ;;  %v1469_v25 = vpop.f32.mrb[26].mxu1 }
 0x1b6   :  { %v2192_v45 = vmul.f32 %v5503_v62, %v6023_v40  ;;  %v2293_v37 = vmul.f32 %v5552_v31, %v2234_v44  ;;  %v2299_v4 = vmul.f32 %v5552_v31, %v6025_v23  ;;  %v1413_v16 = vadd.f32 %v1412_v42, %v6899_v36  ;;  %v6903_v13 = vld [vmem:[#allocation47_spill] sm:$0xff]  ;;  %v6904_v62 = vld [vmem:[#allocation50_spill] sm:$0xff]  ;;  %v1416_v44 = vpop.f32.mrb[26].mxu0  ;;  %v1471_v60 = vpop.f32.mrb[27].mxu1 }
 0x1b7   :  { %6898 = vst [vmem:[#allocation80_spill] sm:$0xff] %v6041_v52  ;;  %v1466_v27 = vadd.f32 %v1465_v28, %v6900_v17  ;;  %v6052_v50 = vsel %vm3284_vm3, %v3530_v63, %v3531_v22  ;;  %v6055_v59 = vsel %vm3284_vm3, %v3531_v22, %v3546_v21  ;;  %v1415_v19 = vadd.f32 %v1414_v39, %v6903_v13  ;;  %v1418_v33 = vpop.f32.mrb[27].mxu0 }
 0x1b8   :  { %6901 = vst [vmem:[#allocation43_spill] sm:$0xff] %v6052_v50  ;;  %6902 = vst [vmem:[#allocation46_spill] sm:$0xff] %v6055_v59  ;;  %v1468_v14 = vadd.f32 %v1467_v61, %v6904_v62  ;;  %v6059_v32 = vadd.f32 %v2293_v37, %v2186_v26  ;;  %v6061_v31 = vadd.f32 %v2299_v4, %v2192_v45  ;;  %v1549_v42 = vmax.f32 %v1413_v16, 0.0 }
 0x1b9   :  { %v1551_v28 = vmax.f32 %v1466_v27, 0.0  ;;  %v1417_v51 = vadd.f32 %v1416_v44, %v6899_v36  ;;  %v1470_v63 = vadd.f32 %v1469_v25, %v6900_v17  ;;  %v1550_v22 = vmax.f32 %v1415_v19, 0.0  ;;  %v1422_v50 = vpop.f32.mrb[28].mxu0 }
 0x1ba   :  { %6905 = vst [vmem:[#allocation47_spill] sm:$0xff] %v6059_v32  ;;  %6906 = vst [vmem:[#allocation50_spill] sm:$0xff] %v6061_v31  ;;  %v1552_v21 = vmax.f32 %v1468_v14, 0.0  ;;  %v1419_v39 = vadd.f32 %v1418_v33, %v6903_v13  ;;  %v1472_v61 = vadd.f32 %v1471_v60, %v6904_v62  ;;  %v1621_v52 = vmin.f32 %v1549_v42, 6.0  ;;  %v1475_v33 = vpop.f32.mrb[28].mxu1 }
 0x1bb   :  { %v1623_v23 = vmin.f32 %v1551_v28, 6.0  ;;  %v1567_v26 = vmax.f32 %v1417_v51, 0.0  ;;  %v1569_v37 = vmax.f32 %v1470_v63, 0.0  ;;  %v1622_v45 = vmin.f32 %v1550_v22, 6.0  ;;  %v1424_v63 = vpop.f32.mrb[29].mxu0  ;;  %v1477_v22 = vpop.f32.mrb[29].mxu1 }
 0x1bc   :  { %v1624_v4 = vmin.f32 %v1552_v21, 6.0  ;;  %v1568_v16 = vmax.f32 %v1419_v39, 0.0  ;;  %v1570_v27 = vmax.f32 %v1472_v61, 0.0  ;;  %v2007_v40 = vrot.slane %v1621_v52, 7  ;;  %v1426_v61 = vpop.f32.mrb[30].mxu0 }
 0x1bd   :  { %v2009_v44 = vrot.slane %v1623_v23, 7  ;;  %v1639_v59 = vmin.f32 %v1567_v26, 6.0  ;;  %v1641_v25 = vmin.f32 %v1569_v37, 6.0  ;;  %v2008_v31 = vrot.slane %v1622_v45, 7  ;;  %v1479_v26 = vpop.f32.mrb[30].mxu1 }
 0x1be   :  { %v2010_v32 = vrot.slane %v1624_v4, 7  ;;  %v1640_v19 = vmin.f32 %v1568_v16, 6.0  ;;  %v1642_v14 = vmin.f32 %v1570_v27, 6.0  ;;  %2079 = vst [vmem:[#allocation4] sm:$0xfe] %v2007_v40  ;;  %v1423_v51 = vadd.f32 %v1422_v50, %v6899_v36  ;;  %v1428_v4 = vpop.f32.mrb[31].mxu0 }
 0x1bf   :  { %2081 = vst [vmem:[#allocation4 + $0x10] sm:$0xfe] %v2009_v44  ;;  %v2013_v60 = vrot.slane %v1639_v59, 7  ;;  %v2017_v42 = vrot.slane %v1641_v25, 7  ;;  %v1476_v28 = vadd.f32 %v1475_v33, %v6900_v17  ;;  %2080 = vst [vmem:[#allocation4 + $0x8] sm:$0xfe] %v2008_v31  ;;  %v1425_v21 = vadd.f32 %v1424_v63, %v6903_v13 }
 0x1c0   :  { %2082 = vst [vmem:[#allocation4 + $0x18] sm:$0xfe] %v2010_v32  ;;  %v2015_v23 = vrot.slane %v1640_v19, 7  ;;  %v2019_v52 = vrot.slane %v1642_v14, 7  ;;  %v1478_v39 = vadd.f32 %v1477_v22, %v6904_v62  ;;  %v1585_v50 = vmax.f32 %v1423_v51, 0.0  ;;  %v1481_v16 = vpop.f32.mrb[31].mxu1 }
 0x1c1   :  { %v2014_v37 = vsel %vm1720_vm1, %v2007_v40, %v2013_v60  ;;  %2091 = vst [vmem:[#allocation4 + $0x60] sm:$0x1] %v2013_v60  ;;  %v2018_v59 = vsel %vm1720_vm1, %v2009_v44, %v2017_v42  ;;  %2093 = vst [vmem:[#allocation4 + $0x70] sm:$0x1] %v2017_v42  ;;  %v1587_v45 = vmax.f32 %v1476_v28, 0.0  ;;  %v1586_v19 = vmax.f32 %v1425_v21, 0.0 }
 0x1c2   :  { %2085 = vst [vmem:[#allocation4 + $0x30] sm:$0xff] %v2014_v37  ;;  %2087 = vst [vmem:[#allocation4 + $0x40] sm:$0xff] %v2018_v59  ;;  %v6074_v27 = vsel %vm1720_vm1, %v2008_v31, %v2015_v23  ;;  %v6077_v25 = vsel %vm1720_vm1, %v2010_v32, %v2019_v52  ;;  %v1588_v40 = vmax.f32 %v1478_v39, 0.0  ;;  %v1657_v14 = vmin.f32 %v1585_v50, 6.0 }
 0x1c3   :  { %2092 = vst [vmem:[#allocation4 + $0x68] sm:$0x1] %v2015_v23  ;;  %2094 = vst [vmem:[#allocation4 + $0x78] sm:$0x1] %v2019_v52  ;;  %v1659_v33 = vmin.f32 %v1587_v45, 6.0  ;;  %v1427_v44 = vadd.f32 %v1426_v61, %v6899_v36  ;;  %v1480_v60 = vadd.f32 %v1479_v26, %v6900_v17  ;;  %v1658_v42 = vmin.f32 %v1586_v19, 6.0 }
 0x1c4   :  { %v1660_v51 = vmin.f32 %v1588_v40, 6.0  ;;  %v1429_v28 = vadd.f32 %v1428_v4, %v6903_v13  ;;  %v1482_v31 = vadd.f32 %v1481_v16, %v6904_v62  ;;  %v2025_v63 = vrot.slane %v1657_v14, 7  ;;  %v6907_v17 = vld [vmem:[#allocation51_spill] sm:$0xff]  ;;  %v6908_v13 = vld [vmem:[#allocation52_spill] sm:$0xff] }
 0x1c5   :  { %v2027_v22 = vrot.slane %v1659_v33, 7  ;;  %v1603_v23 = vmax.f32 %v1427_v44, 0.0  ;;  %v1605_v32 = vmax.f32 %v1480_v60, 0.0  ;;  %v2026_v37 = vrot.slane %v1658_v42, 7 }
 0x1c6   :  { %v2028_v52 = vrot.slane %v1660_v51, 7  ;;  %v1604_v21 = vmax.f32 %v1429_v28, 0.0  ;;  %v1606_v39 = vmax.f32 %v1482_v31, 0.0  ;;  %2097 = vst [vmem:[#allocation4 + $0x90] sm:$0xfe] %v2025_v63  ;;  %v2329_v61 = vld [vmem:[#allocation4 + $0x8] sm:$0xff]  ;;  %v2394_v26 = vmul.f32 %v6907_v17, %v6074_v27 }
 0x1c7   :  { %2099 = vst [vmem:[#allocation4 + $0xa0] sm:$0xfe] %v2027_v22  ;;  %v1675_v59 = vmin.f32 %v1603_v23, 6.0  ;;  %v1677_v36 = vmin.f32 %v1605_v32, 6.0  ;;  %v2915_v50 = vld [vmem:[#allocation4 + $0x8] sm:$0xfe]  ;;  %v2980_v62 = vmul.f32 %v6908_v13, %v6074_v27  ;;  %v2388_v16 = vmul.f32 %v6907_v17, %v2329_v61 }
 0x1c8   :  { %2098 = vst [vmem:[#allocation4 + $0x98] sm:$0xfe] %v2026_v37  ;;  %2100 = vst [vmem:[#allocation4 + $0xa8] sm:$0xfe] %v2028_v52  ;;  %v1676_v45 = vmin.f32 %v1604_v21, 6.0  ;;  %v1678_v4 = vmin.f32 %v1606_v39, 6.0  ;;  %v2974_v19 = vmul.f32 %v6908_v13, %v2915_v50  ;;  %v2418_v33 = vadd.f32 %v2394_v26, %v5835_v9 }
 0x1c9   :  { %v2031_v40 = vrot.slane %v1675_v59, 7  ;;  %v2035_v14 = vrot.slane %v1677_v36, 7  ;;  %v3049_v60 = vrot.slane %v2980_v62, 1  ;;  %v2412_v28 = vadd.f32 %v2388_v16, %v5842_v18  ;;  %v3633_v23 = vld [vmem:[#allocation4 + $0x8] sm:$0xfc]  ;;  %v2331_v9 = vld [vmem:[#allocation4 + $0x18] sm:$0xff] }
 0x1ca   :  { %v2921_v44 = vld [vmem:[#allocation4 + $0x68] sm:$0x1]  ;;  %v2033_v42 = vrot.slane %v1676_v45, 7  ;;  %v2037_v51 = vrot.slane %v1678_v4, 7  ;;  %v2658_v39 = vadd.f32 %v5743_v30, %v2418_v33  ;;  %v3048_v59 = vrot.slane %v2974_v19, 1  ;;  %v6909_v50 = vld [vmem:[#allocation54_spill] sm:$0xff] }
 0x1cb   :  { %v2986_v31 = vmul.f32 %v6908_v13, %v2921_v44  ;;  %v2032_v32 = vsel %vm1720_vm1, %v2025_v63, %v2031_v40  ;;  %2109 = vst [vmem:[#allocation4 + $0xf0] sm:$0x1] %v2031_v40  ;;  %v2036_v21 = vsel %vm1720_vm1, %v2027_v22, %v2035_v14  ;;  %2111 = vst [vmem:[#allocation4 + $0x100] sm:$0x1] %v2035_v14  ;;  %v3639_v36 = vld [vmem:[#allocation4 + $0x68] sm:$0x3] }
 0x1cc   :  { %2103 = vst [vmem:[#allocation4 + $0xc0] sm:$0xff] %v2032_v32  ;;  %2105 = vst [vmem:[#allocation4 + $0xd0] sm:$0xff] %v2036_v21  ;;  %v2034_v61 = vsel %vm1720_vm1, %v2026_v37, %v2033_v42  ;;  %v2038_v18 = vsel %vm1720_vm1, %v2028_v52, %v2037_v51  ;;  %v2652_v26 = vadd.f32 %v5740_v8, %v2412_v28  ;;  %v2917_v4 = vld [vmem:[#allocation4 + $0x18] sm:$0xfe]  ;;  %v2923_v44 = vld [vmem:[#allocation4 + $0x78] sm:$0x1] }
 0x1cd   :  { %2110 = vst [vmem:[#allocation4 + $0xf8] sm:$0x1] %v2033_v42  ;;  %2112 = vst [vmem:[#allocation4 + $0x108] sm:$0x1] %v2037_v51  ;;  %v3065_v63 = vrot.slane %v2986_v31, 1  ;;  %v2897_v22 = vadd.f32 %v5858_v47, %v2658_v39  ;;  %v3050_v30 = vsel %vm2566_vm2, %v3048_v59, %v3049_v60  ;;  %v3692_v62 = vmul.f32 %v6909_v50, %v3633_v23  ;;  %v6910_v8 = vld [vmem:[#allocation55_spill] sm:$0xff] }
 0x1ce   :  { %2104 = vst [vmem:[#allocation4 + $0xc8] sm:$0xff] %v2034_v61  ;;  %2106 = vst [vmem:[#allocation4 + $0xd8] sm:$0xff] %v2038_v18  ;;  %v3698_v45 = vmul.f32 %v6909_v50, %v6074_v27  ;;  %v2891_v37 = vadd.f32 %v5852_v53, %v2652_v26  ;;  %v3704_v16 = vmul.f32 %v6909_v50, %v3639_v36  ;;  %v6911_v28 = vld [vmem:[#allocation61_spill] sm:$0xff]  ;;  %v3635_v21 = vld [vmem:[#allocation4 + $0x18] sm:$0xfc] }
 0x1cf   :  { %v3066_v52 = vsel %vm2566_vm2, %v3049_v60, %v3065_v63  ;;  %v2390_v19 = vmul.f32 %v6910_v8, %v2331_v9  ;;  %v3766_v14 = vrot.slane %v3692_v62, 2  ;;  %v2396_v47 = vmul.f32 %v6910_v8, %v6077_v25  ;;  %v6912_v36 = vld [vmem:[#allocation66_spill] sm:$0xff]  ;;  %v6913_v18 = vld [vmem:[#allocation67_spill] sm:$0xff] }
 0x1d0   :  { %v3136_v40 = vadd.f32 %v3066_v52, %v2897_v22  ;;  %v3767_v33 = vrot.slane %v3698_v45, 2  ;;  %v3130_v42 = vadd.f32 %v3050_v30, %v2891_v37  ;;  %v3783_v51 = vrot.slane %v3704_v16, 2  ;;  %v3641_v22 = vld [vmem:[#allocation4 + $0x78] sm:$0x3]  ;;  %v6914_v45 = vld [vmem:[#allocation65_spill] sm:$0xff] }
 0x1d1   :  { %v2414_v27 = vadd.f32 %v2390_v19, %v5973_v49  ;;  %v2976_v31 = vmul.f32 %v6911_v28, %v2917_v4  ;;  %v2420_v23 = vadd.f32 %v2396_v47, %v5983_v58  ;;  %v2982_v32 = vmul.f32 %v6911_v28, %v6077_v25  ;;  %v1518_v16 = vpop.f32.mrb[32].mxu0 }
 0x1d2   :  { %v3376_v53 = vadd.f32 %v5750_v15, %v3136_v40  ;;  %v3768_v60 = vsel %vm3284_vm3, %v3766_v14, %v3767_v33  ;;  %v3370_v39 = vadd.f32 %v5746_v0, %v3130_v42  ;;  %v3784_v59 = vsel %vm3284_vm3, %v3767_v33, %v3783_v51  ;;  %v6915_v33 = vld [vmem:[#allocation57_spill] sm:$0xff]  ;;  %v1520_v47 = vpop.f32.mrb[33].mxu0 }
 0x1d3   :  { %v2654_v9 = vadd.f32 %v6912_v36, %v2414_v27  ;;  %v2988_v49 = vmul.f32 %v6911_v28, %v2923_v44  ;;  %v2660_v15 = vadd.f32 %v6913_v18, %v2420_v23  ;;  %v3054_v26 = vrot.slane %v2976_v31, 1  ;;  %v6916_v44 = vld [vmem:[#allocation64_spill] sm:$0xff] }
 0x1d4   :  { %v3615_v61 = vadd.f32 %v5869_v35, %v3376_v53  ;;  %v3055_v63 = vrot.slane %v2982_v32, 1  ;;  %v3609_v58 = vadd.f32 %v5866_v1, %v3370_v39  ;;  %v3694_v0 = vmul.f32 %v6914_v45, %v3635_v21  ;;  %v1522_v53 = vpop.f32.mrb[34].mxu0 }
 0x1d5   :  { %v2893_v30 = vadd.f32 %v5997_v10, %v2654_v9  ;;  %v3069_v62 = vrot.slane %v2988_v49, 1  ;;  %v2899_v37 = vadd.f32 %v6000_v2, %v2660_v15  ;;  %v3700_v35 = vmul.f32 %v6914_v45, %v6077_v25  ;;  %v6917_v2 = vld [vmem:[#allocation63_spill] sm:$0xff]  ;;  %v6918_v25 = vld [vmem:[#allocation70_spill] sm:$0xff] }
 0x1d6   :  { %v3854_v4 = vadd.f32 %v3784_v59, %v3615_v61  ;;  %v3056_v52 = vsel %vm2566_vm2, %v3054_v26, %v3055_v63  ;;  %v3848_v19 = vadd.f32 %v3768_v60, %v3609_v58  ;;  %v3706_v1 = vmul.f32 %v6914_v45, %v3641_v22  ;;  %v1524_v59 = vpop.f32.mrb[35].mxu0  ;;  %v6919_v9 = vld [vmem:[#allocation71_spill] sm:$0xff] }
 0x1d7   :  { %v3070_v40 = vsel %vm2566_vm2, %v3055_v63, %v3069_v62  ;;  %v3132_v14 = vadd.f32 %v3056_v52, %v2893_v30  ;;  %v1519_v10 = vadd.f32 %v1518_v16, %v6915_v33  ;;  %v3772_v27 = vrot.slane %v3694_v0, 2  ;;  %v2328_v62 = vld [vmem:[#allocation4] sm:$0xff] }
 0x1d8   :  { %v3910_v42 = vadd.f32 %v6916_v44, %v3854_v4  ;;  %v3138_v51 = vadd.f32 %v3070_v40, %v2899_v37  ;;  %v1521_v31 = vadd.f32 %v1520_v47, %v6917_v2  ;;  %v3904_v23 = vadd.f32 %v6916_v44, %v3848_v19 }
 0x1d9   :  { %v3372_v32 = vadd.f32 %v6918_v25, %v3132_v14  ;;  %v3773_v60 = vrot.slane %v3700_v35, 2  ;;  %v1553_v21 = vmax.f32 %v1519_v10, 0.0  ;;  %v1523_v39 = vadd.f32 %v1522_v53, %v6915_v33  ;;  %v6142_v14 = vld [vmem:[#allocation4 + $0x30] sm:$0xff] }
 0x1da   :  { %v3934_v36 = vmax.f32 %v3910_v42, 0.0  ;;  %v3378_v49 = vadd.f32 %v6919_v9, %v3138_v51  ;;  %v1554_v61 = vmax.f32 %v1521_v31, 0.0  ;;  %v1525_v18 = vadd.f32 %v1524_v59, %v6917_v2  ;;  %v6920_v51 = vld [vmem:[#allocation58_spill] sm:$0xff] }
 0x1db   :  { %v3928_v15 = vmax.f32 %v3904_v23, 0.0  ;;  %v3611_v26 = vadd.f32 %v6008_v20, %v3372_v32  ;;  %v1625_v63 = vmin.f32 %v1553_v21, 6.0  ;;  %v1571_v22 = vmax.f32 %v1523_v39, 0.0  ;;  %v1528_v20 = vpop.f32.mrb[36].mxu0 }
 0x1dc   :  { %v3958_v58 = vmin.f32 %v3934_v36, 6.0  ;;  %v3617_v30 = vadd.f32 %v6011_v34, %v3378_v49  ;;  %v1626_v0 = vmin.f32 %v1554_v61, 6.0  ;;  %v1572_v4 = vmax.f32 %v1525_v18, 0.0  ;;  %v1530_v23 = vpop.f32.mrb[37].mxu0 }
 0x1dd   :  { %v3952_v37 = vmin.f32 %v3928_v15, 6.0  ;;  %v3774_v52 = vsel %vm3284_vm3, %v3772_v27, %v3773_v60  ;;  %v2011_v35 = vrot.slane %v1625_v63, 7  ;;  %v1643_v16 = vmin.f32 %v1571_v22, 6.0  ;;  %v6921_v27 = vld [vmem:[#allocation68_spill] sm:$0xff]  ;;  %v1532_v39 = vpop.f32.mrb[38].mxu0 }
 0x1de   :  { %v3787_v19 = vrot.slane %v3706_v1, 2  ;;  %v3850_v40 = vadd.f32 %v3774_v52, %v3611_v26  ;;  %v2012_v10 = vrot.slane %v1626_v0, 7  ;;  %v1644_v47 = vmin.f32 %v1572_v4, 6.0  ;;  %v1534_v18 = vpop.f32.mrb[39].mxu0 }
 0x1df   :  { %v3976_v42 = vpack.c.bf16 %v3958_v58, %v3952_v37  ;;  %v2387_v31 = vmul.f32 %v6920_v51, %v2328_v62  ;;  %2083 = vst [vmem:[#allocation4 + $0x20] sm:$0xfe] %v2011_v35  ;;  %v2021_v34 = vrot.slane %v1643_v16, 7  ;;  %v1529_v53 = vadd.f32 %v1528_v20, %v6915_v33  ;;  %v2914_v58 = vld [vmem:[#allocation4] sm:$0xfe] }
 0x1e0   :  { %v3788_v25 = vsel %vm3284_vm3, %v3773_v60, %v3787_v19  ;;  %v3906_v32 = vadd.f32 %v6921_v27, %v3850_v40  ;;  %2084 = vst [vmem:[#allocation4 + $0x28] sm:$0xfe] %v2012_v10  ;;  %v2023_v1 = vrot.slane %v1644_v47, 7  ;;  %v1531_v21 = vadd.f32 %v1530_v23, %v6917_v2  ;;  %v2920_v16 = vld [vmem:[#allocation4 + $0x60] sm:$0x1]  ;;  %v6924_v23 = vld [vmem:[#allocation74_spill] sm:$0xff] }
 0x1e1   :  { %4410 = vmatprep.mubr.bf16.mxu1 %v3976_v42  ;;  %v3856_v59 = vadd.f32 %v3788_v25, %v3617_v30  ;;  %v2393_v36 = vmul.f32 %v6920_v51, %v6142_v14  ;;  %v2022_v9 = vsel %vm1720_vm1, %v2011_v35, %v2021_v34  ;;  %2095 = vst [vmem:[#allocation4 + $0x80] sm:$0x1] %v2021_v34  ;;  %v1589_v49 = vmax.f32 %v1529_v53, 0.0 }
 0x1e2   :  { %v1533_v61 = vadd.f32 %v1532_v39, %v6915_v33  ;;  %v3930_v60 = vmax.f32 %v3906_v32, 0.0  ;;  %2089 = vst [vmem:[#allocation4 + $0x50] sm:$0xff] %v2022_v9  ;;  %v2024_v15 = vsel %vm1720_vm1, %v2012_v10, %v2023_v1  ;;  %2096 = vst [vmem:[#allocation4 + $0x88] sm:$0x1] %v2023_v1  ;;  %v1590_v26 = vmax.f32 %v1531_v21, 0.0  ;;  %v6922_v10 = vld [vmem:[#allocation73_spill] sm:$0xff] }
 0x1e3   :  { %v1535_v63 = vadd.f32 %v1534_v18, %v6917_v2  ;;  %v3912_v22 = vadd.f32 %v6921_v27, %v3856_v59  ;;  %2090 = vst [vmem:[#allocation4 + $0x58] sm:$0xff] %v2024_v15  ;;  %v1661_v30 = vmin.f32 %v1589_v49, 6.0  ;;  %v2411_v4 = vadd.f32 %v2387_v31, %v5861_v38  ;;  %v6923_v2 = vld [vmem:[#allocation69_spill] sm:$0xff]  ;;  %v3638_v21 = vld [vmem:[#allocation4 + $0x60] sm:$0x3]  ;;  %v2330_v39 = vld [vmem:[#allocation4 + $0x10] sm:$0xff] }
 0x1e4   :  { %v1607_v62 = vmax.f32 %v1533_v61, 0.0  ;;  %v3954_v0 = vmin.f32 %v3930_v60, 6.0  ;;  %v1662_v37 = vmin.f32 %v1590_v26, 6.0  ;;  %v2417_v35 = vadd.f32 %v2393_v36, %v5872_v11  ;;  %v3632_v32 = vld [vmem:[#allocation4] sm:$0xfc] }
 0x1e5   :  { %v1608_v33 = vmax.f32 %v1535_v63, 0.0  ;;  %v3936_v52 = vmax.f32 %v3912_v22, 0.0  ;;  %v2029_v19 = vrot.slane %v1661_v30, 7  ;;  %v2651_v47 = vadd.f32 %v6922_v10, %v2411_v4  ;;  %v2336_v61 = vld [vmem:[#allocation4 + $0x40] sm:$0xff]  ;;  %v2916_v30 = vld [vmem:[#allocation4 + $0x10] sm:$0xfe] }
 0x1e6   :  { %v1679_v40 = vmin.f32 %v1607_v62, 6.0  ;;  %v2973_v20 = vmul.f32 %v6923_v2, %v2914_v58  ;;  %v2030_v42 = vrot.slane %v1662_v37, 7  ;;  %v2657_v25 = vadd.f32 %v6924_v23, %v2417_v35 }
 0x1e7   :  { %v1680_v34 = vmin.f32 %v1608_v33, 6.0  ;;  %v3960_v53 = vmin.f32 %v3936_v52, 6.0  ;;  %2101 = vst [vmem:[#allocation4 + $0xb0] sm:$0xfe] %v2029_v19  ;;  %v2890_v31 = vadd.f32 %v5890_v43, %v2651_v47  ;;  %v2979_v11 = vmul.f32 %v6923_v2, %v6142_v14  ;;  %v6925_v43 = vld [vmem:[#allocation72_spill] sm:$0xff] }
 0x1e8   :  { %v2039_v38 = vrot.slane %v1679_v40, 7  ;;  %v2985_v1 = vmul.f32 %v6923_v2, %v2920_v16  ;;  %2102 = vst [vmem:[#allocation4 + $0xb8] sm:$0xfe] %v2030_v42  ;;  %v2896_v9 = vadd.f32 %v5893_v6, %v2657_v25  ;;  %v3045_v49 = vrot.slane %v2973_v20, 1  ;;  %v3634_v20 = vld [vmem:[#allocation4 + $0x10] sm:$0xfc] }
 0x1e9   :  { %v2041_v59 = vrot.slane %v1680_v34, 7  ;;  %v3978_v36 = vpack.c.bf16 %v3960_v53, %v3954_v0  ;;  %v3046_v60 = vrot.slane %v2979_v11, 1  ;;  %v3691_v26 = vmul.f32 %v6925_v43, %v3632_v32 }
 0x1ea   :  { %v2040_v18 = vsel %vm1720_vm1, %v2029_v19, %v2039_v38  ;;  %2113 = vst [vmem:[#allocation4 + $0x110] sm:$0x1] %v2039_v38  ;;  %v3063_v15 = vrot.slane %v2985_v1, 1  ;;  %v3697_v22 = vmul.f32 %v6925_v43, %v6142_v14  ;;  %v3703_v58 = vmul.f32 %v6925_v43, %v3638_v21  ;;  %v2922_v19 = vld [vmem:[#allocation4 + $0x70] sm:$0x1]  ;;  %v6927_v1 = vld [vmem:[#allocation77_spill] sm:$0xff] }
 0x1eb   :  { %2107 = vst [vmem:[#allocation4 + $0xe0] sm:$0xff] %v2040_v18  ;;  %v2042_v63 = vsel %vm1720_vm1, %v2030_v42, %v2041_v59  ;;  %2114 = vst [vmem:[#allocation4 + $0x118] sm:$0x1] %v2041_v59  ;;  %4459 = vmatprep.mubr.bf16.mxu0 %v3978_v36  ;;  %v2389_v6 = vmul.f32 %v5908_v24, %v2330_v39  ;;  %v3047_v62 = vsel %vm2566_vm2, %v3045_v49, %v3046_v60  ;;  %v3640_v38 = vld [vmem:[#allocation4 + $0x70] sm:$0x3] }
 0x1ec   :  { %2108 = vst [vmem:[#allocation4 + $0xe8] sm:$0xff] %v2042_v63  ;;  %v3064_v0 = vsel %vm2566_vm2, %v3046_v60, %v3063_v15  ;;  %v3763_v4 = vrot.slane %v3691_v26, 2  ;;  %v2395_v37 = vmul.f32 %v5908_v24, %v2336_v61  ;;  %v3129_v33 = vadd.f32 %v3047_v62, %v2890_v31  ;;  %v6926_v31 = vld [vmem:[#allocation76_spill] sm:$0xff]  ;;  %v6195_v15 = vld [vmem:[#allocation4 + $0xc8] sm:$0xff] }
 0x1ed   :  { %v3135_v52 = vadd.f32 %v3064_v0, %v2896_v9  ;;  %v3764_v35 = vrot.slane %v3697_v22, 2  ;;  %v3781_v16 = vrot.slane %v3703_v58, 2  ;;  %v2413_v14 = vadd.f32 %v2389_v6, %v5970_v7  ;;  %v2341_v60 = vld [vmem:[#allocation4 + $0x98] sm:$0xff] }
 0x1ee   :  { %v2419_v40 = vadd.f32 %v2395_v37, %v6003_v41  ;;  %v2975_v10 = vmul.f32 %v5927_v5, %v2916_v30  ;;  %v2981_v47 = vmul.f32 %v5927_v5, %v2336_v61  ;;  %v3369_v42 = vadd.f32 %v5879_v29, %v3129_v33  ;;  %v2448_v62 = vld [vmem:[#allocation2 + $0x98] sm:$0xfe] }
 0x1ef   :  { %v3375_v34 = vadd.f32 %v5898_v54, %v3135_v52  ;;  %v3765_v53 = vsel %vm3284_vm3, %v3763_v4, %v3764_v35  ;;  %v3782_v23 = vsel %vm3284_vm3, %v3764_v35, %v3781_v16  ;;  %v2653_v25 = vadd.f32 %v5964_v57, %v2413_v14  ;;  %v2454_v14 = vld [vmem:[#allocation2 + $0xf8] sm:$0x1] }
 0x1f0   :  { %v2659_v32 = vadd.f32 %v5993_v56, %v2419_v40  ;;  %v2987_v7 = vmul.f32 %v5927_v5, %v2922_v19  ;;  %v3051_v41 = vrot.slane %v2975_v10, 1  ;;  %v3608_v11 = vadd.f32 %v6926_v31, %v3369_v42  ;;  %v2688_v40 = vld [vmem:[#allocation3 + $0x98] sm:$0xfe] }
 0x1f1   :  { %v3614_v21 = vadd.f32 %v6927_v1, %v3375_v34  ;;  %v3052_v39 = vrot.slane %v2981_v47, 1  ;;  %v3693_v29 = vmul.f32 %v6021_v48, %v3634_v20  ;;  %v2892_v54 = vadd.f32 %v6028_v46, %v2653_v25  ;;  %v6928_v46 = vld [vmem:[#allocation75_spill] sm:$0xff] }
 0x1f2   :  { %v2898_v59 = vadd.f32 %v6031_v12, %v2659_v32  ;;  %v3067_v36 = vrot.slane %v2987_v7, 1  ;;  %v3699_v57 = vmul.f32 %v6021_v48, %v2336_v61  ;;  %v3847_v9 = vadd.f32 %v3765_v53, %v3608_v11  ;;  %v6929_v10 = vld [vmem:[#allocation43_spill] sm:$0xff]  ;;  %v6932_v53 = vld [vmem:[#allocation25_spill] sm:$0xff]  ;;  %v6933_v7 = vld [vmem:[#allocation46_spill] sm:$0xff] }
 0x1f3   :  { %v3853_v56 = vadd.f32 %v3782_v23, %v3614_v21  ;;  %v3053_v49 = vsel %vm2566_vm2, %v3051_v41, %v3052_v39  ;;  %v3705_v18 = vmul.f32 %v6021_v48, %v3640_v38  ;;  %v3769_v22 = vrot.slane %v3693_v29, 2  ;;  %v6930_v20 = vld [vmem:[#allocation47_spill] sm:$0xff]  ;;  %v6934_v41 = vld [vmem:[#allocation78_spill] sm:$0xff] }
 0x1f4   :  { %v3068_v26 = vsel %vm2566_vm2, %v3052_v39, %v3067_v36  ;;  %v3131_v63 = vadd.f32 %v3053_v49, %v2892_v54  ;;  %v3770_v58 = vrot.slane %v3699_v57, 2  ;;  %v3903_v6 = vadd.f32 %v6928_v46, %v3847_v9  ;;  %v5094_v11 = vld [vmem:[#allocation13 + $0x100] sm:$0xff]   ;;  %v6935_v39 = vld [vmem:[#allocation37_spill] sm:$0xff]  ;;  %v5095_v57 = vld [vmem:[#allocation13 + $0x148] sm:$0xff]  }
 0x1f5   :  { %v3909_v12 = vadd.f32 %v6928_v46, %v3853_v56  ;;  %v3137_v30 = vadd.f32 %v3068_v26, %v2898_v59  ;;  %v3785_v61 = vrot.slane %v3705_v18, 2  ;;  %v2400_v37 = vmul.f32 %v6907_v17, %v2341_v60  ;;  %v2927_v54 = vld [vmem:[#allocation4 + $0x98] sm:$0xfe] }
 0x1f6   :  { %v3371_v0 = vadd.f32 %v6034_v55, %v3131_v63  ;;  %v3771_v4 = vsel %vm3284_vm3, %v3769_v22, %v3770_v58  ;;  %v2406_v33 = vmul.f32 %v6907_v17, %v6195_v15  ;;  %v3927_v52 = vmax.f32 %v3903_v6, 0.0  ;;  %v6931_v55 = vld [vmem:[#allocation50_spill] sm:$0xff]  ;;  %v6936_v56 = vld [vmem:[#allocation79_spill] sm:$0xff]  ;;  %v6937_v18 = vld [vmem:[#allocation80_spill] sm:$0xff] }
 0x1f7   :  { %v3933_v35 = vmax.f32 %v3909_v12, 0.0  ;;  %v3377_v16 = vadd.f32 %v6037_v3, %v3137_v30  ;;  %v3786_v19 = vsel %vm3284_vm3, %v3770_v58, %v3785_v61  ;;  %v2424_v42 = vadd.f32 %v2400_v37, %v6930_v20  ;;  %v2694_v3 = vld [vmem:[#allocation3 + $0xf8] sm:$0x1] }
 0x1f8   :  { %v3610_v47 = vadd.f32 %v6929_v10, %v3371_v0  ;;  %v2430_v34 = vadd.f32 %v2406_v33, %v6931_v55  ;;  %v2513_v23 = vmul.f32 %v6932_v53, %v2448_v62  ;;  %v3951_v25 = vmin.f32 %v3927_v52, 6.0  ;;  %v2933_v30 = vld [vmem:[#allocation4 + $0xf8] sm:$0x1]  ;;  %v5096_v0 = vld [vmem:[#allocation13 + $0x108] sm:$0xff]   ;;  %v5097_v10 = vld [vmem:[#allocation13 + $0x150] sm:$0xff]  }
 0x1f9   :  { %v3957_v32 = vmin.f32 %v3933_v35, 6.0  ;;  %v3616_v17 = vadd.f32 %v6933_v7, %v3377_v16  ;;  %v2519_v38 = vmul.f32 %v6932_v53, %v6934_v41  ;;  %v2525_v1 = vmul.f32 %v6932_v53, %v2454_v14  ;;  %v3166_v14 = vld [vmem:[#allocation2 + $0x98] sm:$0xfc] }
 0x1fa   :  { %v3849_v31 = vadd.f32 %v3771_v4, %v3610_v47  ;;  %v2600_v21 = vrot.slane %v2513_v23, 1  ;;  %v2753_v29 = vmul.f32 %v6935_v39, %v2688_v40  ;;  %v2759_v49 = vmul.f32 %v6935_v39, %v6936_v56  ;;  %v3172_v40 = vld [vmem:[#allocation2 + $0xf8] sm:$0x3]  ;;  %v3406_v23 = vld [vmem:[#allocation3 + $0x98] sm:$0xfc] }
 0x1fb   :  { %v3975_v59 = vpack.c.bf16 %v3957_v32, %v3951_v25  ;;  %v3855_v36 = vadd.f32 %v3786_v19, %v3616_v17  ;;  %v2601_v9 = vrot.slane %v2519_v38, 1  ;;  %v2617_v26 = vrot.slane %v2525_v1, 1  ;;  %v6938_v17 = vld [vmem:[#allocation26_spill] sm:$0xff]  ;;  %v5098_v1 = vld [vmem:[#allocation13 + $0x110] sm:$0xff]  }
 0x1fc   :  { %v3905_v60 = vadd.f32 %v6937_v18, %v3849_v31  ;;  %v2765_v63 = vmul.f32 %v6935_v39, %v2694_v3  ;;  %v2839_v22 = vrot.slane %v2753_v29, 1  ;;  %v2840_v12 = vrot.slane %v2759_v49, 1 }
 0x1fd   :  { %4411 = vmatmul.mubr.bf16.vlgmr.msra.gmra.mrb[32].mxu1 %v3975_v59  ;;  %v3911_v58 = vadd.f32 %v6937_v18, %v3855_v36  ;;  %v2602_v6 = vsel %vm2566_vm2, %v2600_v21, %v2601_v9  ;;  %v2992_v61 = vmul.f32 %v6908_v13, %v2927_v54  ;;  %v2618_v4 = vsel %vm2566_vm2, %v2601_v9, %v2617_v26  ;;  %v3645_v59 = vld [vmem:[#allocation4 + $0x98] sm:$0xfc]  ;;  %v5099_v36 = vld [vmem:[#allocation13 + $0x158] sm:$0xff]  }
 0x1fe   :  { %v3929_v62 = vmax.f32 %v3905_v60, 0.0  ;;  %4802 = vmatpush3.bf16.msra.mxu1 %v5094_v11  ;;  %v2664_v37 = vadd.f32 %v2602_v6, %v2424_v42  ;;  %v2856_v33 = vrot.slane %v2765_v63, 1  ;;  %v2670_v35 = vadd.f32 %v2618_v4, %v2430_v34  ;;  %v3412_v11 = vld [vmem:[#allocation3 + $0xf8] sm:$0x3] }
 0x1ff   :  { %v3935_v52 = vmax.f32 %v3911_v58, 0.0  ;;  %4803 = vmatprep.subr.bf16.mxu1 %v5095_v57  ;;  %v2841_v16 = vsel %vm2566_vm2, %v2839_v22, %v2840_v12  ;;  %v2998_v19 = vmul.f32 %v6908_v13, %v6195_v15  ;;  %v3004_v53 = vmul.f32 %v6908_v13, %v2933_v30  ;;  %v6939_v13 = vld [vmem:[#allocation39_spill] sm:$0xff] }
 0x200   :  { %v3953_v47 = vmin.f32 %v3929_v62, 6.0  ;;  %v2857_v20 = vsel %vm2566_vm2, %v2840_v12, %v2856_v33  ;;  %v2903_v55 = vadd.f32 %v2841_v16, %v2664_v37  ;;  %v3078_v32 = vrot.slane %v2992_v61, 1  ;;  %v3651_v60 = vld [vmem:[#allocation4 + $0xf8] sm:$0x3]  ;;  %v2130_v61 = vld [vmem:[#allocation2 + $0xa8] sm:$0xff] }
 0x201   :  { %v3959_v42 = vmin.f32 %v3935_v52, 6.0  ;;  %v2909_v25 = vadd.f32 %v2857_v20, %v2670_v35  ;;  %v3079_v7 = vrot.slane %v2998_v19, 1  ;;  %v3095_v34 = vrot.slane %v3004_v53, 1  ;;  %v5100_v62 = vld [vmem:[#allocation13 + $0x118] sm:$0xff]   ;;  %v6245_v52 = vld [vmem:[#allocation2 + $0xd8] sm:$0xff] }
 0x202   :  { %4804 = vmatpush3.bf16.msra.mxu1 %v5096_v0  ;;  %v3231_v38 = vmul.f32 %v6938_v17, %v3166_v14  ;;  %v3237_v3 = vmul.f32 %v6938_v17, %v6934_v41  ;;  %v3243_v31 = vmul.f32 %v6938_v17, %v3172_v40  ;;  %v3471_v29 = vmul.f32 %v6939_v13, %v3406_v23  ;;  %v2236_v35 = vld [vmem:[#allocation3 + $0xa8] sm:$0xff]  ;;  %v5101_v16 = vld [vmem:[#allocation13 + $0x160] sm:$0xff]   ;;  %v6940_v23 = vld [vmem:[#allocation32_spill] sm:$0xff] }
 0x203   :  { %v3977_v21 = vpack.c.bf16 %v3959_v42, %v3953_v47  ;;  %v3080_v39 = vsel %vm2566_vm2, %v3078_v32, %v3079_v7  ;;  %v3477_v54 = vmul.f32 %v6939_v13, %v6936_v56  ;;  %4805 = vmatprep.subr.bf16.mxu1 %v5097_v10  ;;  %v3096_v57 = vsel %vm2566_vm2, %v3079_v7, %v3095_v34  ;;  %v2343_v47 = vld [vmem:[#allocation4 + $0xa8] sm:$0xff]  ;;  %v6941_v17 = vld [vmem:[#allocation44_spill] sm:$0xff] }
 0x204   :  { %v3142_v9 = vadd.f32 %v3080_v39, %v2903_v55  ;;  %v3318_v49 = vrot.slane %v3231_v38, 2  ;;  %v3319_v41 = vrot.slane %v3237_v3, 2  ;;  %v3148_v26 = vadd.f32 %v3096_v57, %v2909_v25  ;;  %v2450_v25 = vld [vmem:[#allocation2 + $0xa8] sm:$0xfe]  ;;  %v2456_v3 = vld [vmem:[#allocation2 + $0x108] sm:$0x1] }
 0x205   :  { %4460 = vmatmul.mubr.bf16.vlgmr.msra.gmra.mrb[40].mxu0 %v3977_v21  ;;  %v3335_v63 = vrot.slane %v3243_v31, 2  ;;  %v3483_v22 = vmul.f32 %v6939_v13, %v3412_v11  ;;  %v3557_v58 = vrot.slane %v3471_v29, 2  ;;  %v3558_v12 = vrot.slane %v3477_v54, 2  ;;  %v5102_v31 = vld [vmem:[#allocation13 + $0x120] sm:$0xff]   ;;  %v2690_v13 = vld [vmem:[#allocation3 + $0xa8] sm:$0xfe] }
 0x206   :  { %v3320_v6 = vsel %vm3284_vm3, %v3318_v49, %v3319_v41  ;;  %v3710_v56 = vmul.f32 %v6909_v50, %v3645_v59  ;;  %v3716_v30 = vmul.f32 %v6909_v50, %v6195_v15  ;;  %4806 = vmatpush3.bf16.msra.mxu1 %v5098_v1  ;;  %v3722_v33 = vmul.f32 %v6909_v50, %v3651_v60  ;;  %v6248_v15 = vld [vmem:[#allocation3 + $0xd8] sm:$0xff]  ;;  %v6942_v57 = vld [vmem:[#allocation33_spill] sm:$0xff] }
 0x207   :  { %v3336_v0 = vsel %vm3284_vm3, %v3319_v41, %v3335_v63  ;;  %v3382_v4 = vadd.f32 %v3320_v6, %v3142_v9  ;;  %v3574_v37 = vrot.slane %v3483_v22, 2  ;;  %4807 = vmatprep.subr.bf16.mxu1 %v5099_v36  ;;  %v3559_v14 = vsel %vm3284_vm3, %v3557_v58, %v3558_v12  ;;  %v6252_v50 = vld [vmem:[#allocation4 + $0xd8] sm:$0xff]  ;;  %v2696_v63 = vld [vmem:[#allocation3 + $0x108] sm:$0x1] }
 0x208   :  { %v3388_v19 = vadd.f32 %v3336_v0, %v3148_v26  ;;  %v3796_v40 = vrot.slane %v3710_v56, 2  ;;  %v3797_v10 = vrot.slane %v3716_v30, 2  ;;  %v3813_v53 = vrot.slane %v3722_v33, 2  ;;  %v5103_v29 = vld [vmem:[#allocation13 + $0x168] sm:$0xff]   ;;  %v2929_v30 = vld [vmem:[#allocation4 + $0xa8] sm:$0xfe] }
 0x209   :  { %v3575_v20 = vsel %vm3284_vm3, %v3558_v12, %v3574_v37  ;;  %v3621_v55 = vadd.f32 %v3559_v14, %v3382_v4  ;;  %v2188_v42 = vmul.f32 %v6940_v23, %v2130_v61  ;;  %v2194_v34 = vmul.f32 %v6940_v23, %v6245_v52  ;;  %v6943_v12 = vld [vmem:[#allocation48_spill] sm:$0xff]  ;;  %v5105_v37 = vld [vmem:[#allocation13 + $0x170] sm:$0xff]  }
 0x20a   :  { %v3627_v32 = vadd.f32 %v3575_v20, %v3388_v19  ;;  %v3798_v7 = vsel %vm3284_vm3, %v3796_v40, %v3797_v10  ;;  %v2295_v38 = vmul.f32 %v6941_v17, %v2236_v35  ;;  %4808 = vmatpush3.bf16.msra.mxu1 %v5100_v62  ;;  %v3814_v11 = vsel %vm3284_vm3, %v3797_v10, %v3813_v53  ;;  %v2935_v19 = vld [vmem:[#allocation4 + $0x108] sm:$0x1]  ;;  %v3168_v20 = vld [vmem:[#allocation2 + $0xa8] sm:$0xfc] }
 0x20b   :  { %v3860_v1 = vadd.f32 %v3798_v7, %v3621_v55  ;;  %v2301_v21 = vmul.f32 %v6941_v17, %v6248_v15  ;;  %v2402_v39 = vmul.f32 %v6910_v8, %v2343_v47  ;;  %4809 = vmatprep.subr.bf16.mxu1 %v5101_v16  ;;  %v2408_v36 = vmul.f32 %v6910_v8, %v6252_v50  ;;  %v5104_v8 = vld [vmem:[#allocation13 + $0x128] sm:$0xff]  }
 0x20c   :  { %v3866_v54 = vadd.f32 %v3814_v11, %v3627_v32  ;;  %v2319_v59 = vadd.f32 %v2295_v38, %v2188_v42  ;;  %v2515_v9 = vmul.f32 %v6942_v57, %v2450_v25  ;;  %v2521_v60 = vmul.f32 %v6942_v57, %v6245_v52  ;;  %v5106_v25 = vld [vmem:[#allocation13 + $0x130] sm:$0xff]  }
 0x20d   :  { %v3916_v49 = vadd.f32 %v6916_v44, %v3860_v1  ;;  %v2325_v41 = vadd.f32 %v2301_v21, %v2194_v34  ;;  %v2527_v26 = vmul.f32 %v6942_v57, %v2456_v3  ;;  %v2755_v56 = vmul.f32 %v6943_v12, %v2690_v13  ;;  %v3174_v38 = vld [vmem:[#allocation2 + $0x108] sm:$0x3]  ;;  %v5107_v3 = vld [vmem:[#allocation13 + $0x178] sm:$0xff]  }
 0x20e   :  { %v3922_v22 = vadd.f32 %v6916_v44, %v3866_v54  ;;  %v2426_v58 = vadd.f32 %v2402_v39, %v2319_v59  ;;  %v2606_v6 = vrot.slane %v2515_v9, 1  ;;  %4810 = vmatpush3.bf16.msra.mxu1 %v5102_v31  ;;  %v2607_v0 = vrot.slane %v2521_v60, 1  ;;  %v6944_v1 = vld [vmem:[#allocation34_spill] sm:$0xff]  ;;  %v3414_v57 = vld [vmem:[#allocation3 + $0x108] sm:$0x3] }
 0x20f   :  { %v3940_v61 = vmax.f32 %v3916_v49, 0.0  ;;  %v2432_v62 = vadd.f32 %v2408_v36, %v2325_v41  ;;  %v2621_v4 = vrot.slane %v2527_v26, 1  ;;  %4811 = vmatprep.subr.bf16.mxu1 %v5103_v29  ;;  %v2761_v35 = vmul.f32 %v6943_v12, %v6248_v15  ;;  %v3408_v13 = vld [vmem:[#allocation3 + $0xa8] sm:$0xfc] }
 0x210   :  { %v3946_v33 = vmax.f32 %v3922_v22, 0.0  ;;  %v2767_v16 = vmul.f32 %v6943_v12, %v2696_v63  ;;  %v2845_v44 = vrot.slane %v2755_v56, 1  ;;  %v2608_v40 = vsel %vm2566_vm2, %v2606_v6, %v2607_v0  ;;  %v3647_v60 = vld [vmem:[#allocation4 + $0xa8] sm:$0xfc]  ;;  %v6945_v22 = vld [vmem:[#allocation49_spill] sm:$0xff] }
 0x211   :  { %v3964_v14 = vmin.f32 %v3940_v61, 6.0  ;;  %v2622_v10 = vsel %vm2566_vm2, %v2607_v0, %v2621_v4  ;;  %v2994_v47 = vmul.f32 %v6911_v28, %v2929_v30  ;;  %v2666_v53 = vadd.f32 %v2608_v40, %v2426_v58  ;;  %v5108_v26 = vld [vmem:[#allocation13 + $0x138] sm:$0xff]   ;;  %v3653_v12 = vld [vmem:[#allocation4 + $0x108] sm:$0x3]  ;;  %v6300_v40 = vld [vmem:[#allocation3 + $0xc0] sm:$0xff] }
 0x212   :  { %v3970_v55 = vmin.f32 %v3946_v33, 6.0  ;;  %v2672_v23 = vadd.f32 %v2622_v10, %v2432_v62  ;;  %v2846_v42 = vrot.slane %v2761_v35, 1  ;;  %4812 = vmatpush3.bf16.msra.mxu1 %v5104_v8  ;;  %v2860_v32 = vrot.slane %v2767_v16, 1  ;;  %v2127_v33 = vld [vmem:[#allocation2 + $0x90] sm:$0xff] }
 0x213   :  { %v3000_v7 = vmul.f32 %v6911_v28, %v6252_v50  ;;  %v3006_v34 = vmul.f32 %v6911_v28, %v2935_v19  ;;  %v3084_v17 = vrot.slane %v2994_v47, 1  ;;  %4813 = vmatprep.subr.bf16.mxu1 %v5105_v37  ;;  %v3233_v21 = vmul.f32 %v6944_v1, %v3168_v20  ;;  %v6298_v19 = vld [vmem:[#allocation2 + $0xc0] sm:$0xff] }
 0x214   :  { %v3982_v31 = vpack.c.bf16 %v3970_v55, %v3964_v14  ;;  %v2847_v11 = vsel %vm2566_vm2, %v2845_v44, %v2846_v42  ;;  %v3239_v39 = vmul.f32 %v6944_v1, %v6245_v52  ;;  %v2861_v29 = vsel %vm2566_vm2, %v2846_v42, %v2860_v32  ;;  %v2233_v14 = vld [vmem:[#allocation3 + $0x90] sm:$0xff] }
 0x215   :  { %v2905_v54 = vadd.f32 %v2847_v11, %v2666_v53  ;;  %v3085_v59 = vrot.slane %v3000_v7, 1  ;;  %v3099_v36 = vrot.slane %v3006_v34, 1  ;;  %v2911_v28 = vadd.f32 %v2861_v29, %v2672_v23  ;;  %v2340_v53 = vld [vmem:[#allocation4 + $0x90] sm:$0xff] }
 0x216   :  { %4418 = vmatprep.mubr.bf16.mxu1 %v3982_v31  ;;  %v3245_v9 = vmul.f32 %v6944_v1, %v3174_v38  ;;  %v3324_v49 = vrot.slane %v3233_v21, 2  ;;  %v3325_v41 = vrot.slane %v3239_v39, 2  ;;  %4814 = vmatpush3.bf16.msra.mxu1 %v5106_v25  ;;  %v3473_v58 = vmul.f32 %v6945_v22, %v3408_v13  ;;  %v6946_v32 = vld [vmem:[#allocation27_spill] sm:$0xff]  ;;  %v2453_v11 = vld [vmem:[#allocation2 + $0xf0] sm:$0x1] }
 0x217   :  { %v3086_v63 = vsel %vm2566_vm2, %v3084_v17, %v3085_v59  ;;  %v3100_v52 = vsel %vm2566_vm2, %v3085_v59, %v3099_v36  ;;  %v3479_v6 = vmul.f32 %v6945_v22, %v6248_v15  ;;  %4815 = vmatprep.subr.bf16.mxu1 %v5107_v3  ;;  %v3485_v62 = vmul.f32 %v6945_v22, %v3414_v57  ;;  %v6947_v17 = vld [vmem:[#allocation35_spill] sm:$0xff] }
 0x218   :  { %v3144_v56 = vadd.f32 %v3086_v63, %v2905_v54  ;;  %v3150_v30 = vadd.f32 %v3100_v52, %v2911_v28  ;;  %v3326_v8 = vsel %vm3284_vm3, %v3324_v49, %v3325_v41  ;;  %v3339_v61 = vrot.slane %v3245_v9, 2  ;;  %v2447_v31 = vld [vmem:[#allocation2 + $0x90] sm:$0xfe] }
 0x219   :  { %v3563_v0 = vrot.slane %v3473_v58, 2  ;;  %v3564_v4 = vrot.slane %v3479_v6, 2  ;;  %v3712_v37 = vmul.f32 %v6914_v45, %v3647_v60  ;;  %v3718_v15 = vmul.f32 %v6914_v45, %v6252_v50  ;;  %v6304_v50 = vld [vmem:[#allocation4 + $0xc0] sm:$0xff]  ;;  %v2687_v29 = vld [vmem:[#allocation3 + $0x90] sm:$0xfe] }
 0x21a   :  { %v3340_v35 = vsel %vm3284_vm3, %v3325_v41, %v3339_v61  ;;  %v3384_v16 = vadd.f32 %v3326_v8, %v3144_v56  ;;  %v3724_v44 = vmul.f32 %v6914_v45, %v3653_v12  ;;  %4816 = vmatpush3.bf16.msra.mxu1 %v5108_v26  ;;  %v3578_v20 = vrot.slane %v3485_v62, 2  ;;  %v6948_v9 = vld [vmem:[#allocation30_spill] sm:$0xff]  ;;  %v6949_v58 = vld [vmem:[#allocation53_spill] sm:$0xff] }
 0x21b   :  { %v3390_v10 = vadd.f32 %v3340_v35, %v3150_v30  ;;  %v3565_v47 = vsel %vm3284_vm3, %v3563_v0, %v3564_v4  ;;  %v3802_v55 = vrot.slane %v3712_v37, 2  ;;  %v3803_v42 = vrot.slane %v3718_v15, 2  ;;  %v2693_v26 = vld [vmem:[#allocation3 + $0xf0] sm:$0x1]  ;;  %v2926_v12 = vld [vmem:[#allocation4 + $0x90] sm:$0xfe] }
 0x21c   :  { %v3623_v23 = vadd.f32 %v3565_v47, %v3384_v16  ;;  %v3817_v25 = vrot.slane %v3724_v44, 2  ;;  %v2185_v7 = vmul.f32 %v6946_v32, %v2127_v33  ;;  %v3579_v45 = vsel %vm3284_vm3, %v3564_v4, %v3578_v20  ;;  %v2932_v37 = vld [vmem:[#allocation4 + $0xf0] sm:$0x1]  ;;  %v3165_v44 = vld [vmem:[#allocation2 + $0x90] sm:$0xfc] }
 0x21d   :  { %v2191_v34 = vmul.f32 %v6946_v32, %v6298_v19  ;;  %v2292_v38 = vmul.f32 %v6947_v17, %v2233_v14  ;;  %v2298_v3 = vmul.f32 %v6947_v17, %v6300_v40  ;;  %v3629_v1 = vadd.f32 %v3579_v45, %v3390_v10  ;;  %v3405_v17 = vld [vmem:[#allocation3 + $0x90] sm:$0xfc] }
 0x21e   :  { %v3804_v21 = vsel %vm3284_vm3, %v3802_v55, %v3803_v42  ;;  %v3818_v39 = vsel %vm3284_vm3, %v3803_v42, %v3817_v25  ;;  %v2399_v13 = vmul.f32 %v6920_v51, %v2340_v53  ;;  %v2405_v57 = vmul.f32 %v6920_v51, %v6304_v50  ;;  %v3171_v42 = vld [vmem:[#allocation2 + $0xf0] sm:$0x3] }
 0x21f   :  { %v3862_v54 = vadd.f32 %v3804_v21, %v3623_v23  ;;  %v2316_v59 = vadd.f32 %v2292_v38, %v2185_v7  ;;  %v2322_v36 = vadd.f32 %v2298_v3, %v2191_v34  ;;  %v3868_v28 = vadd.f32 %v3818_v39, %v3629_v1  ;;  %v6950_v7 = vld [vmem:[#allocation31_spill] sm:$0xff]  ;;  %v3411_v1 = vld [vmem:[#allocation3 + $0xf0] sm:$0x3] }
 0x220   :  { %v2512_v49 = vmul.f32 %v6948_v9, %v2447_v31  ;;  %v2518_v41 = vmul.f32 %v6948_v9, %v6298_v19  ;;  %v2524_v60 = vmul.f32 %v6948_v9, %v2453_v11  ;;  %v2752_v6 = vmul.f32 %v6949_v58, %v2687_v29 }
 0x221   :  { %v3918_v63 = vadd.f32 %v6921_v27, %v3862_v54  ;;  %v2423_v52 = vadd.f32 %v2399_v13, %v2316_v59  ;;  %v2429_v22 = vadd.f32 %v2405_v57, %v2322_v36  ;;  %v3924_v56 = vadd.f32 %v6921_v27, %v3868_v28  ;;  %v6951_v59 = vld [vmem:[#allocation56_spill] sm:$0xff]  ;;  %v3644_v57 = vld [vmem:[#allocation4 + $0x90] sm:$0xfc] }
 0x222   :  { %v2597_v30 = vrot.slane %v2512_v49, 1  ;;  %v2598_v51 = vrot.slane %v2518_v41, 1  ;;  %v2615_v8 = vrot.slane %v2524_v60, 1  ;;  %v2758_v62 = vmul.f32 %v6949_v58, %v6300_v40  ;;  %v3650_v60 = vld [vmem:[#allocation4 + $0xf0] sm:$0x3] }
 0x223   :  { %v3942_v61 = vmax.f32 %v3918_v63, 0.0  ;;  %v2764_v0 = vmul.f32 %v6949_v58, %v2693_v26  ;;  %v2836_v4 = vrot.slane %v2752_v6, 1  ;;  %v3948_v33 = vmax.f32 %v3924_v56, 0.0  ;;  %v2129_v58 = vld [vmem:[#allocation2 + $0xa0] sm:$0xff] }
 0x224   :  { %v2599_v35 = vsel %vm2566_vm2, %v2597_v30, %v2598_v51  ;;  %v2616_v16 = vsel %vm2566_vm2, %v2598_v51, %v2615_v8  ;;  %v2991_v15 = vmul.f32 %v6923_v2, %v2926_v12  ;;  %v2837_v47 = vrot.slane %v2758_v62, 1  ;;  %v6348_v30 = vld [vmem:[#allocation2 + $0xd0] sm:$0xff]  ;;  %v2235_v51 = vld [vmem:[#allocation3 + $0xa0] sm:$0xff] }
 0x225   :  { %v3966_v27 = vmin.f32 %v3942_v61, 6.0  ;;  %v2663_v14 = vadd.f32 %v2599_v35, %v2423_v52  ;;  %v2669_v10 = vadd.f32 %v2616_v16, %v2429_v22  ;;  %v3972_v20 = vmin.f32 %v3948_v33, 6.0  ;;  %v6356_v33 = vld [vmem:[#allocation4 + $0xd0] sm:$0xff] }
 0x226   :  { %v2854_v55 = vrot.slane %v2764_v0, 1  ;;  %v2997_v53 = vmul.f32 %v6923_v2, %v6304_v50  ;;  %v3003_v23 = vmul.f32 %v6923_v2, %v2932_v37  ;;  %v2838_v25 = vsel %vm2566_vm2, %v2836_v4, %v2837_v47  ;;  %v6354_v4 = vld [vmem:[#allocation3 + $0xd0] sm:$0xff]  ;;  %v2342_v37 = vld [vmem:[#allocation4 + $0xa0] sm:$0xff] }
 0x227   :  { %v3075_v32 = vrot.slane %v2991_v15, 1  ;;  %v3230_v45 = vmul.f32 %v6950_v7, %v3165_v44  ;;  %v3236_v34 = vmul.f32 %v6950_v7, %v6298_v19  ;;  %v3984_v38 = vpack.c.bf16 %v3972_v20, %v3966_v27  ;;  %v6952_v44 = vld [vmem:[#allocation41_spill] sm:$0xff] }
 0x228   :  { %v2855_v3 = vsel %vm2566_vm2, %v2837_v47, %v2854_v55  ;;  %v2902_v31 = vadd.f32 %v2838_v25, %v2663_v14  ;;  %v3076_v11 = vrot.slane %v2997_v53, 1  ;;  %v3093_v39 = vrot.slane %v3003_v23, 1  ;;  %v2449_v14 = vld [vmem:[#allocation2 + $0xa0] sm:$0xfe]  ;;  %v6953_v55 = vld [vmem:[#allocation59_spill] sm:$0xff] }
 0x229   :  { %v2908_v21 = vadd.f32 %v2855_v3, %v2669_v10  ;;  %v3242_v2 = vmul.f32 %v6950_v7, %v3171_v42  ;;  %v3315_v13 = vrot.slane %v3230_v45, 2  ;;  %4467 = vmatprep.mubr.bf16.mxu0 %v3984_v38  ;;  %v3316_v54 = vrot.slane %v3236_v34, 2  ;;  %v2455_v25 = vld [vmem:[#allocation2 + $0x100] sm:$0x1]  ;;  %v6954_v34 = vld [vmem:[#allocation42_spill] sm:$0xff] }
 0x22a   :  { %v3077_v29 = vsel %vm2566_vm2, %v3075_v32, %v3076_v11  ;;  %v3470_v36 = vmul.f32 %v6951_v59, %v3405_v17  ;;  %v3476_v19 = vmul.f32 %v6951_v59, %v6300_v40  ;;  %v3094_v28 = vsel %vm2566_vm2, %v3076_v11, %v3093_v39  ;;  %v2689_v32 = vld [vmem:[#allocation3 + $0xa0] sm:$0xfe] }
 0x22b   :  { %v3141_v9 = vadd.f32 %v3077_v29, %v2902_v31  ;;  %v3333_v49 = vrot.slane %v3242_v2, 2  ;;  %v3482_v41 = vmul.f32 %v6951_v59, %v3411_v1  ;;  %v3147_v26 = vadd.f32 %v3094_v28, %v2908_v21  ;;  %v2695_v21 = vld [vmem:[#allocation3 + $0x100] sm:$0x1] }
 0x22c   :  { %v3317_v63 = vsel %vm3284_vm3, %v3315_v13, %v3316_v54  ;;  %v3554_v52 = vrot.slane %v3470_v36, 2  ;;  %v3555_v22 = vrot.slane %v3476_v19, 2  ;;  %v3709_v40 = vmul.f32 %v6925_v43, %v3644_v57  ;;  %v6955_v13 = vld [vmem:[#allocation60_spill] sm:$0xff] }
 0x22d   :  { %v3334_v6 = vsel %vm3284_vm3, %v3316_v54, %v3333_v49  ;;  %v3381_v12 = vadd.f32 %v3317_v63, %v3141_v9  ;;  %v3572_v56 = vrot.slane %v3482_v41, 2  ;;  %v3715_v62 = vmul.f32 %v6925_v43, %v6304_v50  ;;  %v2928_v57 = vld [vmem:[#allocation4 + $0xa0] sm:$0xfe] }
 0x22e   :  { %v3387_v8 = vadd.f32 %v3334_v6, %v3147_v26  ;;  %v3556_v61 = vsel %vm3284_vm3, %v3554_v52, %v3555_v22  ;;  %v3721_v0 = vmul.f32 %v6925_v43, %v3650_v60  ;;  %v3793_v15 = vrot.slane %v3709_v40, 2 }
 0x22f   :  { %v3573_v35 = vsel %vm3284_vm3, %v3555_v22, %v3572_v56  ;;  %v3620_v16 = vadd.f32 %v3556_v61, %v3381_v12  ;;  %v2187_v27 = vmul.f32 %v6952_v44, %v2129_v58  ;;  %v3794_v47 = vrot.slane %v3715_v62, 2  ;;  %v2934_v22 = vld [vmem:[#allocation4 + $0x100] sm:$0x1]  ;;  %v3167_v61 = vld [vmem:[#allocation2 + $0xa0] sm:$0xfc] }
 0x230   :  { %v3626_v10 = vadd.f32 %v3573_v35, %v3387_v8  ;;  %v3811_v20 = vrot.slane %v3721_v0, 2  ;;  %v2193_v50 = vmul.f32 %v6952_v44, %v6348_v30  ;;  %v2294_v43 = vmul.f32 %v6953_v55, %v2235_v51  ;;  %v3173_v62 = vld [vmem:[#allocation2 + $0x100] sm:$0x3] }
 0x231   :  { %v2300_v53 = vmul.f32 %v6953_v55, %v6354_v4  ;;  %v2401_v23 = vmul.f32 %v5908_v24, %v2342_v37  ;;  %v2407_v42 = vmul.f32 %v5908_v24, %v6356_v33  ;;  %v3795_v7 = vsel %vm3284_vm3, %v3793_v15, %v3794_v47  ;;  %v3407_v15 = vld [vmem:[#allocation3 + $0xa0] sm:$0xfc]  ;;  %v3413_v44 = vld [vmem:[#allocation3 + $0x100] sm:$0x3] }
 0x232   :  { %v3812_v45 = vsel %vm3284_vm3, %v3794_v47, %v3811_v20  ;;  %v2514_v17 = vmul.f32 %v6954_v34, %v2449_v14  ;;  %v2520_v38 = vmul.f32 %v6954_v34, %v6348_v30  ;;  %v3859_v3 = vadd.f32 %v3795_v7, %v3620_v16  ;;  %v3646_v7 = vld [vmem:[#allocation4 + $0xa0] sm:$0xfc] }
 0x233   :  { %v3865_v31 = vadd.f32 %v3812_v45, %v3626_v10  ;;  %v2318_v11 = vadd.f32 %v2294_v43, %v2187_v27  ;;  %v2324_v1 = vadd.f32 %v2300_v53, %v2193_v50  ;;  %v2526_v39 = vmul.f32 %v6954_v34, %v2455_v25  ;;  %v6956_v50 = vld [vmem:[#allocation45_spill] sm:$0xff] }
 0x234   :  { %v2603_v2 = vrot.slane %v2514_v17, 1  ;;  %v2604_v24 = vrot.slane %v2520_v38, 1  ;;  %v2754_v29 = vmul.f32 %v6955_v13, %v2689_v32  ;;  %v3915_v54 = vadd.f32 %v6928_v46, %v3859_v3  ;;  %v3652_v3 = vld [vmem:[#allocation4 + $0x100] sm:$0x3] }
 0x235   :  { %v3921_v59 = vadd.f32 %v6928_v46, %v3865_v31  ;;  %v2425_v36 = vadd.f32 %v2401_v23, %v2318_v11  ;;  %v2431_v19 = vadd.f32 %v2407_v42, %v2324_v1  ;;  %v2619_v9 = vrot.slane %v2526_v39, 1  ;;  %v6957_v42 = vld [vmem:[#allocation62_spill] sm:$0xff] }
 0x236   :  { %v2605_v28 = vsel %vm2566_vm2, %v2603_v2, %v2604_v24  ;;  %v2760_v49 = vmul.f32 %v6955_v13, %v6354_v4  ;;  %v2766_v41 = vmul.f32 %v6955_v13, %v2695_v21  ;;  %v3939_v60 = vmax.f32 %v3915_v54, 0.0 }
 0x237   :  { %v3945_v26 = vmax.f32 %v3921_v59, 0.0  ;;  %v2665_v63 = vadd.f32 %v2605_v28, %v2425_v36  ;;  %v2842_v52 = vrot.slane %v2754_v29, 1  ;;  %v2620_v58 = vsel %vm2566_vm2, %v2604_v24, %v2619_v9  ;;  %v2120_v28 = vld [vmem:[#allocation2 + $0x28] sm:$0xff]  ;;  %v6406_v9 = vld [vmem:[#allocation2 + $0x58] sm:$0xff] }
 0x238   :  { %v2843_v6 = vrot.slane %v2760_v49, 1  ;;  %v2858_v46 = vrot.slane %v2766_v41, 1  ;;  %v2993_v12 = vmul.f32 %v5927_v5, %v2928_v57  ;;  %v3963_v56 = vmin.f32 %v3939_v60, 6.0  ;;  %v6958_v60 = vld [vmem:[#allocation23_spill] sm:$0xff] }
 0x239   :  { %v3969_v40 = vmin.f32 %v3945_v26, 6.0  ;;  %v2671_v51 = vadd.f32 %v2620_v58, %v2431_v19  ;;  %v2999_v8 = vmul.f32 %v5927_v5, %v6356_v33  ;;  %v3005_v35 = vmul.f32 %v5927_v5, %v2934_v22  ;;  %v6959_v26 = vld [vmem:[#allocation19_spill] sm:$0xff]  ;;  %v6960_v22 = vld [vmem:[#allocation24_spill] sm:$0xff]  ;;  %v2333_v58 = vld [vmem:[#allocation4 + $0x28] sm:$0xff] }
 0x23a   :  { %v2844_v0 = vsel %vm2566_vm2, %v2842_v52, %v2843_v6  ;;  %v2859_v37 = vsel %vm2566_vm2, %v2843_v6, %v2858_v46  ;;  %v3081_v16 = vrot.slane %v2993_v12, 1  ;;  %v3232_v55 = vmul.f32 %v6956_v50, %v3167_v61  ;;  %v6412_v52 = vld [vmem:[#allocation3 + $0x58] sm:$0xff] }
 0x23b   :  { %v3981_v27 = vpack.c.bf16 %v3969_v40, %v3963_v56  ;;  %v2904_v14 = vadd.f32 %v2844_v0, %v2665_v63  ;;  %v2910_v10 = vadd.f32 %v2859_v37, %v2671_v51  ;;  %v3082_v47 = vrot.slane %v2999_v8, 1  ;;  %v2226_v63 = vld [vmem:[#allocation3 + $0x28] sm:$0xff]  ;;  %v6419_v12 = vld [vmem:[#allocation4 + $0x58] sm:$0xff] }
 0x23c   :  { %v3097_v20 = vrot.slane %v3005_v35, 1  ;;  %v3238_v43 = vmul.f32 %v6956_v50, %v6348_v30  ;;  %v3244_v53 = vmul.f32 %v6956_v50, %v3173_v62  ;;  %v3472_v5 = vmul.f32 %v6957_v42, %v3407_v15  ;;  %v6961_v56 = vld [vmem:[#allocation36_spill] sm:$0xff]  ;;  %v2440_v51 = vld [vmem:[#allocation2 + $0x28] sm:$0xfe] }
 0x23d   :  { %4419 = vmatmul.mubr.bf16.gmra.mrb[36].mxu1 %v3981_v27  ;;  %v3083_v23 = vsel %vm2566_vm2, %v3081_v16, %v3082_v47  ;;  %v3478_v25 = vmul.f32 %v6957_v42, %v6354_v4  ;;  %v3484_v32 = vmul.f32 %v6957_v42, %v3413_v44  ;;  %v3321_v17 = vrot.slane %v3232_v55, 2  ;;  %v6962_v8 = vld [vmem:[#allocation20_spill] sm:$0xff]  ;;  %v2446_v16 = vld [vmem:[#allocation2 + $0x88] sm:$0x1]  ;;  %v2680_v42 = vld [vmem:[#allocation3 + $0x28] sm:$0xfe] }
 0x23e   :  { %v3098_v45 = vsel %vm2566_vm2, %v3082_v47, %v3097_v20  ;;  %v3143_v34 = vadd.f32 %v3083_v23, %v2904_v14  ;;  %v3322_v38 = vrot.slane %v3238_v43, 2  ;;  %v3337_v31 = vrot.slane %v3244_v53, 2 }
 0x23f   :  { %v3149_v30 = vadd.f32 %v3098_v45, %v2910_v10  ;;  %v3560_v11 = vrot.slane %v3472_v5, 2  ;;  %v3561_v1 = vrot.slane %v3478_v25, 2  ;;  %v3576_v39 = vrot.slane %v3484_v32, 2  ;;  %v6963_v45 = vld [vmem:[#allocation28_spill] sm:$0xff] }
 0x240   :  { %v3323_v21 = vsel %vm3284_vm3, %v3321_v17, %v3322_v38  ;;  %v3711_v2 = vmul.f32 %v6021_v48, %v3646_v7  ;;  %v3717_v4 = vmul.f32 %v6021_v48, %v6356_v33  ;;  %v3338_v24 = vsel %vm3284_vm3, %v3322_v38, %v3337_v31  ;;  %v2686_v7 = vld [vmem:[#allocation3 + $0x88] sm:$0x1] }
 0x241   :  { %v3383_v13 = vadd.f32 %v3323_v21, %v3143_v34  ;;  %v3562_v29 = vsel %vm3284_vm3, %v3560_v11, %v3561_v1  ;;  %v3723_v54 = vmul.f32 %v6021_v48, %v3652_v3  ;;  %v3389_v59 = vadd.f32 %v3338_v24, %v3149_v30  ;;  %v2919_v24 = vld [vmem:[#allocation4 + $0x28] sm:$0xfe] }
 0x242   :  { %v3577_v36 = vsel %vm3284_vm3, %v3561_v1, %v3576_v39  ;;  %v3799_v19 = vrot.slane %v3711_v2, 2  ;;  %v3800_v57 = vrot.slane %v3717_v4, 2  ;;  %v6410_v33 = vrot.slane %v6959_v26, %v6958_v60 }
 0x243   :  { %v3622_v49 = vadd.f32 %v3562_v29, %v3383_v13  ;;  %v3815_v41 = vrot.slane %v3723_v54, 2  ;;  %v6416_v48 = vrot.slane %v6960_v22, %v6958_v60  ;;  %v3628_v6 = vadd.f32 %v3577_v36, %v3389_v59  ;;  %v2925_v13 = vld [vmem:[#allocation4 + $0x88] sm:$0x1]  ;;  %v6964_v36 = vld [vmem:[#allocation38_spill] sm:$0xff] }
 0x244   :  { %v3801_v46 = vsel %vm3284_vm3, %v3799_v19, %v3800_v57  ;;  %v6423_v40 = vrot.slane %v6961_v56, %v6958_v60  ;;  %v6427_v61 = vrot.slane %v6962_v8, %v6958_v60  ;;  %v2178_v37 = vmul.f32 %v6410_v33, %v2120_v28 }
 0x245   :  { %v3816_v62 = vsel %vm3284_vm3, %v3800_v57, %v3815_v41  ;;  %v3861_v0 = vadd.f32 %v3801_v46, %v3622_v49  ;;  %v2184_v35 = vmul.f32 %v6410_v33, %v6406_v9  ;;  %v2285_v44 = vmul.f32 %v6416_v48, %v2226_v63  ;;  %v3158_v57 = vld [vmem:[#allocation2 + $0x28] sm:$0xfc] }
 0x246   :  { %v3867_v15 = vadd.f32 %v3816_v62, %v3628_v6  ;;  %v2291_v27 = vmul.f32 %v6416_v48, %v6412_v52  ;;  %v2392_v14 = vmul.f32 %v6423_v40, %v2333_v58  ;;  %v2398_v47 = vmul.f32 %v6423_v40, %v6419_v12  ;;  %v6965_v41 = vld [vmem:[#allocation22_spill] sm:$0xff]  ;;  %v6966_v58 = vld [vmem:[#allocation29_spill] sm:$0xff] }
 0x247   :  { %v3917_v10 = vadd.f32 %v6937_v18, %v3861_v0  ;;  %v2499_v20 = vmul.f32 %v6427_v61, %v2440_v51  ;;  %v2505_v50 = vmul.f32 %v6427_v61, %v6406_v9  ;;  %v2309_v43 = vadd.f32 %v2285_v44, %v2178_v37  ;;  %v3164_v37 = vld [vmem:[#allocation2 + $0x88] sm:$0x3] }
 0x248   :  { %v3923_v55 = vadd.f32 %v6937_v18, %v3867_v15  ;;  %v2315_v53 = vadd.f32 %v2291_v27, %v2184_v35  ;;  %v2511_v23 = vmul.f32 %v6427_v61, %v2446_v16  ;;  %v6447_v34 = vrot.slane %v6963_v45, %v6958_v60  ;;  %v3398_v35 = vld [vmem:[#allocation3 + $0x28] sm:$0xfc] }
 0x249   :  { %v3941_v5 = vmax.f32 %v3917_v10, 0.0  ;;  %v2582_v25 = vrot.slane %v2499_v20, 1  ;;  %v2583_v32 = vrot.slane %v2505_v50, 1  ;;  %v2416_v38 = vadd.f32 %v2392_v14, %v2309_v43  ;;  %v3404_v14 = vld [vmem:[#allocation3 + $0x88] sm:$0x3] }
 0x24a   :  { %v3947_v17 = vmax.f32 %v3923_v55, 0.0  ;;  %v2422_v3 = vadd.f32 %v2398_v47, %v2315_v53  ;;  %v2595_v30 = vrot.slane %v2511_v23, 1  ;;  %v2739_v11 = vmul.f32 %v6447_v34, %v2680_v42 }
 0x24b   :  { %v3965_v31 = vmin.f32 %v3941_v5, 6.0  ;;  %v2584_v18 = vsel %vm2566_vm2, %v2582_v25, %v2583_v32  ;;  %v2745_v1 = vmul.f32 %v6447_v34, %v6412_v52  ;;  %v2751_v4 = vmul.f32 %v6447_v34, %v2686_v7 }
 0x24c   :  { %v3971_v21 = vmin.f32 %v3947_v17, 6.0  ;;  %v2596_v39 = vsel %vm2566_vm2, %v2583_v32, %v2595_v30  ;;  %v2656_v2 = vadd.f32 %v2584_v18, %v2416_v38  ;;  %v2821_v54 = vrot.slane %v2739_v11, 1  ;;  %v3643_v11 = vld [vmem:[#allocation4 + $0x88] sm:$0x3] }
 0x24d   :  { %v2662_v29 = vadd.f32 %v2596_v39, %v2422_v3  ;;  %v2822_v59 = vrot.slane %v2745_v1, 1  ;;  %v6457_v19 = vrot.slane %v6964_v36, %v6958_v60  ;;  %v2834_v49 = vrot.slane %v2751_v4, 1  ;;  %v3637_v3 = vld [vmem:[#allocation4 + $0x28] sm:$0xfc]  ;;  %v6967_v1 = vld [vmem:[#allocation40_spill] sm:$0xff] }
 0x24e   :  { %v3983_v28 = vpack.c.bf16 %v3971_v21, %v3965_v31  ;;  %v6461_v63 = vrot.slane %v6965_v41, %v6958_v60  ;;  %v6465_v6 = vrot.slane %v6966_v58, %v6958_v60  ;;  %v6486_v21 = vrot.slane %v6967_v1, %v6958_v60  ;;  %v2119_v39 = vld [vmem:[#allocation2 + $0x20] sm:$0xff] }
 0x24f   :  { %v2823_v46 = vsel %vm2566_vm2, %v2821_v54, %v2822_v59  ;;  %v2978_v51 = vmul.f32 %v6457_v19, %v2919_v24  ;;  %v2984_v62 = vmul.f32 %v6457_v19, %v6419_v12  ;;  %v2990_v0 = vmul.f32 %v6457_v19, %v2925_v13  ;;  %v6492_v4 = vld [vmem:[%s6729_s4] sm:$0x3f]  ;;  %v6498_v13 = vld [vmem:[#allocation2 + $0x50] sm:$0xff] }
 0x250   :  { %4468 = vmatmul.mubr.bf16.gmra.mrb[44].mxu0 %v3983_v28  ;;  %v2835_v16 = vsel %vm2566_vm2, %v2822_v59, %v2834_v49  ;;  %v2895_v15 = vadd.f32 %v2823_v46, %v2656_v2  ;;  %v3217_v44 = vmul.f32 %v6461_v63, %v3158_v57  ;;  %v3223_v27 = vmul.f32 %v6461_v63, %v6406_v9 }
 0x251   :  { %v2901_v10 = vadd.f32 %v2835_v16, %v2662_v29  ;;  %v3060_v47 = vrot.slane %v2978_v51, 1  ;;  %v3061_v20 = vrot.slane %v2984_v62, 1  ;;  %v3073_v50 = vrot.slane %v2990_v0, 1  ;;  %v6968_v29 = vld [vmem:[#allocation21_spill] sm:$0xff] }
 0x252   :  { %v3229_v55 = vmul.f32 %v6461_v63, %v3164_v37  ;;  %v3300_v43 = vrot.slane %v3217_v44, 2  ;;  %v3301_v53 = vrot.slane %v3223_v27, 2  ;;  %v3457_v23 = vmul.f32 %v6465_v6, %v3398_v35  ;;  %v2225_v0 = vld [vmem:[#allocation3 + $0x20] sm:$0xff]  ;;  %v6511_v37 = vld [vmem:[#allocation3 + $0x50] sm:$0xff] }
 0x253   :  { %v3062_v42 = vsel %vm2566_vm2, %v3060_v47, %v3061_v20  ;;  %v3074_v5 = vsel %vm2566_vm2, %v3061_v20, %v3073_v50  ;;  %v3463_v25 = vmul.f32 %v6465_v6, %v6412_v52  ;;  %v3469_v9 = vmul.f32 %v6465_v6, %v3404_v14  ;;  %v2332_v44 = vld [vmem:[#allocation4 + $0x20] sm:$0xff]  ;;  %v6519_v27 = vld [vmem:[#allocation4 + $0x50] sm:$0xff] }
 0x254   :  { %v3134_v32 = vadd.f32 %v3062_v42, %v2895_v15  ;;  %v3140_v7 = vadd.f32 %v3074_v5, %v2901_v10  ;;  %v3302_v17 = vsel %vm3284_vm3, %v3300_v43, %v3301_v53  ;;  %v3313_v38 = vrot.slane %v3229_v55, 2  ;;  %v2445_v55 = vld [vmem:[#allocation2 + $0x80] sm:$0x1]  ;;  %v2679_v43 = vld [vmem:[#allocation3 + $0x20] sm:$0xfe] }
 0x255   :  { %v3539_v30 = vrot.slane %v3457_v23, 2  ;;  %v3540_v31 = vrot.slane %v3463_v25, 2  ;;  %v3552_v18 = vrot.slane %v3469_v9, 2  ;;  %v6496_v24 = vrot.slane %v6492_v4, %v6958_v60 }
 0x256   :  { %v3314_v2 = vsel %vm3284_vm3, %v3301_v53, %v3313_v38  ;;  %v3374_v52 = vadd.f32 %v3302_v17, %v3134_v32  ;;  %v6502_v54 = vrot.slane %v6959_v26, %v6968_v29  ;;  %v3696_v49 = vmul.f32 %v6486_v21, %v3637_v3  ;;  %v2685_v38 = vld [vmem:[#allocation3 + $0x80] sm:$0x1] }
 0x257   :  { %v3380_v59 = vadd.f32 %v3314_v2, %v3140_v7  ;;  %v3541_v57 = vsel %vm3284_vm3, %v3539_v30, %v3540_v31  ;;  %v3553_v28 = vsel %vm3284_vm3, %v3540_v31, %v3552_v18  ;;  %v3702_v51 = vmul.f32 %v6486_v21, %v6419_v12 }
 0x258   :  { %v3613_v46 = vadd.f32 %v3541_v57, %v3374_v52  ;;  %v3708_v60 = vmul.f32 %v6486_v21, %v3643_v11  ;;  %v2177_v62 = vmul.f32 %v6502_v54, %v2119_v39  ;;  %v3778_v35 = vrot.slane %v3696_v49, 2  ;;  %v2918_v39 = vld [vmem:[#allocation4 + $0x20] sm:$0xfe] }
 0x259   :  { %v3619_v26 = vadd.f32 %v3553_v28, %v3380_v59  ;;  %v2183_v16 = vmul.f32 %v6502_v54, %v6498_v13  ;;  %v6517_v15 = vrot.slane %v6960_v22, %v6968_v29  ;;  %v3779_v12 = vrot.slane %v3702_v51, 2  ;;  %v2439_v22 = vld [vmem:[#allocation2 + $0x20] sm:$0xfe] }
 0x25a   :  { %v3791_v14 = vrot.slane %v3708_v60, 2  ;;  %v6523_v10 = vrot.slane %v6961_v56, %v6968_v29  ;;  %v6527_v47 = vrot.slane %v6962_v8, %v6968_v29  ;;  %v6534_v53 = vrot.slane %v6963_v45, %v6968_v29  ;;  %v2924_v60 = vld [vmem:[#allocation4 + $0x80] sm:$0x1] }
 0x25b   :  { %v2284_v20 = vmul.f32 %v6517_v15, %v2225_v0  ;;  %v2290_v50 = vmul.f32 %v6517_v15, %v6511_v37  ;;  %v6538_v56 = vrot.slane %v6964_v36, %v6968_v29  ;;  %v3780_v23 = vsel %vm3284_vm3, %v3778_v35, %v3779_v12 }
 0x25c   :  { %v3792_v8 = vsel %vm3284_vm3, %v3779_v12, %v3791_v14  ;;  %v2391_v42 = vmul.f32 %v6523_v10, %v2332_v44  ;;  %v2397_v5 = vmul.f32 %v6523_v10, %v6519_v27  ;;  %v3852_v25 = vadd.f32 %v3780_v23, %v3613_v46  ;;  %v3163_v23 = vld [vmem:[#allocation2 + $0x80] sm:$0x3] }
 0x25d   :  { %v3858_v9 = vadd.f32 %v3792_v8, %v3619_v26  ;;  %v2308_v32 = vadd.f32 %v2284_v20, %v2177_v62  ;;  %v2314_v7 = vadd.f32 %v2290_v50, %v2183_v16  ;;  %v2498_v45 = vmul.f32 %v6527_v47, %v2439_v22 }
 0x25e   :  { %v2504_v17 = vmul.f32 %v6527_v47, %v6498_v13  ;;  %v2510_v36 = vmul.f32 %v6527_v47, %v2445_v55  ;;  %v2738_v3 = vmul.f32 %v6534_v53, %v2679_v43  ;;  %v3908_v30 = vadd.f32 %v6496_v24, %v3852_v25  ;;  %v3157_v43 = vld [vmem:[#allocation2 + $0x20] sm:$0xfc] }
 0x25f   :  { %v3914_v31 = vadd.f32 %v6496_v24, %v3858_v9  ;;  %v2415_v18 = vadd.f32 %v2391_v42, %v2308_v32  ;;  %v2421_v11 = vadd.f32 %v2397_v5, %v2314_v7  ;;  %v2579_v2 = vrot.slane %v2498_v45, 1  ;;  %v3397_v9 = vld [vmem:[#allocation3 + $0x20] sm:$0xfc] }
 0x260   :  { %v2580_v52 = vrot.slane %v2504_v17, 1  ;;  %v2593_v59 = vrot.slane %v2510_v36, 1  ;;  %v2744_v57 = vmul.f32 %v6534_v53, %v6511_v37  ;;  %v3932_v28 = vmax.f32 %v3908_v30, 0.0 }
 0x261   :  { %v3938_v49 = vmax.f32 %v3914_v31, 0.0  ;;  %v2750_v46 = vmul.f32 %v6534_v53, %v2685_v38  ;;  %v2818_v51 = vrot.slane %v2738_v3, 1  ;;  %v2977_v35 = vmul.f32 %v6538_v56, %v2918_v39  ;;  %v2132_v39 = vld [vmem:[#allocation2 + $0xb8] sm:$0xff] }
 0x262   :  { %v2581_v62 = vsel %vm2566_vm2, %v2579_v2, %v2580_v52  ;;  %v2594_v0 = vsel %vm2566_vm2, %v2580_v52, %v2593_v59  ;;  %v2819_v26 = vrot.slane %v2744_v57, 1  ;;  %v3956_v16 = vmin.f32 %v3932_v28, 6.0  ;;  %v3636_v28 = vld [vmem:[#allocation4 + $0x20] sm:$0xfc] }
 0x263   :  { %v3962_v44 = vmin.f32 %v3938_v49, 6.0  ;;  %v2655_v12 = vadd.f32 %v2581_v62, %v2415_v18  ;;  %v2661_v14 = vadd.f32 %v2594_v0, %v2421_v11  ;;  %v2832_v50 = vrot.slane %v2750_v46, 1 }
 0x264   :  { %v2820_v20 = vsel %vm2566_vm2, %v2818_v51, %v2819_v26  ;;  %v2983_v22 = vmul.f32 %v6538_v56, %v6519_v27  ;;  %v2989_v55 = vmul.f32 %v6538_v56, %v2924_v60  ;;  %v3057_v5 = vrot.slane %v2977_v35, 1  ;;  %v3642_v60 = vld [vmem:[#allocation4 + $0x80] sm:$0x3] }
 0x265   :  { %v3980_v8 = vpack.c.bf16 %v3962_v44, %v3956_v16  ;;  %v2894_v42 = vadd.f32 %v2820_v20, %v2655_v12  ;;  %v6564_v25 = vrot.slane %v6965_v41, %v6968_v29  ;;  %v2833_v32 = vsel %vm2566_vm2, %v2819_v26, %v2832_v50  ;;  %v3403_v41 = vld [vmem:[#allocation3 + $0x80] sm:$0x3]  ;;  %v6590_v26 = vld [vmem:[#allocation2 + $0xe8] sm:$0xff]  ;;  %v2238_v16 = vld [vmem:[#allocation3 + $0xb8] sm:$0xff] }
 0x266   :  { %v3058_v7 = vrot.slane %v2983_v22, 1  ;;  %v3071_v45 = vrot.slane %v2989_v55, 1  ;;  %v6569_v17 = vrot.slane %v6966_v58, %v6968_v29  ;;  %v2900_v36 = vadd.f32 %v2833_v32, %v2661_v14  ;;  %v2345_v55 = vld [vmem:[#allocation4 + $0xb8] sm:$0xff] }
 0x267   :  { %4508 = vmatprep.mubr.bf16.mxu1 %v3980_v8  ;;  %v3216_v38 = vmul.f32 %v6564_v25, %v3157_v43  ;;  %v3222_v3 = vmul.f32 %v6564_v25, %v6498_v13  ;;  %v3228_v30 = vmul.f32 %v6564_v25, %v3163_v23  ;;  %v6584_v0 = vrot.slane %v6967_v1, %v6968_v29  ;;  %v6601_v43 = vld [vmem:[#allocation4 + $0xe8] sm:$0xff] }
 0x268   :  { %v3059_v31 = vsel %vm2566_vm2, %v3057_v5, %v3058_v7  ;;  %v3072_v18 = vsel %vm2566_vm2, %v3058_v7, %v3071_v45  ;;  %v3456_v11 = vmul.f32 %v6569_v17, %v3397_v9  ;;  %v3462_v58 = vmul.f32 %v6569_v17, %v6511_v37  ;;  %v2452_v9 = vld [vmem:[#allocation2 + $0xb8] sm:$0xfe] }
 0x269   :  { %v3133_v2 = vadd.f32 %v3059_v31, %v2894_v42  ;;  %v3139_v52 = vadd.f32 %v3072_v18, %v2900_v36  ;;  %v3297_v59 = vrot.slane %v3216_v38, 2  ;;  %v3298_v57 = vrot.slane %v3222_v3, 2  ;;  %v2692_v31 = vld [vmem:[#allocation3 + $0xb8] sm:$0xfe] }
 0x26a   :  { %v3311_v49 = vrot.slane %v3228_v30, 2  ;;  %v3468_v13 = vmul.f32 %v6569_v17, %v3403_v41  ;;  %v3536_v46 = vrot.slane %v3456_v11, 2  ;;  %v3537_v51 = vrot.slane %v3462_v58, 2  ;;  %v2458_v41 = vld [vmem:[#allocation2 + $0x118] sm:$0x1] }
 0x26b   :  { %v3299_v62 = vsel %vm3284_vm3, %v3297_v59, %v3298_v57  ;;  %v6588_v37 = vrot.slane %v6492_v4, %v6968_v29  ;;  %v2190_v35 = vmul.f32 %v6410_v33, %v2132_v39  ;;  %v3695_v22 = vmul.f32 %v6584_v0, %v3636_v28  ;;  %v6599_v29 = vld [vmem:[#allocation3 + $0xe8] sm:$0xff]  ;;  %v2698_v59 = vld [vmem:[#allocation3 + $0x118] sm:$0x1] }
 0x26c   :  { %v3312_v44 = vsel %vm3284_vm3, %v3298_v57, %v3311_v49  ;;  %v3373_v12 = vadd.f32 %v3299_v62, %v3133_v2  ;;  %v3538_v14 = vsel %vm3284_vm3, %v3536_v46, %v3537_v51  ;;  %v3550_v20 = vrot.slane %v3468_v13, 2  ;;  %v2931_v62 = vld [vmem:[#allocation4 + $0xb8] sm:$0xfe] }
 0x26d   :  { %v3379_v50 = vadd.f32 %v3312_v44, %v3139_v52  ;;  %v3701_v1 = vmul.f32 %v6584_v0, %v6519_v27  ;;  %v3707_v4 = vmul.f32 %v6584_v0, %v3642_v60  ;;  %v2196_v42 = vmul.f32 %v6410_v33, %v6590_v26 }
 0x26e   :  { %v3551_v23 = vsel %vm3284_vm3, %v3537_v51, %v3550_v20  ;;  %v3612_v8 = vadd.f32 %v3538_v14, %v3373_v12  ;;  %v2297_v5 = vmul.f32 %v6416_v48, %v2238_v16  ;;  %v3775_v7 = vrot.slane %v3695_v22, 2  ;;  %v2937_v22 = vld [vmem:[#allocation4 + $0x118] sm:$0x1] }
 0x26f   :  { %v3618_v32 = vadd.f32 %v3551_v23, %v3379_v50  ;;  %v3776_v45 = vrot.slane %v3701_v1, 2  ;;  %v3789_v27 = vrot.slane %v3707_v4, 2  ;;  %v2303_v36 = vmul.f32 %v6416_v48, %v6599_v29 }
 0x270   :  { %v2321_v38 = vadd.f32 %v2297_v5, %v2190_v35  ;;  %v2404_v3 = vmul.f32 %v6423_v40, %v2345_v55  ;;  %v2410_v30 = vmul.f32 %v6423_v40, %v6601_v43  ;;  %v2517_v11 = vmul.f32 %v6427_v61, %v2452_v9 }
 0x271   :  { %v3777_v33 = vsel %vm3284_vm3, %v3775_v7, %v3776_v45  ;;  %v3790_v18 = vsel %vm3284_vm3, %v3776_v45, %v3789_v27  ;;  %v2523_v58 = vmul.f32 %v6427_v61, %v6590_v26  ;;  %v2327_v48 = vadd.f32 %v2303_v36, %v2196_v42  ;;  %v3410_v7 = vld [vmem:[#allocation3 + $0xb8] sm:$0xfc] }
 0x272   :  { %v3851_v39 = vadd.f32 %v3777_v33, %v3612_v8  ;;  %v3857_v2 = vadd.f32 %v3790_v18, %v3618_v32  ;;  %v2428_v52 = vadd.f32 %v2404_v3, %v2321_v38  ;;  %v2529_v57 = vmul.f32 %v6427_v61, %v2458_v41  ;;  %v3170_v8 = vld [vmem:[#allocation2 + $0xb8] sm:$0xfc]  ;;  %v3176_v32 = vld [vmem:[#allocation2 + $0x118] sm:$0x3] }
 0x273   :  { %v2612_v28 = vrot.slane %v2517_v11, 1  ;;  %v2613_v40 = vrot.slane %v2523_v58, 1  ;;  %v2757_v49 = vmul.f32 %v6447_v34, %v2692_v31  ;;  %v2434_v51 = vadd.f32 %v2410_v30, %v2327_v48  ;;  %v3416_v3 = vld [vmem:[#allocation3 + $0x118] sm:$0x3] }
 0x274   :  { %v3907_v13 = vadd.f32 %v6588_v37, %v3851_v39  ;;  %v3913_v46 = vadd.f32 %v6588_v37, %v3857_v2  ;;  %v2763_v60 = vmul.f32 %v6447_v34, %v6599_v29  ;;  %v2625_v16 = vrot.slane %v2529_v57, 1 }
 0x275   :  { %v2614_v35 = vsel %vm2566_vm2, %v2612_v28, %v2613_v40  ;;  %v2769_v44 = vmul.f32 %v6447_v34, %v2698_v59  ;;  %v2851_v12 = vrot.slane %v2757_v49, 1  ;;  %v2996_v55 = vmul.f32 %v6457_v19, %v2931_v62  ;;  %v3649_v59 = vld [vmem:[#allocation4 + $0xb8] sm:$0xfc] }
 0x276   :  { %v3931_v61 = vmax.f32 %v3907_v13, 0.0  ;;  %v3937_v14 = vmax.f32 %v3913_v46, 0.0  ;;  %v2668_v20 = vadd.f32 %v2614_v35, %v2428_v52  ;;  %v2852_v50 = vrot.slane %v2763_v60, 1  ;;  %v2131_v60 = vld [vmem:[#allocation2 + $0xb0] sm:$0xff] }
 0x277   :  { %v2626_v1 = vsel %vm2566_vm2, %v2613_v40, %v2625_v16  ;;  %v2864_v4 = vrot.slane %v2769_v44, 1  ;;  %v3002_v23 = vmul.f32 %v6457_v19, %v6601_v43  ;;  %v3008_v36 = vmul.f32 %v6457_v19, %v2937_v22  ;;  %v6647_v16 = vld [vmem:[#allocation2 + $0xe0] sm:$0xff]  ;;  %v2237_v44 = vld [vmem:[#allocation3 + $0xb0] sm:$0xff] }
 0x278   :  { %v3955_v42 = vmin.f32 %v3931_v61, 6.0  ;;  %v3961_v5 = vmin.f32 %v3937_v14, 6.0  ;;  %v2674_v9 = vadd.f32 %v2626_v1, %v2434_v51  ;;  %v2853_v34 = vsel %vm2566_vm2, %v2851_v12, %v2852_v50  ;;  %v3655_v51 = vld [vmem:[#allocation4 + $0x118] sm:$0x3]  ;;  %v2344_v22 = vld [vmem:[#allocation4 + $0xb0] sm:$0xff] }
 0x279   :  { %v2865_v45 = vsel %vm2566_vm2, %v2852_v50, %v2864_v4  ;;  %v2907_v27 = vadd.f32 %v2853_v34, %v2668_v20  ;;  %v3090_v38 = vrot.slane %v2996_v55, 1  ;;  %v3091_v31 = vrot.slane %v3002_v23, 1  ;;  %v6651_v50 = vld [vmem:[#allocation3 + $0xe0] sm:$0xff] }
 0x27a   :  { %v3979_v30 = vpack.c.bf16 %v3961_v5, %v3955_v42  ;;  %v2913_v41 = vadd.f32 %v2865_v45, %v2674_v9  ;;  %v3235_v33 = vmul.f32 %v6461_v63, %v3170_v8  ;;  %v3103_v18 = vrot.slane %v3008_v36, 1  ;;  %v6655_v8 = vld [vmem:[#allocation4 + $0xe0] sm:$0xff] }
 0x27b   :  { %v3241_v11 = vmul.f32 %v6461_v63, %v6590_v26  ;;  %v3247_v58 = vmul.f32 %v6461_v63, %v3176_v32  ;;  %v3475_v39 = vmul.f32 %v6465_v6, %v3410_v7  ;;  %v3092_v2 = vsel %vm2566_vm2, %v3090_v38, %v3091_v31  ;;  %v2457_v32 = vld [vmem:[#allocation2 + $0x110] sm:$0x1] }
 0x27c   :  { %4509 = vmatmul.mubr.bf16.vlgmr.msra.gmra.mrb[40].mxu1 %v3979_v30  ;;  %v3330_v48 = vrot.slane %v3235_v33, 2  ;;  %v3481_v19 = vmul.f32 %v6465_v6, %v6599_v29  ;;  %v3487_v52 = vmul.f32 %v6465_v6, %v3416_v3  ;;  %v3104_v57 = vsel %vm2566_vm2, %v3091_v31, %v3103_v18 }
 0x27d   :  { %v3146_v28 = vadd.f32 %v3092_v2, %v2907_v27  ;;  %v3331_v40 = vrot.slane %v3241_v11, 2  ;;  %v3343_v49 = vrot.slane %v3247_v58, 2  ;;  %v3152_v26 = vadd.f32 %v3104_v57, %v2913_v41  ;;  %v2691_v41 = vld [vmem:[#allocation3 + $0xb0] sm:$0xfe]  ;;  %v2697_v11 = vld [vmem:[#allocation3 + $0x110] sm:$0x1] }
 0x27e   :  { %v3569_v13 = vrot.slane %v3475_v39, 2  ;;  %v3570_v63 = vrot.slane %v3481_v19, 2  ;;  %v3582_v46 = vrot.slane %v3487_v52, 2  ;;  %v3714_v29 = vmul.f32 %v6486_v21, %v3649_v59 }
 0x27f   :  { %v3332_v62 = vsel %vm3284_vm3, %v3330_v48, %v3331_v40  ;;  %v3344_v35 = vsel %vm3284_vm3, %v3331_v40, %v3343_v49  ;;  %v3720_v6 = vmul.f32 %v6486_v21, %v6601_v43  ;;  %v3726_v1 = vmul.f32 %v6486_v21, %v3655_v51  ;;  %v2451_v43 = vld [vmem:[#allocation2 + $0xb0] sm:$0xfe]  ;;  %v2936_v49 = vld [vmem:[#allocation4 + $0x110] sm:$0x1] }
 0x280   :  { %v3386_v12 = vadd.f32 %v3332_v62, %v3146_v28  ;;  %v3392_v61 = vadd.f32 %v3344_v35, %v3152_v26  ;;  %v3571_v14 = vsel %vm3284_vm3, %v3569_v13, %v3570_v63  ;;  %v3583_v20 = vsel %vm3284_vm3, %v3570_v63, %v3582_v46  ;;  %v2930_v48 = vld [vmem:[#allocation4 + $0xb0] sm:$0xfe] }
 0x281   :  { %v3808_v4 = vrot.slane %v3714_v29, 2  ;;  %v3809_v55 = vrot.slane %v3720_v6, 2  ;;  %v2189_v23 = vmul.f32 %v6502_v54, %v2131_v60  ;;  %v2195_v9 = vmul.f32 %v6502_v54, %v6647_v16  ;;  %v3169_v51 = vld [vmem:[#allocation2 + $0xb0] sm:$0xfc] }
 0x282   :  { %v3625_v42 = vadd.f32 %v3571_v14, %v3386_v12  ;;  %v3631_v5 = vadd.f32 %v3583_v20, %v3392_v61  ;;  %v2296_v34 = vmul.f32 %v6517_v15, %v2237_v44  ;;  %v3821_v45 = vrot.slane %v3726_v1, 2  ;;  %v3175_v12 = vld [vmem:[#allocation2 + $0x110] sm:$0x3] }
 0x283   :  { %v3810_v7 = vsel %vm3284_vm3, %v3808_v4, %v3809_v55  ;;  %v2302_v21 = vmul.f32 %v6517_v15, %v6651_v50  ;;  %v2403_v27 = vmul.f32 %v6523_v10, %v2344_v22  ;;  %v2409_v3 = vmul.f32 %v6523_v10, %v6655_v8 }
 0x284   :  { %v3864_v36 = vadd.f32 %v3810_v7, %v3625_v42  ;;  %v2320_v38 = vadd.f32 %v2296_v34, %v2189_v23  ;;  %v2516_v30 = vmul.f32 %v6527_v47, %v2451_v43  ;;  %v3822_v54 = vsel %vm3284_vm3, %v3809_v55, %v3821_v45  ;;  %v3409_v43 = vld [vmem:[#allocation3 + $0xb0] sm:$0xfc]  ;;  %v3415_v34 = vld [vmem:[#allocation3 + $0x110] sm:$0x3] }
 0x285   :  { %v2326_v31 = vadd.f32 %v2302_v21, %v2195_v9  ;;  %v2522_v33 = vmul.f32 %v6527_v47, %v6647_v16  ;;  %v2528_v18 = vmul.f32 %v6527_v47, %v2457_v32  ;;  %v3870_v15 = vadd.f32 %v3822_v54, %v3631_v5  ;;  %v3648_v32 = vld [vmem:[#allocation4 + $0xb0] sm:$0xfc] }
 0x286   :  { %v3920_v58 = vadd.f32 %v6496_v24, %v3864_v36  ;;  %v2427_v39 = vadd.f32 %v2403_v27, %v2320_v38  ;;  %v2609_v2 = vrot.slane %v2516_v30, 1  ;;  %v2756_v59 = vmul.f32 %v6534_v53, %v2691_v41  ;;  %v3654_v30 = vld [vmem:[#allocation4 + $0x110] sm:$0x3] }
 0x287   :  { %v2433_v19 = vadd.f32 %v2409_v3, %v2326_v31  ;;  %v2610_v10 = vrot.slane %v2522_v33, 1  ;;  %v2623_v52 = vrot.slane %v2528_v18, 1  ;;  %v3926_v57 = vadd.f32 %v6496_v24, %v3870_v15 }
 0x288   :  { %v3944_v28 = vmax.f32 %v3920_v58, 0.0  ;;  %v2762_v40 = vmul.f32 %v6534_v53, %v6651_v50  ;;  %v2768_v47 = vmul.f32 %v6534_v53, %v2697_v11  ;;  %v2848_v63 = vrot.slane %v2756_v59, 1 }
 0x289   :  { %v2611_v26 = vsel %vm2566_vm2, %v2609_v2, %v2610_v10  ;;  %v2624_v13 = vsel %vm2566_vm2, %v2610_v10, %v2623_v52  ;;  %v2995_v46 = vmul.f32 %v6538_v56, %v2930_v48  ;;  %v3950_v60 = vmax.f32 %v3926_v57, 0.0 }
 0x28a   :  { %v3968_v62 = vmin.f32 %v3944_v28, 6.0  ;;  %v2667_v35 = vadd.f32 %v2611_v26, %v2427_v39  ;;  %v2673_v29 = vadd.f32 %v2624_v13, %v2433_v19  ;;  %v2849_v24 = vrot.slane %v2762_v40, 1 }
 0x28b   :  { %v2862_v6 = vrot.slane %v2768_v47, 1  ;;  %v3001_v44 = vmul.f32 %v6538_v56, %v6655_v8  ;;  %v3007_v53 = vmul.f32 %v6538_v56, %v2936_v49  ;;  %v3974_v61 = vmin.f32 %v3950_v60, 6.0 }
 0x28c   :  { %v3087_v14 = vrot.slane %v2995_v46, 1  ;;  %v3234_v20 = vmul.f32 %v6564_v25, %v3169_v51  ;;  %v3240_v22 = vmul.f32 %v6564_v25, %v6647_v16  ;;  %v2850_v1 = vsel %vm2566_vm2, %v2848_v63, %v2849_v24 }
 0x28d   :  { %v2863_v4 = vsel %vm2566_vm2, %v2849_v24, %v2862_v6  ;;  %v3088_v55 = vrot.slane %v3001_v44, 1  ;;  %v3101_v23 = vrot.slane %v3007_v53, 1  ;;  %v3986_v42 = vpack.c.bf16 %v3974_v61, %v3968_v62  ;;  %v4696_v44 = vld [vmem:[%s6731_s6] ss:$0 sm:$0xff]  ;;  %s5269_s6 = smov [#allocation14]  }
 0x28e   :  { %v2906_v5 = vadd.f32 %v2850_v1, %v2667_v35  ;;  %v2912_v9 = vadd.f32 %v2863_v4, %v2673_v29  ;;  %v3246_v56 = vmul.f32 %v6564_v25, %v3175_v12  ;;  %v3327_v21 = vrot.slane %v3234_v20, 2  ;;  %s4538_s23 = sshll.u32 %s5269_s6, 4  ;;  %s4539_s23 = int_to_ptr.vmem [resolvable:$true] %s4538_s23 }
 0x28f   :  { %v3089_v7 = vsel %vm2566_vm2, %v3087_v14, %v3088_v55  ;;  %v3102_v45 = vsel %vm2566_vm2, %v3088_v55, %v3101_v23  ;;  %v3328_v16 = vrot.slane %v3240_v22, 2  ;;  %4516 = vmatprep.mubr.bf16.mxu1 %v3986_v42  ;;  %v3474_v3 = vmul.f32 %v6569_v17, %v3409_v43  ;;  %s5224_s24 = scalar_lea.vmem %s4539_s23, 512  ;;  %p5229_p13 = scmp.lt.s32.totalorder %s4539_s23, %s4539_s23 }
 0x290   :  { %v3145_v27 = vadd.f32 %v3089_v7, %v2906_v5  ;;  %v3151_v36 = vadd.f32 %v3102_v45, %v2912_v9  ;;  %v3341_v38 = vrot.slane %v3246_v56, 2  ;;  %v3480_v25 = vmul.f32 %v6569_v17, %v6651_v50  ;;  %p5225_p12 = scmp.ne.s32.totalorder %s4539_s23, %s5224_s24  ;;  %p5230_p0 = scmp.lt.s32.totalorder %s5224_s24, %s5224_s24 }
 0x291   :  { %v3329_v41 = vsel %vm3284_vm3, %v3327_v21, %v3328_v16  ;;  %v3486_v54 = vmul.f32 %v6569_v17, %v3415_v34  ;;  %v3713_v31 = vmul.f32 %v6584_v0, %v3648_v32  ;;  %v3566_v11 = vrot.slane %v3474_v3, 2 }
 0x292   :  { %v3342_v33 = vsel %vm3284_vm3, %v3328_v16, %v3341_v38  ;;  %v3385_v18 = vadd.f32 %v3329_v41, %v3145_v27  ;;  %v3719_v15 = vmul.f32 %v6584_v0, %v6655_v8  ;;  %v3567_v39 = vrot.slane %v3480_v25, 2  ;;  %p5231_p1 = por %p5230_p0, %p5229_p13 }
 0x293   :  { %v3391_v58 = vadd.f32 %v3342_v33, %v3151_v36  ;;  %v3580_v2 = vrot.slane %v3486_v54, 2  ;;  %v3725_v48 = vmul.f32 %v6584_v0, %v3654_v30  ;;  %v3805_v17 = vrot.slane %v3713_v31, 2 }
 0x294   :  { %v3806_v19 = vrot.slane %v3719_v15, 2  ;;  %v3568_v10 = vsel %vm3284_vm3, %v3566_v11, %v3567_v39  ;;  %v5110_v11 = vld [vmem:[#allocation5] sm:$0xff]  ;;  %p5232_p2 = pnand %p5231_p1, %p5225_p12 }
 0x295   :  { %v3581_v50 = vsel %vm3284_vm3, %v3567_v39, %v3580_v2  ;;  %v3819_v52 = vrot.slane %v3725_v48, 2  ;;  %v3624_v59 = vadd.f32 %v3568_v10, %v3385_v18  ;;  %v5111_v39 = vld [vmem:[#allocation5 + $0x8] sm:$0xff] }
 0x296   :  { %v3630_v57 = vadd.f32 %v3581_v50, %v3391_v58  ;;  %v3807_v28 = vsel %vm3284_vm3, %v3805_v17, %v3806_v19 }
 0x297   :  { %v3820_v40 = vsel %vm3284_vm3, %v3806_v19, %v3819_v52  ;;  %v3863_v47 = vadd.f32 %v3807_v28, %v3624_v59 }
 0x298   :  { %v3869_v8 = vadd.f32 %v3820_v40, %v3630_v57  ;;  %v5112_v57 = vld [vmem:[#allocation5 + $0x10] sm:$0xff] }
 0x299   :  { %v3919_v49 = vadd.f32 %v6588_v37, %v3863_v47  ;;  %v5113_v47 = vld [vmem:[#allocation5 + $0x18] sm:$0xff] }
 0x29a   :  { %v3925_v26 = vadd.f32 %v6588_v37, %v3869_v8 }
 0x29b   :  { %v3943_v0 = vmax.f32 %v3919_v49, 0.0 }
 0x29c   :  { %v3949_v13 = vmax.f32 %v3925_v26, 0.0 }
 0x29d   :  { %v3967_v63 = vmin.f32 %v3943_v0, 6.0 }
 0x29e   :  { %v3973_v46 = vmin.f32 %v3949_v13, 6.0 }
 0x2a0   :  { %v3985_v51 = vpack.c.bf16 %v3973_v46, %v3967_v63 }
 0x2a2   :  { %4517 = vmatmul.mubr.bf16.gmra.mrb[44].mxu1 %v3985_v51 }
 0x2d0   :  { %v4761_v60 = vpop.f32.mrb[32].mxu1 }
 0x2d1   :  { %v4762_v62 = vpop.f32.mrb[33].mxu1 }
 0x2d2   :  { %v4763_v35 = vadd.f32 %v4762_v62, %v4761_v60  ;;  %v4764_v29 = vpop.f32.mrb[34].mxu1 }
 0x2d3   :  { %v4765_v24 = vpop.f32.mrb[35].mxu1 }
 0x2d4   :  { %v4766_v6 = vadd.f32 %v4765_v24, %v4764_v29  ;;  %v4413_v12 = vadd.f32 %v4763_v35, %v4696_v44 }
 0x2d6   :  { %v4416_v20 = vadd.f32 %v4766_v6, %v4696_v44 }
 0x2d8   :  { %v4789_v53 = vpop.f32.mrb[40].mxu0 }
 0x2d9   :  { %v4790_v61 = vpop.f32.mrb[41].mxu0 }
 0x2da   :  { %v4791_v37 = vadd.f32 %v4790_v61, %v4789_v53  ;;  %v4792_v14 = vpop.f32.mrb[42].mxu0 }
 0x2db   :  { %v4793_v22 = vpop.f32.mrb[43].mxu0 }
 0x2dc   :  { %v4462_v1 = vadd.f32 %v4791_v37, %v4413_v12  ;;  %v4794_v4 = vadd.f32 %v4793_v22, %v4792_v14 }
 0x2de   :  { %v4465_v55 = vadd.f32 %v4794_v4, %v4416_v20 }
 0x310   :  { %v4767_v23 = vpop.f32.mrb[36].mxu1 }
 0x311   :  { %v4768_v43 = vpop.f32.mrb[37].mxu1 }
 0x312   :  { %v4769_v42 = vadd.f32 %v4768_v43, %v4767_v23  ;;  %v4770_v5 = vpop.f32.mrb[38].mxu1 }
 0x313   :  { %v4771_v9 = vpop.f32.mrb[39].mxu1 }
 0x314   :  { %v4772_v56 = vadd.f32 %v4771_v9, %v4770_v5  ;;  %v4421_v32 = vadd.f32 %v4769_v42, %v4696_v44 }
 0x316   :  { %v4424_v16 = vadd.f32 %v4772_v56, %v4696_v44 }
 0x323   :  { %v4795_v34 = vpop.f32.mrb[44].mxu0 }
 0x324   :  { %v4796_v7 = vpop.f32.mrb[45].mxu0 }
 0x325   :  { %v4797_v45 = vadd.f32 %v4796_v7, %v4795_v34  ;;  %v4798_v21 = vpop.f32.mrb[46].mxu0 }
 0x326   :  { %v4799_v27 = vpop.f32.mrb[47].mxu0 }
 0x327   :  { %v4470_v36 = vadd.f32 %v4797_v45, %v4421_v32  ;;  %v4800_v38 = vadd.f32 %v4799_v27, %v4798_v21 }
 0x329   :  { %v4473_v3 = vadd.f32 %v4800_v38, %v4424_v16 }
 0x34f   :  { %v4817_v30 = vpop.f32.mrb[40].mxu1 }
 0x350   :  { %v4818_v41 = vpop.f32.mrb[41].mxu1 }
 0x351   :  { %v4819_v25 = vadd.f32 %v4818_v41, %v4817_v30  ;;  %v4820_v54 = vpop.f32.mrb[42].mxu1 }
 0x352   :  { %v4821_v31 = vpop.f32.mrb[43].mxu1 }
 0x353   :  { %v4511_v33 = vadd.f32 %v4819_v25, %v4462_v1  ;;  %v4822_v18 = vadd.f32 %v4821_v31, %v4820_v54 }
 0x355   :  { %v4525_v15 = vadd.f32 %v5110_v11, %v4511_v33  ;;  %v4514_v58 = vadd.f32 %v4822_v18, %v4465_v55 }
 0x357   :  { %4529 = vst [vmem:[#allocation14] sm:$0xff] %v4525_v15  ;;  %v4526_v2 = vadd.f32 %v5111_v39, %v4514_v58 }
 0x359   :  { %4530 = vst [vmem:[#allocation14 + $0x8] sm:$0xff] %v4526_v2 }
 0x375   :  { %v4823_v48 = vpop.f32.mrb[44].mxu1 }
 0x376   :  { %v4824_v19 = vpop.f32.mrb[45].mxu1 }
 0x377   :  { %v4825_v10 = vadd.f32 %v4824_v19, %v4823_v48  ;;  %v4826_v50 = vpop.f32.mrb[46].mxu1 }
 0x378   :  { %v4827_v17 = vpop.f32.mrb[47].mxu1 }
 0x379   :  { %v4519_v52 = vadd.f32 %v4825_v10, %v4470_v36  ;;  %v4828_v59 = vadd.f32 %v4827_v17, %v4826_v50 }
 0x37b   :  { %v4527_v28 = vadd.f32 %v5112_v57, %v4519_v52  ;;  %v4522_v40 = vadd.f32 %v4828_v59, %v4473_v3 }
 0x37d   :  { %4531 = vst [vmem:[#allocation14 + $0x10] sm:$0xff] %v4527_v28  ;;  %v4528_v8 = vadd.f32 %v5113_v47, %v4522_v40 }
 0x37f   :  { %4532 = vst [vmem:[#allocation14 + $0x18] sm:$0xff] %v4528_v8 }
 0x380   :  { %5235 = shalt.err (!%p5232_p2)
}
 0x381   :  { %s5236_s26 = scalar_lea.hbm %s6732_s7, 512 }
 0x382   :  { %p5237_p3 = scmp.ne.s32.totalorder %s6732_s7, %s5236_s26  ;;  %p5240_p4 = scmp.lt.u32.totalorder %s5236_s26, %s6732_s7 }
 0x384   :  { %p5242_p5 = pnand %p5240_p4, %p5237_p3 }
 0x386   :  { %5245 = shalt.err (!%p5242_p5)
}
 0x387   :  { %4544 = dma.vmem_to_hbm [thread:$0]  %s4539_s23, 512, %s6732_s7, [#allocation7], %s5261_s3, %s5261_s3, %s5262_s15  }
 0x388   :  { %5252 = dma.done.wait [#allocation7], 512  }
 0x389   :  { %5253 = vsyncadd [#allocation7], 4294966784 }
 0x38a   :  { %4548 = vsyncpa [#allocation6], 1 }
 0x38b   :  { %4549 = vsyncpa [#allocation9], 1 }
 0x38c   :  { %4550 = vsyncpa [#allocation12], 1 }
 0x38d   :  { %4551 = vsyncpa [#allocation7], 1 }

</bundles_post_ra>
